<compile_context>
chip_gen: v6e
topology: v6e:2x2x1
jax: 0.10.0
libtpu: 0.0.40
codegen_flags: <defaults>
</compile_context>

<pallas_src>
import functools

import jax
import jax.numpy as jnp
from jax import lax
from jax.experimental import pallas as pl
from jax.experimental.pallas import tpu as pltpu


# ----------------------------- Pallas kernel ------------------------------- #

def _svf_exp_kernel(rowcol_ref, flow_ref, out_ref, *, H, W, T, Bt,
                    use_reshape, unroll):
    """Processes one block of Bt batch elements, fully resident in VMEM.

    rowcol_ref : (2, HW)      f32 constants: row 0 = p // W, row 1 = p % W
    flow_ref   : (Bt, 2, HW)  velocity field (chan 0 = y disp, chan 1 = x disp)
    out_ref    : (Bt, 2, HW)  integrated displacement field
    """
    HW = H * W
    f32 = jnp.float32

    # ---- constants hoisted once per grid step (shared by all Bt*T steps) ----
    h_idx = rowcol_ref[0:1, :]                                        # (1, HW) p // W
    w_idx = rowcol_ref[1:2, :]                                        # (1, HW) p %  W
    r_iota = lax.broadcasted_iota(jnp.int32, (H, 1), 0).astype(f32)   # (H, 1)
    s_iota = lax.broadcasted_iota(jnp.int32, (W, 1), 0).astype(f32)   # (W, 1)

    if use_reshape:
        mask_r = None
        s_wt = None
    else:
        # Fallback "unflatten" via one-hot matmul (only used when Mosaic
        # refuses the lane->sublane reshape).
        #   mask_r[r, p] = (p // W == r),   s_wt[q, w] = (q % W == w)
        mask_r = r_iota == h_idx                                      # (H, HW) bool
        q_f = lax.broadcasted_iota(jnp.int32, (HW, 1), 0).astype(f32)  # (HW, 1)
        # float row/col trick: exact while H*W < 2**22 (asserted in wrapper)
        hq = jnp.floor((q_f + 0.5) * f32(1.0 / W))
        wq = q_f - hq * f32(W)                                        # (HW, 1) q % W
        w_row = lax.broadcasted_iota(jnp.int32, (1, W), 1).astype(f32)
        s_wt = (wq == w_row).astype(f32)                              # (HW, W)

    half_h = f32(0.5 * (H - 1))
    half_w = f32(0.5 * (W - 1))
    max_y = f32(H - 1)
    max_x = f32(W - 1)
    scale = f32(1.0 / (2.0 ** T))

    def unflatten(v):
        """(1, HW) flat row vector -> (H, W) image (matmul LHS)."""
        if use_reshape:
            return v.reshape(H, W)
        return jnp.dot(jnp.where(mask_r, v, f32(0.0)), s_wt,
                       preferred_element_type=f32)

    def step(_, carry):
        xy, xx = carry                                                # (1, HW) each
        # Absolute border-clamped sample coordinates:
        #   (flow + ref + 1)/2 * (S-1) == flow*(S-1)/2 + pixel_index
        iy = jnp.clip(xy * half_h + h_idx, f32(0.0), max_y)           # (1, HW)
        ix = jnp.clip(xx * half_w + w_idx, f32(0.0), max_x)           # (1, HW)

        # Separable bilinear weights as tent functions (exact, incl. border).
        ry = jnp.maximum(f32(1.0) - jnp.abs(r_iota - iy), f32(0.0))   # (H, HW)
        cx = jnp.maximum(f32(1.0) - jnp.abs(s_iota - ix), f32(0.0))   # (W, HW)

        img_y = unflatten(xy)                                         # (H, W)
        img_x = unflatten(xx)                                         # (H, W)

        # Column interpolation on the MXU: (H, W) @ (W, HW) -> (H, HW).
        t2y = jnp.dot(img_y, cx, preferred_element_type=f32)
        t2x = jnp.dot(img_x, cx, preferred_element_type=f32)

        # Row interpolation: elementwise (VPU) + sublane reduce (XLU).
        wy = jnp.sum(ry * t2y, axis=0, keepdims=True)                 # (1, HW)
        wx = jnp.sum(ry * t2x, axis=0, keepdims=True)                 # (1, HW)
        return (xy + wy, xx + wx)

    for b in range(Bt):  # static unroll over the batch block
        xb = flow_ref[b] * scale                                      # (2, HW)
        xy0 = xb[0:1, :]
        xx0 = xb[1:2, :]
        xyT, xxT = lax.fori_loop(0, T, step, (xy0, xx0), unroll=unroll)
        out_ref[b] = jnp.concatenate([xyT, xxT], axis=0)


# ------------------------------- wrapper ------------------------------------ #

def _physical_vmem_bytes():
    try:
        info = pltpu.get_tpu_info()
        for name in ("vmem_capacity_bytes", "vmem_bytes", "vmem_size_bytes"):
            v = getattr(info, name, None)
            if v:
                return int(v)
    except Exception:
        pass
    return 64 * 1024 * 1024  # conservative: v7x physical; below v5e/v6e's 128 MiB


def _choose_bt(B, H, W, vmem_limit_bytes):
    """Largest batch block that fits VMEM and keeps >= 2 grid steps when B >= 2
    (so both v7x TensorCores get work; harmless on single-TC v5e/v6e)."""
    HW = H * W
    io_per_b = 2 * 2 * HW * 4 * 2            # in + out blocks, double-buffered
    hot = (3 * H + W + 16) * HW * 4          # weights + t2 tiles + coords (hot set)
    const = 2 * 2 * HW * 4                   # rowcol constant input
    budget = vmem_limit_bytes - hot - const
    cap = int(max(1, min(8, budget // io_per_b))) if budget > io_per_b else 1
    best = 1
    for bt in range(1, B + 1):
        if B % bt != 0 or bt > cap:
            continue
        if B >= 2 and B // bt < 2:
            continue
        best = bt
    return best


def svf_exp_pallas(flow, time_step=7):
    """flow: (B, 2, H, W) float32 velocity field (NCHW). Returns (B, 2, H, W)."""
    B, C, H, W = flow.shape
    assert C == 2, "2D flow expected (C == number of spatial dims == 2)"
    HW = H * W
    # keeps the float row/col-index trick of the fallback path exact
    assert HW < (1 << 22), "field too large for the float index trick"

    flow_flat = flow.reshape(B, C, HW).astype(jnp.float32)

    # Per-pixel (row, col) indices, computed exactly on the host side.
    p = jnp.arange(HW, dtype=jnp.int32)
    rowcol = jnp.stack([(p // W).astype(jnp.float32),
                        (p % W).astype(jnp.float32)], axis=0)         # (2, HW)

    vmem_limit = int(0.85 * _physical_vmem_bytes())                   # gen-aware cap
    Bt = _choose_bt(B, H, W, vmem_limit)
    unroll = bool(HW <= 4096)   # 7 steps are serially dependent; unroll tiny fields only

    def build(use_reshape):
        kernel = functools.partial(
            _svf_exp_kernel, H=H, W=W, T=time_step, Bt=Bt,
            use_reshape=use_reshape, unroll=unroll)
        return pl.pallas_call(
            kernel,
            out_shape=jax.ShapeDtypeStruct((B, C, HW), jnp.float32),
            grid=(B // Bt,),
            in_specs=[pl.BlockSpec((2, HW), lambda g: (0, 0)),
                      pl.BlockSpec((Bt, C, HW), lambda g: (g, 0, 0))],
            out_specs=pl.BlockSpec((Bt, C, HW), lambda g: (g, 0, 0)),
            compiler_params=pltpu.CompilerParams(
                dimension_semantics=("parallel",),
                vmem_limit_bytes=vmem_limit,
            ),
        )

    # Preferred path: in-kernel reshape for the flat->image layout change.
    # Fallback: one-hot unflatten matmul (always lowers) if Mosaic rejects it.
    last_err = None
    for use_reshape in (True, False):
        try:
            out = jax.block_until_ready(build(use_reshape)(rowcol, flow_flat))
            return out.reshape(B, C, H, W)
        except Exception as e:  # lowering / compile failure -> fall back
            last_err = e
    raise last_err


# ------------------------- pure-JAX reference check ------------------------- #

def svf_exp_ref(flow, time_step=7):
    B, C, H, W = flow.shape
    ref_y = jnp.linspace(-1.0, 1.0, H, dtype=jnp.float32)
    ref_x = jnp.linspace(-1.0, 1.0, W, dtype=jnp.float32)
    gy, gx = jnp.meshgrid(ref_y, ref_x, indexing="ij")

    def warp_one(img):  # img: (2, H, W) — warp img by ddf=img (border, bilinear)
        y = img[0] + gy
        x = img[1] + gx
        iy = jnp.clip((y + 1.0) * 0.5 * (H - 1), 0.0, float(H - 1))
        ix = jnp.clip((x + 1.0) * 0.5 * (W - 1), 0.0, float(W - 1))
        iy0f = jnp.floor(iy)
        ix0f = jnp.floor(ix)
        wy1 = iy - iy0f
        wx1 = ix - ix0f
        iy0 = iy0f.astype(jnp.int32)
        ix0 = ix0f.astype(jnp.int32)
        iy1 = jnp.minimum(iy0 + 1, H - 1)
        ix1 = jnp.minimum(ix0 + 1, W - 1)

        def g(yy, xx):
            return img[:, yy, xx]

        return ((1 - wy1) * (1 - wx1) * g(iy0, ix0)
                + (1 - wy1) * wx1 * g(iy0, ix1)
                + wy1 * (1 - wx1) * g(iy1, ix0)
                + wy1 * wx1 * g(iy1, ix1))

    f = flow.astype(jnp.float32) / (2.0 ** time_step)
    for _ in range(time_step):
        f = f + jax.vmap(warp_one)(f)
    return f


# --------------------------------- main -------------------------------------- #

if __name__ == "__main__":
    key = jax.random.PRNGKey(0)
    B, C, H, W = 2, 2, 16, 16
    flow = 0.5 * jax.random.normal(key, (B, C, H, W), dtype=jnp.float32)

    out = svf_exp_pallas(flow, time_step=7)
    out = jax.block_until_ready(out)

    ref = jax.block_until_ready(svf_exp_ref(flow, time_step=7))
    max_err = float(jnp.max(jnp.abs(out - ref)))
    assert max_err < 2e-3, f"mismatch vs reference: max abs err = {max_err}"

    print("KERNEL_OK")
</pallas_src>

<mosaic_0001>
module attributes {stable_mosaic.version = 11 : i64} {
  func.func @_svf_exp_kernel(%arg0: i32, %arg1: memref<2x256xf32, #tpu.memory_space<vmem>>, %arg2: memref<1x2x256xf32, #tpu.memory_space<vmem>>, %arg3: memref<1x2x256xf32, #tpu.memory_space<vmem>>) attributes {dimension_semantics = [#tpu.dimension_semantics<parallel>], iteration_bounds = array<i64: 2>, scalar_prefetch = 0 : i64, scratch_operands = 0 : i64, tpu.core_type = #tpu.core_type<tc>, window_params = [{pipeline_mode = #tpu.pipeline_mode<synchronous>, transform_indices = @transform_0, window_bounds = array<i64: 2, 256>}, {transform_indices = @transform_1, window_bounds = array<i64: 1, 2, 256>}, {transform_indices = @transform_2, window_bounds = array<i64: 1, 2, 256>}]} {
    %c0 = arith.constant 0 : index
    %c0_0 = arith.constant 0 : index
    %0 = vector.load %arg1[%c0, %c0_0] : memref<2x256xf32, #tpu.memory_space<vmem>>, vector<1x256xf32>
    %c1 = arith.constant 1 : index
    %c0_1 = arith.constant 0 : index
    %1 = vector.load %arg1[%c1, %c0_1] : memref<2x256xf32, #tpu.memory_space<vmem>>, vector<1x256xf32>
    %2 = tpu.iota {dimensions = array<i32: 0>} : vector<16x1xi32>
    %3 = arith.sitofp %2 : vector<16x1xi32> to vector<16x1xf32>
    %4 = tpu.iota {dimensions = array<i32: 0>} : vector<16x1xi32>
    %5 = arith.sitofp %4 : vector<16x1xi32> to vector<16x1xf32>
    %c0_2 = arith.constant 0 : index
    %c0_3 = arith.constant 0 : index
    %c0_4 = arith.constant 0 : index
    %6 = vector.load %arg2[%c0_2, %c0_3, %c0_4] : memref<1x2x256xf32, #tpu.memory_space<vmem>>, vector<1x2x256xf32>
    %7 = vector.shape_cast %6 : vector<1x2x256xf32> to vector<2x256xf32>
    %cst = arith.constant 7.812500e-03 : f32
    %8 = vector.broadcast %cst : f32 to vector<2x256xf32>
    %9 = arith.mulf %7, %8 : vector<2x256xf32>
    %10 = vector.extract_strided_slice %9 {offsets = [0, 0], sizes = [1, 256], strides = [1, 1]} : vector<2x256xf32> to vector<1x256xf32>
    %11 = vector.extract_strided_slice %9 {offsets = [1, 0], sizes = [1, 256], strides = [1, 1]} : vector<2x256xf32> to vector<1x256xf32>
    %cst_5 = arith.constant 7.500000e+00 : f32
    %cst_6 = arith.constant 1.500000e+01 : f32
    %cst_7 = arith.constant 7.500000e+00 : f32
    %cst_8 = arith.constant 1.500000e+01 : f32
    %c0_i32 = arith.constant 0 : i32
    %12 = vector.broadcast %cst_5 : f32 to vector<1x256xf32>
    %13 = arith.mulf %10, %12 : vector<1x256xf32>
    %14 = arith.addf %13, %0 : vector<1x256xf32>
    %cst_9 = arith.constant 0.000000e+00 : f32
    %15 = vector.broadcast %cst_9 : f32 to vector<1x256xf32>
    %16 = arith.maximumf %15, %14 : vector<1x256xf32>
    %17 = vector.broadcast %cst_6 : f32 to vector<1x256xf32>
    %18 = arith.minimumf %17, %16 : vector<1x256xf32>
    %19 = vector.broadcast %cst_7 : f32 to vector<1x256xf32>
    %20 = arith.mulf %11, %19 : vector<1x256xf32>
    %21 = arith.addf %20, %1 : vector<1x256xf32>
    %cst_10 = arith.constant 0.000000e+00 : f32
    %22 = vector.broadcast %cst_10 : f32 to vector<1x256xf32>
    %23 = arith.maximumf %22, %21 : vector<1x256xf32>
    %24 = vector.broadcast %cst_8 : f32 to vector<1x256xf32>
    %25 = arith.minimumf %24, %23 : vector<1x256xf32>
    %26 = vector.broadcast %3 : vector<16x1xf32> to vector<16x256xf32>
    %27 = vector.broadcast %18 : vector<1x256xf32> to vector<16x256xf32>
    %28 = arith.subf %26, %27 : vector<16x256xf32>
    %29 = math.absf %28 : vector<16x256xf32>
    %cst_11 = arith.constant 1.000000e+00 : f32
    %30 = vector.broadcast %cst_11 : f32 to vector<16x256xf32>
    %31 = arith.subf %30, %29 : vector<16x256xf32>
    %cst_12 = arith.constant 0.000000e+00 : f32
    %32 = vector.broadcast %cst_12 : f32 to vector<16x256xf32>
    %33 = arith.maximumf %31, %32 : vector<16x256xf32>
    %34 = vector.broadcast %5 : vector<16x1xf32> to vector<16x256xf32>
    %35 = vector.broadcast %25 : vector<1x256xf32> to vector<16x256xf32>
    %36 = arith.subf %34, %35 : vector<16x256xf32>
    %37 = math.absf %36 : vector<16x256xf32>
    %cst_13 = arith.constant 1.000000e+00 : f32
    %38 = vector.broadcast %cst_13 : f32 to vector<16x256xf32>
    %39 = arith.subf %38, %37 : vector<16x256xf32>
    %cst_14 = arith.constant 0.000000e+00 : f32
    %40 = vector.broadcast %cst_14 : f32 to vector<16x256xf32>
    %41 = arith.maximumf %39, %40 : vector<16x256xf32>
    %42 = vector.shape_cast %10 : vector<1x256xf32> to vector<16x16xf32>
    %43 = vector.shape_cast %11 : vector<1x256xf32> to vector<16x16xf32>
    %cst_15 = arith.constant dense<0.000000e+00> : vector<16x256xf32>
    %44 = tpu.matmul %42, %41, %cst_15 {dimension_numbers = #tpu.dot_dimension_numbers<[1], [0], [0], [1], [0, 0, 1, 1], [], []>} : vector<16x16xf32>, vector<16x256xf32>, vector<16x256xf32> -> vector<16x256xf32>
    %cst_16 = arith.constant dense<0.000000e+00> : vector<16x256xf32>
    %45 = tpu.matmul %43, %41, %cst_16 {dimension_numbers = #tpu.dot_dimension_numbers<[1], [0], [0], [1], [0, 0, 1, 1], [], []>} : vector<16x16xf32>, vector<16x256xf32>, vector<16x256xf32> -> vector<16x256xf32>
    %46 = arith.mulf %33, %44 : vector<16x256xf32>
    %cst_17 = arith.constant dense<0.000000e+00> : vector<256xf32>
    %47 = vector.multi_reduction <add>, %46, %cst_17 [0] : vector<16x256xf32> to vector<256xf32>
    %48 = vector.shape_cast %47 : vector<256xf32> to vector<1x256xf32>
    %49 = arith.mulf %33, %45 : vector<16x256xf32>
    %cst_18 = arith.constant dense<0.000000e+00> : vector<256xf32>
    %50 = vector.multi_reduction <add>, %49, %cst_18 [0] : vector<16x256xf32> to vector<256xf32>
    %51 = vector.shape_cast %50 : vector<256xf32> to vector<1x256xf32>
    %52 = arith.addf %10, %48 : vector<1x256xf32>
    %53 = arith.addf %11, %51 : vector<1x256xf32>
    %c1_i32 = arith.constant 1 : i32
    %54 = vector.broadcast %cst_5 : f32 to vector<1x256xf32>
    %55 = arith.mulf %52, %54 : vector<1x256xf32>
    %56 = arith.addf %55, %0 : vector<1x256xf32>
    %cst_19 = arith.constant 0.000000e+00 : f32
    %57 = vector.broadcast %cst_19 : f32 to vector<1x256xf32>
    %58 = arith.maximumf %57, %56 : vector<1x256xf32>
    %59 = vector.broadcast %cst_6 : f32 to vector<1x256xf32>
    %60 = arith.minimumf %59, %58 : vector<1x256xf32>
    %61 = vector.broadcast %cst_7 : f32 to vector<1x256xf32>
    %62 = arith.mulf %53, %61 : vector<1x256xf32>
    %63 = arith.addf %62, %1 : vector<1x256xf32>
    %cst_20 = arith.constant 0.000000e+00 : f32
    %64 = vector.broadcast %cst_20 : f32 to vector<1x256xf32>
    %65 = arith.maximumf %64, %63 : vector<1x256xf32>
    %66 = vector.broadcast %cst_8 : f32 to vector<1x256xf32>
    %67 = arith.minimumf %66, %65 : vector<1x256xf32>
    %68 = vector.broadcast %3 : vector<16x1xf32> to vector<16x256xf32>
    %69 = vector.broadcast %60 : vector<1x256xf32> to vector<16x256xf32>
    %70 = arith.subf %68, %69 : vector<16x256xf32>
    %71 = math.absf %70 : vector<16x256xf32>
    %cst_21 = arith.constant 1.000000e+00 : f32
    %72 = vector.broadcast %cst_21 : f32 to vector<16x256xf32>
    %73 = arith.subf %72, %71 : vector<16x256xf32>
    %cst_22 = arith.constant 0.000000e+00 : f32
    %74 = vector.broadcast %cst_22 : f32 to vector<16x256xf32>
    %75 = arith.maximumf %73, %74 : vector<16x256xf32>
    %76 = vector.broadcast %5 : vector<16x1xf32> to vector<16x256xf32>
    %77 = vector.broadcast %67 : vector<1x256xf32> to vector<16x256xf32>
    %78 = arith.subf %76, %77 : vector<16x256xf32>
    %79 = math.absf %78 : vector<16x256xf32>
    %cst_23 = arith.constant 1.000000e+00 : f32
    %80 = vector.broadcast %cst_23 : f32 to vector<16x256xf32>
    %81 = arith.subf %80, %79 : vector<16x256xf32>
    %cst_24 = arith.constant 0.000000e+00 : f32
    %82 = vector.broadcast %cst_24 : f32 to vector<16x256xf32>
    %83 = arith.maximumf %81, %82 : vector<16x256xf32>
    %84 = vector.shape_cast %52 : vector<1x256xf32> to vector<16x16xf32>
    %85 = vector.shape_cast %53 : vector<1x256xf32> to vector<16x16xf32>
    %cst_25 = arith.constant dense<0.000000e+00> : vector<16x256xf32>
    %86 = tpu.matmul %84, %83, %cst_25 {dimension_numbers = #tpu.dot_dimension_numbers<[1], [0], [0], [1], [0, 0, 1, 1], [], []>} : vector<16x16xf32>, vector<16x256xf32>, vector<16x256xf32> -> vector<16x256xf32>
    %cst_26 = arith.constant dense<0.000000e+00> : vector<16x256xf32>
    %87 = tpu.matmul %85, %83, %cst_26 {dimension_numbers = #tpu.dot_dimension_numbers<[1], [0], [0], [1], [0, 0, 1, 1], [], []>} : vector<16x16xf32>, vector<16x256xf32>, vector<16x256xf32> -> vector<16x256xf32>
    %88 = arith.mulf %75, %86 : vector<16x256xf32>
    %cst_27 = arith.constant dense<0.000000e+00> : vector<256xf32>
    %89 = vector.multi_reduction <add>, %88, %cst_27 [0] : vector<16x256xf32> to vector<256xf32>
    %90 = vector.shape_cast %89 : vector<256xf32> to vector<1x256xf32>
    %91 = arith.mulf %75, %87 : vector<16x256xf32>
    %cst_28 = arith.constant dense<0.000000e+00> : vector<256xf32>
    %92 = vector.multi_reduction <add>, %91, %cst_28 [0] : vector<16x256xf32> to vector<256xf32>
    %93 = vector.shape_cast %92 : vector<256xf32> to vector<1x256xf32>
    %94 = arith.addf %52, %90 : vector<1x256xf32>
    %95 = arith.addf %53, %93 : vector<1x256xf32>
    %c2_i32 = arith.constant 2 : i32
    %96 = vector.broadcast %cst_5 : f32 to vector<1x256xf32>
    %97 = arith.mulf %94, %96 : vector<1x256xf32>
    %98 = arith.addf %97, %0 : vector<1x256xf32>
    %cst_29 = arith.constant 0.000000e+00 : f32
    %99 = vector.broadcast %cst_29 : f32 to vector<1x256xf32>
    %100 = arith.maximumf %99, %98 : vector<1x256xf32>
    %101 = vector.broadcast %cst_6 : f32 to vector<1x256xf32>
    %102 = arith.minimumf %101, %100 : vector<1x256xf32>
    %103 = vector.broadcast %cst_7 : f32 to vector<1x256xf32>
    %104 = arith.mulf %95, %103 : vector<1x256xf32>
    %105 = arith.addf %104, %1 : vector<1x256xf32>
    %cst_30 = arith.constant 0.000000e+00 : f32
    %106 = vector.broadcast %cst_30 : f32 to vector<1x256xf32>
    %107 = arith.maximumf %106, %105 : vector<1x256xf32>
    %108 = vector.broadcast %cst_8 : f32 to vector<1x256xf32>
    %109 = arith.minimumf %108, %107 : vector<1x256xf32>
    %110 = vector.broadcast %3 : vector<16x1xf32> to vector<16x256xf32>
    %111 = vector.broadcast %102 : vector<1x256xf32> to vector<16x256xf32>
    %112 = arith.subf %110, %111 : vector<16x256xf32>
    %113 = math.absf %112 : vector<16x256xf32>
    %cst_31 = arith.constant 1.000000e+00 : f32
    %114 = vector.broadcast %cst_31 : f32 to vector<16x256xf32>
    %115 = arith.subf %114, %113 : vector<16x256xf32>
    %cst_32 = arith.constant 0.000000e+00 : f32
    %116 = vector.broadcast %cst_32 : f32 to vector<16x256xf32>
    %117 = arith.maximumf %115, %116 : vector<16x256xf32>
    %118 = vector.broadcast %5 : vector<16x1xf32> to vector<16x256xf32>
    %119 = vector.broadcast %109 : vector<1x256xf32> to vector<16x256xf32>
    %120 = arith.subf %118, %119 : vector<16x256xf32>
    %121 = math.absf %120 : vector<16x256xf32>
    %cst_33 = arith.constant 1.000000e+00 : f32
    %122 = vector.broadcast %cst_33 : f32 to vector<16x256xf32>
    %123 = arith.subf %122, %121 : vector<16x256xf32>
    %cst_34 = arith.constant 0.000000e+00 : f32
    %124 = vector.broadcast %cst_34 : f32 to vector<16x256xf32>
    %125 = arith.maximumf %123, %124 : vector<16x256xf32>
    %126 = vector.shape_cast %94 : vector<1x256xf32> to vector<16x16xf32>
    %127 = vector.shape_cast %95 : vector<1x256xf32> to vector<16x16xf32>
    %cst_35 = arith.constant dense<0.000000e+00> : vector<16x256xf32>
    %128 = tpu.matmul %126, %125, %cst_35 {dimension_numbers = #tpu.dot_dimension_numbers<[1], [0], [0], [1], [0, 0, 1, 1], [], []>} : vector<16x16xf32>, vector<16x256xf32>, vector<16x256xf32> -> vector<16x256xf32>
    %cst_36 = arith.constant dense<0.000000e+00> : vector<16x256xf32>
    %129 = tpu.matmul %127, %125, %cst_36 {dimension_numbers = #tpu.dot_dimension_numbers<[1], [0], [0], [1], [0, 0, 1, 1], [], []>} : vector<16x16xf32>, vector<16x256xf32>, vector<16x256xf32> -> vector<16x256xf32>
    %130 = arith.mulf %117, %128 : vector<16x256xf32>
    %cst_37 = arith.constant dense<0.000000e+00> : vector<256xf32>
    %131 = vector.multi_reduction <add>, %130, %cst_37 [0] : vector<16x256xf32> to vector<256xf32>
    %132 = vector.shape_cast %131 : vector<256xf32> to vector<1x256xf32>
    %133 = arith.mulf %117, %129 : vector<16x256xf32>
    %cst_38 = arith.constant dense<0.000000e+00> : vector<256xf32>
    %134 = vector.multi_reduction <add>, %133, %cst_38 [0] : vector<16x256xf32> to vector<256xf32>
    %135 = vector.shape_cast %134 : vector<256xf32> to vector<1x256xf32>
    %136 = arith.addf %94, %132 : vector<1x256xf32>
    %137 = arith.addf %95, %135 : vector<1x256xf32>
    %c3_i32 = arith.constant 3 : i32
    %138 = vector.broadcast %cst_5 : f32 to vector<1x256xf32>
    %139 = arith.mulf %136, %138 : vector<1x256xf32>
    %140 = arith.addf %139, %0 : vector<1x256xf32>
    %cst_39 = arith.constant 0.000000e+00 : f32
    %141 = vector.broadcast %cst_39 : f32 to vector<1x256xf32>
    %142 = arith.maximumf %141, %140 : vector<1x256xf32>
    %143 = vector.broadcast %cst_6 : f32 to vector<1x256xf32>
    %144 = arith.minimumf %143, %142 : vector<1x256xf32>
    %145 = vector.broadcast %cst_7 : f32 to vector<1x256xf32>
    %146 = arith.mulf %137, %145 : vector<1x256xf32>
    %147 = arith.addf %146, %1 : vector<1x256xf32>
    %cst_40 = arith.constant 0.000000e+00 : f32
    %148 = vector.broadcast %cst_40 : f32 to vector<1x256xf32>
    %149 = arith.maximumf %148, %147 : vector<1x256xf32>
    %150 = vector.broadcast %cst_8 : f32 to vector<1x256xf32>
    %151 = arith.minimumf %150, %149 : vector<1x256xf32>
    %152 = vector.broadcast %3 : vector<16x1xf32> to vector<16x256xf32>
    %153 = vector.broadcast %144 : vector<1x256xf32> to vector<16x256xf32>
    %154 = arith.subf %152, %153 : vector<16x256xf32>
    %155 = math.absf %154 : vector<16x256xf32>
    %cst_41 = arith.constant 1.000000e+00 : f32
    %156 = vector.broadcast %cst_41 : f32 to vector<16x256xf32>
    %157 = arith.subf %156, %155 : vector<16x256xf32>
    %cst_42 = arith.constant 0.000000e+00 : f32
    %158 = vector.broadcast %cst_42 : f32 to vector<16x256xf32>
    %159 = arith.maximumf %157, %158 : vector<16x256xf32>
    %160 = vector.broadcast %5 : vector<16x1xf32> to vector<16x256xf32>
    %161 = vector.broadcast %151 : vector<1x256xf32> to vector<16x256xf32>
    %162 = arith.subf %160, %161 : vector<16x256xf32>
    %163 = math.absf %162 : vector<16x256xf32>
    %cst_43 = arith.constant 1.000000e+00 : f32
    %164 = vector.broadcast %cst_43 : f32 to vector<16x256xf32>
    %165 = arith.subf %164, %163 : vector<16x256xf32>
    %cst_44 = arith.constant 0.000000e+00 : f32
    %166 = vector.broadcast %cst_44 : f32 to vector<16x256xf32>
    %167 = arith.maximumf %165, %166 : vector<16x256xf32>
    %168 = vector.shape_cast %136 : vector<1x256xf32> to vector<16x16xf32>
    %169 = vector.shape_cast %137 : vector<1x256xf32> to vector<16x16xf32>
    %cst_45 = arith.constant dense<0.000000e+00> : vector<16x256xf32>
    %170 = tpu.matmul %168, %167, %cst_45 {dimension_numbers = #tpu.dot_dimension_numbers<[1], [0], [0], [1], [0, 0, 1, 1], [], []>} : vector<16x16xf32>, vector<16x256xf32>, vector<16x256xf32> -> vector<16x256xf32>
    %cst_46 = arith.constant dense<0.000000e+00> : vector<16x256xf32>
    %171 = tpu.matmul %169, %167, %cst_46 {dimension_numbers = #tpu.dot_dimension_numbers<[1], [0], [0], [1], [0, 0, 1, 1], [], []>} : vector<16x16xf32>, vector<16x256xf32>, vector<16x256xf32> -> vector<16x256xf32>
    %172 = arith.mulf %159, %170 : vector<16x256xf32>
    %cst_47 = arith.constant dense<0.000000e+00> : vector<256xf32>
    %173 = vector.multi_reduction <add>, %172, %cst_47 [0] : vector<16x256xf32> to vector<256xf32>
    %174 = vector.shape_cast %173 : vector<256xf32> to vector<1x256xf32>
    %175 = arith.mulf %159, %171 : vector<16x256xf32>
    %cst_48 = arith.constant dense<0.000000e+00> : vector<256xf32>
    %176 = vector.multi_reduction <add>, %175, %cst_48 [0] : vector<16x256xf32> to vector<256xf32>
    %177 = vector.shape_cast %176 : vector<256xf32> to vector<1x256xf32>
    %178 = arith.addf %136, %174 : vector<1x256xf32>
    %179 = arith.addf %137, %177 : vector<1x256xf32>
    %c4_i32 = arith.constant 4 : i32
    %180 = vector.broadcast %cst_5 : f32 to vector<1x256xf32>
    %181 = arith.mulf %178, %180 : vector<1x256xf32>
    %182 = arith.addf %181, %0 : vector<1x256xf32>
    %cst_49 = arith.constant 0.000000e+00 : f32
    %183 = vector.broadcast %cst_49 : f32 to vector<1x256xf32>
    %184 = arith.maximumf %183, %182 : vector<1x256xf32>
    %185 = vector.broadcast %cst_6 : f32 to vector<1x256xf32>
    %186 = arith.minimumf %185, %184 : vector<1x256xf32>
    %187 = vector.broadcast %cst_7 : f32 to vector<1x256xf32>
    %188 = arith.mulf %179, %187 : vector<1x256xf32>
    %189 = arith.addf %188, %1 : vector<1x256xf32>
    %cst_50 = arith.constant 0.000000e+00 : f32
    %190 = vector.broadcast %cst_50 : f32 to vector<1x256xf32>
    %191 = arith.maximumf %190, %189 : vector<1x256xf32>
    %192 = vector.broadcast %cst_8 : f32 to vector<1x256xf32>
    %193 = arith.minimumf %192, %191 : vector<1x256xf32>
    %194 = vector.broadcast %3 : vector<16x1xf32> to vector<16x256xf32>
    %195 = vector.broadcast %186 : vector<1x256xf32> to vector<16x256xf32>
    %196 = arith.subf %194, %195 : vector<16x256xf32>
    %197 = math.absf %196 : vector<16x256xf32>
    %cst_51 = arith.constant 1.000000e+00 : f32
    %198 = vector.broadcast %cst_51 : f32 to vector<16x256xf32>
    %199 = arith.subf %198, %197 : vector<16x256xf32>
    %cst_52 = arith.constant 0.000000e+00 : f32
    %200 = vector.broadcast %cst_52 : f32 to vector<16x256xf32>
    %201 = arith.maximumf %199, %200 : vector<16x256xf32>
    %202 = vector.broadcast %5 : vector<16x1xf32> to vector<16x256xf32>
    %203 = vector.broadcast %193 : vector<1x256xf32> to vector<16x256xf32>
    %204 = arith.subf %202, %203 : vector<16x256xf32>
    %205 = math.absf %204 : vector<16x256xf32>
    %cst_53 = arith.constant 1.000000e+00 : f32
    %206 = vector.broadcast %cst_53 : f32 to vector<16x256xf32>
    %207 = arith.subf %206, %205 : vector<16x256xf32>
    %cst_54 = arith.constant 0.000000e+00 : f32
    %208 = vector.broadcast %cst_54 : f32 to vector<16x256xf32>
    %209 = arith.maximumf %207, %208 : vector<16x256xf32>
    %210 = vector.shape_cast %178 : vector<1x256xf32> to vector<16x16xf32>
    %211 = vector.shape_cast %179 : vector<1x256xf32> to vector<16x16xf32>
    %cst_55 = arith.constant dense<0.000000e+00> : vector<16x256xf32>
    %212 = tpu.matmul %210, %209, %cst_55 {dimension_numbers = #tpu.dot_dimension_numbers<[1], [0], [0], [1], [0, 0, 1, 1], [], []>} : vector<16x16xf32>, vector<16x256xf32>, vector<16x256xf32> -> vector<16x256xf32>
    %cst_56 = arith.constant dense<0.000000e+00> : vector<16x256xf32>
    %213 = tpu.matmul %211, %209, %cst_56 {dimension_numbers = #tpu.dot_dimension_numbers<[1], [0], [0], [1], [0, 0, 1, 1], [], []>} : vector<16x16xf32>, vector<16x256xf32>, vector<16x256xf32> -> vector<16x256xf32>
    %214 = arith.mulf %201, %212 : vector<16x256xf32>
    %cst_57 = arith.constant dense<0.000000e+00> : vector<256xf32>
    %215 = vector.multi_reduction <add>, %214, %cst_57 [0] : vector<16x256xf32> to vector<256xf32>
    %216 = vector.shape_cast %215 : vector<256xf32> to vector<1x256xf32>
    %217 = arith.mulf %201, %213 : vector<16x256xf32>
    %cst_58 = arith.constant dense<0.000000e+00> : vector<256xf32>
    %218 = vector.multi_reduction <add>, %217, %cst_58 [0] : vector<16x256xf32> to vector<256xf32>
    %219 = vector.shape_cast %218 : vector<256xf32> to vector<1x256xf32>
    %220 = arith.addf %178, %216 : vector<1x256xf32>
    %221 = arith.addf %179, %219 : vector<1x256xf32>
    %c5_i32 = arith.constant 5 : i32
    %222 = vector.broadcast %cst_5 : f32 to vector<1x256xf32>
    %223 = arith.mulf %220, %222 : vector<1x256xf32>
    %224 = arith.addf %223, %0 : vector<1x256xf32>
    %cst_59 = arith.constant 0.000000e+00 : f32
    %225 = vector.broadcast %cst_59 : f32 to vector<1x256xf32>
    %226 = arith.maximumf %225, %224 : vector<1x256xf32>
    %227 = vector.broadcast %cst_6 : f32 to vector<1x256xf32>
    %228 = arith.minimumf %227, %226 : vector<1x256xf32>
    %229 = vector.broadcast %cst_7 : f32 to vector<1x256xf32>
    %230 = arith.mulf %221, %229 : vector<1x256xf32>
    %231 = arith.addf %230, %1 : vector<1x256xf32>
    %cst_60 = arith.constant 0.000000e+00 : f32
    %232 = vector.broadcast %cst_60 : f32 to vector<1x256xf32>
    %233 = arith.maximumf %232, %231 : vector<1x256xf32>
    %234 = vector.broadcast %cst_8 : f32 to vector<1x256xf32>
    %235 = arith.minimumf %234, %233 : vector<1x256xf32>
    %236 = vector.broadcast %3 : vector<16x1xf32> to vector<16x256xf32>
    %237 = vector.broadcast %228 : vector<1x256xf32> to vector<16x256xf32>
    %238 = arith.subf %236, %237 : vector<16x256xf32>
    %239 = math.absf %238 : vector<16x256xf32>
    %cst_61 = arith.constant 1.000000e+00 : f32
    %240 = vector.broadcast %cst_61 : f32 to vector<16x256xf32>
    %241 = arith.subf %240, %239 : vector<16x256xf32>
    %cst_62 = arith.constant 0.000000e+00 : f32
    %242 = vector.broadcast %cst_62 : f32 to vector<16x256xf32>
    %243 = arith.maximumf %241, %242 : vector<16x256xf32>
    %244 = vector.broadcast %5 : vector<16x1xf32> to vector<16x256xf32>
    %245 = vector.broadcast %235 : vector<1x256xf32> to vector<16x256xf32>
    %246 = arith.subf %244, %245 : vector<16x256xf32>
    %247 = math.absf %246 : vector<16x256xf32>
    %cst_63 = arith.constant 1.000000e+00 : f32
    %248 = vector.broadcast %cst_63 : f32 to vector<16x256xf32>
    %249 = arith.subf %248, %247 : vector<16x256xf32>
    %cst_64 = arith.constant 0.000000e+00 : f32
    %250 = vector.broadcast %cst_64 : f32 to vector<16x256xf32>
    %251 = arith.maximumf %249, %250 : vector<16x256xf32>
    %252 = vector.shape_cast %220 : vector<1x256xf32> to vector<16x16xf32>
    %253 = vector.shape_cast %221 : vector<1x256xf32> to vector<16x16xf32>
    %cst_65 = arith.constant dense<0.000000e+00> : vector<16x256xf32>
    %254 = tpu.matmul %252, %251, %cst_65 {dimension_numbers = #tpu.dot_dimension_numbers<[1], [0], [0], [1], [0, 0, 1, 1], [], []>} : vector<16x16xf32>, vector<16x256xf32>, vector<16x256xf32> -> vector<16x256xf32>
    %cst_66 = arith.constant dense<0.000000e+00> : vector<16x256xf32>
    %255 = tpu.matmul %253, %251, %cst_66 {dimension_numbers = #tpu.dot_dimension_numbers<[1], [0], [0], [1], [0, 0, 1, 1], [], []>} : vector<16x16xf32>, vector<16x256xf32>, vector<16x256xf32> -> vector<16x256xf32>
    %256 = arith.mulf %243, %254 : vector<16x256xf32>
    %cst_67 = arith.constant dense<0.000000e+00> : vector<256xf32>
    %257 = vector.multi_reduction <add>, %256, %cst_67 [0] : vector<16x256xf32> to vector<256xf32>
    %258 = vector.shape_cast %257 : vector<256xf32> to vector<1x256xf32>
    %259 = arith.mulf %243, %255 : vector<16x256xf32>
    %cst_68 = arith.constant dense<0.000000e+00> : vector<256xf32>
    %260 = vector.multi_reduction <add>, %259, %cst_68 [0] : vector<16x256xf32> to vector<256xf32>
    %261 = vector.shape_cast %260 : vector<256xf32> to vector<1x256xf32>
    %262 = arith.addf %220, %258 : vector<1x256xf32>
    %263 = arith.addf %221, %261 : vector<1x256xf32>
    %c6_i32 = arith.constant 6 : i32
    %264 = vector.broadcast %cst_5 : f32 to vector<1x256xf32>
    %265 = arith.mulf %262, %264 : vector<1x256xf32>
    %266 = arith.addf %265, %0 : vector<1x256xf32>
    %cst_69 = arith.constant 0.000000e+00 : f32
    %267 = vector.broadcast %cst_69 : f32 to vector<1x256xf32>
    %268 = arith.maximumf %267, %266 : vector<1x256xf32>
    %269 = vector.broadcast %cst_6 : f32 to vector<1x256xf32>
    %270 = arith.minimumf %269, %268 : vector<1x256xf32>
    %271 = vector.broadcast %cst_7 : f32 to vector<1x256xf32>
    %272 = arith.mulf %263, %271 : vector<1x256xf32>
    %273 = arith.addf %272, %1 : vector<1x256xf32>
    %cst_70 = arith.constant 0.000000e+00 : f32
    %274 = vector.broadcast %cst_70 : f32 to vector<1x256xf32>
    %275 = arith.maximumf %274, %273 : vector<1x256xf32>
    %276 = vector.broadcast %cst_8 : f32 to vector<1x256xf32>
    %277 = arith.minimumf %276, %275 : vector<1x256xf32>
    %278 = vector.broadcast %3 : vector<16x1xf32> to vector<16x256xf32>
    %279 = vector.broadcast %270 : vector<1x256xf32> to vector<16x256xf32>
    %280 = arith.subf %278, %279 : vector<16x256xf32>
    %281 = math.absf %280 : vector<16x256xf32>
    %cst_71 = arith.constant 1.000000e+00 : f32
    %282 = vector.broadcast %cst_71 : f32 to vector<16x256xf32>
    %283 = arith.subf %282, %281 : vector<16x256xf32>
    %cst_72 = arith.constant 0.000000e+00 : f32
    %284 = vector.broadcast %cst_72 : f32 to vector<16x256xf32>
    %285 = arith.maximumf %283, %284 : vector<16x256xf32>
    %286 = vector.broadcast %5 : vector<16x1xf32> to vector<16x256xf32>
    %287 = vector.broadcast %277 : vector<1x256xf32> to vector<16x256xf32>
    %288 = arith.subf %286, %287 : vector<16x256xf32>
    %289 = math.absf %288 : vector<16x256xf32>
    %cst_73 = arith.constant 1.000000e+00 : f32
    %290 = vector.broadcast %cst_73 : f32 to vector<16x256xf32>
    %291 = arith.subf %290, %289 : vector<16x256xf32>
    %cst_74 = arith.constant 0.000000e+00 : f32
    %292 = vector.broadcast %cst_74 : f32 to vector<16x256xf32>
    %293 = arith.maximumf %291, %292 : vector<16x256xf32>
    %294 = vector.shape_cast %262 : vector<1x256xf32> to vector<16x16xf32>
    %295 = vector.shape_cast %263 : vector<1x256xf32> to vector<16x16xf32>
    %cst_75 = arith.constant dense<0.000000e+00> : vector<16x256xf32>
    %296 = tpu.matmul %294, %293, %cst_75 {dimension_numbers = #tpu.dot_dimension_numbers<[1], [0], [0], [1], [0, 0, 1, 1], [], []>} : vector<16x16xf32>, vector<16x256xf32>, vector<16x256xf32> -> vector<16x256xf32>
    %cst_76 = arith.constant dense<0.000000e+00> : vector<16x256xf32>
    %297 = tpu.matmul %295, %293, %cst_76 {dimension_numbers = #tpu.dot_dimension_numbers<[1], [0], [0], [1], [0, 0, 1, 1], [], []>} : vector<16x16xf32>, vector<16x256xf32>, vector<16x256xf32> -> vector<16x256xf32>
    %298 = arith.mulf %285, %296 : vector<16x256xf32>
    %cst_77 = arith.constant dense<0.000000e+00> : vector<256xf32>
    %299 = vector.multi_reduction <add>, %298, %cst_77 [0] : vector<16x256xf32> to vector<256xf32>
    %300 = vector.shape_cast %299 : vector<256xf32> to vector<1x256xf32>
    %301 = arith.mulf %285, %297 : vector<16x256xf32>
    %cst_78 = arith.constant dense<0.000000e+00> : vector<256xf32>
    %302 = vector.multi_reduction <add>, %301, %cst_78 [0] : vector<16x256xf32> to vector<256xf32>
    %303 = vector.shape_cast %302 : vector<256xf32> to vector<1x256xf32>
    %304 = arith.addf %262, %300 : vector<1x256xf32>
    %305 = arith.addf %263, %303 : vector<1x256xf32>
    %306 = tpu.concatenate %304, %305 in 0 : vector<1x256xf32>, vector<1x256xf32> -> vector<2x256xf32>
    %c0_79 = arith.constant 0 : index
    %c0_80 = arith.constant 0 : index
    %c0_81 = arith.constant 0 : index
    %307 = vector.load %arg3[%c0_79, %c0_80, %c0_81] : memref<1x2x256xf32, #tpu.memory_space<vmem>>, vector<1x2x256xf32>
    %308 = vector.shape_cast %307 : vector<1x2x256xf32> to vector<2x256xf32>
    %309 = vector.shape_cast %306 : vector<2x256xf32> to vector<1x2x256xf32>
    tpu.vector_store %arg3[%c0_79, %c0_80, %c0_81], %309 {strides = array<i32>} : memref<1x2x256xf32, #tpu.memory_space<vmem>>, vector<1x2x256xf32>,
    return
  }
  func.func @transform_0(%arg0: i32) -> (i32, i32) {
    %c0_i32 = arith.constant 0 : i32
    %c0_i32_0 = arith.constant 0 : i32
    %c0_i32_1 = arith.constant 0 : i32
    return %c0_i32, %c0_i32_0 : i32, i32
  }
  func.func @transform_1(%arg0: i32) -> (i32, i32, i32) {
    %c0_i32 = arith.constant 0 : i32
    %c0_i32_0 = arith.constant 0 : i32
    %c0_i32_1 = arith.constant 0 : i32
    return %arg0, %c0_i32, %c0_i32_0 : i32, i32, i32
  }
  func.func @transform_2(%arg0: i32) -> (i32, i32, i32) {
    %c0_i32 = arith.constant 0 : i32
    %c0_i32_0 = arith.constant 0 : i32
    %c0_i32_1 = arith.constant 0 : i32
    return %arg0, %c0_i32, %c0_i32_0 : i32, i32, i32
  }
}

module attributes {stable_mosaic.version = 11 : i64} {
  func.func @_svf_exp_kernel(%arg0: i32, %arg1: memref<2x256xf32, #tpu.memory_space<vmem>>, %arg2: memref<1x2x256xf32, #tpu.memory_space<vmem>>, %arg3: memref<1x2x256xf32, #tpu.memory_space<vmem>>) attributes {dimension_semantics = [#tpu.dimension_semantics<parallel>], iteration_bounds = array<i64: 2>, scalar_prefetch = 0 : i64, scratch_operands = 0 : i64, tpu.core_type = #tpu.core_type<tc>, window_params = [{pipeline_mode = #tpu.pipeline_mode<synchronous>, transform_indices = @transform_0, window_bounds = array<i64: 2, 256>}, {transform_indices = @transform_1, window_bounds = array<i64: 1, 2, 256>}, {transform_indices = @transform_2, window_bounds = array<i64: 1, 2, 256>}]} {
    %c0 = arith.constant 0 : index
    %c0_0 = arith.constant 0 : index
    %0 = vector.load %arg1[%c0, %c0_0] : memref<2x256xf32, #tpu.memory_space<vmem>>, vector<1x256xf32>
    %c1 = arith.constant 1 : index
    %c0_1 = arith.constant 0 : index
    %1 = vector.load %arg1[%c1, %c0_1] : memref<2x256xf32, #tpu.memory_space<vmem>>, vector<1x256xf32>
    %2 = tpu.iota {dimensions = array<i32: 0>} : vector<16x1xi32>
    %3 = arith.sitofp %2 : vector<16x1xi32> to vector<16x1xf32>
    %4 = tpu.iota {dimensions = array<i32: 0>} : vector<16x1xi32>
    %5 = arith.sitofp %4 : vector<16x1xi32> to vector<16x1xf32>
    %6 = vector.broadcast %3 : vector<16x1xf32> to vector<16x256xf32>
    %7 = vector.broadcast %0 : vector<1x256xf32> to vector<16x256xf32>
    %8 = arith.cmpf oeq, %6, %7 : vector<16x256xf32>
    %9 = tpu.iota {dimensions = array<i32: 0>} : vector<256x1xi32>
    %10 = arith.sitofp %9 : vector<256x1xi32> to vector<256x1xf32>
    %cst = arith.constant 5.000000e-01 : f32
    %11 = vector.broadcast %cst : f32 to vector<256x1xf32>
    %12 = arith.addf %10, %11 : vector<256x1xf32>
    %cst_2 = arith.constant 6.250000e-02 : f32
    %13 = vector.broadcast %cst_2 : f32 to vector<256x1xf32>
    %14 = arith.mulf %12, %13 : vector<256x1xf32>
    %15 = math.floor %14 : vector<256x1xf32>
    %cst_3 = arith.constant 1.600000e+01 : f32
    %16 = vector.broadcast %cst_3 : f32 to vector<256x1xf32>
    %17 = arith.mulf %15, %16 : vector<256x1xf32>
    %18 = arith.subf %10, %17 : vector<256x1xf32>
    %19 = tpu.iota {dimensions = array<i32: 1>} : vector<1x16xi32>
    %20 = arith.sitofp %19 : vector<1x16xi32> to vector<1x16xf32>
    %21 = vector.broadcast %18 : vector<256x1xf32> to vector<256x16xf32>
    %22 = vector.broadcast %20 : vector<1x16xf32> to vector<256x16xf32>
    %23 = arith.cmpf oeq, %21, %22 : vector<256x16xf32>
    %24 = arith.extui %23 : vector<256x16xi1> to vector<256x16xi32>
    %25 = arith.sitofp %24 : vector<256x16xi32> to vector<256x16xf32>
    %c0_4 = arith.constant 0 : index
    %c0_5 = arith.constant 0 : index
    %c0_6 = arith.constant 0 : index
    %26 = vector.load %arg2[%c0_4, %c0_5, %c0_6] : memref<1x2x256xf32, #tpu.memory_space<vmem>>, vector<1x2x256xf32>
    %27 = vector.shape_cast %26 : vector<1x2x256xf32> to vector<2x256xf32>
    %cst_7 = arith.constant 7.812500e-03 : f32
    %28 = vector.broadcast %cst_7 : f32 to vector<2x256xf32>
    %29 = arith.mulf %27, %28 : vector<2x256xf32>
    %30 = vector.extract_strided_slice %29 {offsets = [0, 0], sizes = [1, 256], strides = [1, 1]} : vector<2x256xf32> to vector<1x256xf32>
    %31 = vector.extract_strided_slice %29 {offsets = [1, 0], sizes = [1, 256], strides = [1, 1]} : vector<2x256xf32> to vector<1x256xf32>
    %cst_8 = arith.constant 7.500000e+00 : f32
    %cst_9 = arith.constant 1.500000e+01 : f32
    %cst_10 = arith.constant 7.500000e+00 : f32
    %cst_11 = arith.constant 1.500000e+01 : f32
    %c0_i32 = arith.constant 0 : i32
    %32 = vector.broadcast %cst_8 : f32 to vector<1x256xf32>
    %33 = arith.mulf %30, %32 : vector<1x256xf32>
    %34 = arith.addf %33, %0 : vector<1x256xf32>
    %cst_12 = arith.constant 0.000000e+00 : f32
    %35 = vector.broadcast %cst_12 : f32 to vector<1x256xf32>
    %36 = arith.maximumf %35, %34 : vector<1x256xf32>
    %37 = vector.broadcast %cst_9 : f32 to vector<1x256xf32>
    %38 = arith.minimumf %37, %36 : vector<1x256xf32>
    %39 = vector.broadcast %cst_10 : f32 to vector<1x256xf32>
    %40 = arith.mulf %31, %39 : vector<1x256xf32>
    %41 = arith.addf %40, %1 : vector<1x256xf32>
    %cst_13 = arith.constant 0.000000e+00 : f32
    %42 = vector.broadcast %cst_13 : f32 to vector<1x256xf32>
    %43 = arith.maximumf %42, %41 : vector<1x256xf32>
    %44 = vector.broadcast %cst_11 : f32 to vector<1x256xf32>
    %45 = arith.minimumf %44, %43 : vector<1x256xf32>
    %46 = vector.broadcast %3 : vector<16x1xf32> to vector<16x256xf32>
    %47 = vector.broadcast %38 : vector<1x256xf32> to vector<16x256xf32>
    %48 = arith.subf %46, %47 : vector<16x256xf32>
    %49 = math.absf %48 : vector<16x256xf32>
    %cst_14 = arith.constant 1.000000e+00 : f32
    %50 = vector.broadcast %cst_14 : f32 to vector<16x256xf32>
    %51 = arith.subf %50, %49 : vector<16x256xf32>
    %cst_15 = arith.constant 0.000000e+00 : f32
    %52 = vector.broadcast %cst_15 : f32 to vector<16x256xf32>
    %53 = arith.maximumf %51, %52 : vector<16x256xf32>
    %54 = vector.broadcast %5 : vector<16x1xf32> to vector<16x256xf32>
    %55 = vector.broadcast %45 : vector<1x256xf32> to vector<16x256xf32>
    %56 = arith.subf %54, %55 : vector<16x256xf32>
    %57 = math.absf %56 : vector<16x256xf32>
    %cst_16 = arith.constant 1.000000e+00 : f32
    %58 = vector.broadcast %cst_16 : f32 to vector<16x256xf32>
    %59 = arith.subf %58, %57 : vector<16x256xf32>
    %cst_17 = arith.constant 0.000000e+00 : f32
    %60 = vector.broadcast %cst_17 : f32 to vector<16x256xf32>
    %61 = arith.maximumf %59, %60 : vector<16x256xf32>
    %cst_18 = arith.constant 0.000000e+00 : f32
    %62 = vector.shape_cast %30 : vector<1x256xf32> to vector<1x256xf32>
    %63 = vector.broadcast %62 : vector<1x256xf32> to vector<16x256xf32>
    %64 = vector.broadcast %cst_18 : f32 to vector<16x256xf32>
    %65 = arith.select %8, %63, %64 : vector<16x256xi1>, vector<16x256xf32>
    %cst_19 = arith.constant dense<0.000000e+00> : vector<16x16xf32>
    %66 = tpu.matmul %65, %25, %cst_19 {dimension_numbers = #tpu.dot_dimension_numbers<[1], [0], [0], [1], [0, 0, 1, 1], [], []>} : vector<16x256xf32>, vector<256x16xf32>, vector<16x16xf32> -> vector<16x16xf32>
    %cst_20 = arith.constant 0.000000e+00 : f32
    %67 = vector.shape_cast %31 : vector<1x256xf32> to vector<1x256xf32>
    %68 = vector.broadcast %67 : vector<1x256xf32> to vector<16x256xf32>
    %69 = vector.broadcast %cst_20 : f32 to vector<16x256xf32>
    %70 = arith.select %8, %68, %69 : vector<16x256xi1>, vector<16x256xf32>
    %cst_21 = arith.constant dense<0.000000e+00> : vector<16x16xf32>
    %71 = tpu.matmul %70, %25, %cst_21 {dimension_numbers = #tpu.dot_dimension_numbers<[1], [0], [0], [1], [0, 0, 1, 1], [], []>} : vector<16x256xf32>, vector<256x16xf32>, vector<16x16xf32> -> vector<16x16xf32>
    %cst_22 = arith.constant dense<0.000000e+00> : vector<16x256xf32>
    %72 = tpu.matmul %66, %61, %cst_22 {dimension_numbers = #tpu.dot_dimension_numbers<[1], [0], [0], [1], [0, 0, 1, 1], [], []>} : vector<16x16xf32>, vector<16x256xf32>, vector<16x256xf32> -> vector<16x256xf32>
    %cst_23 = arith.constant dense<0.000000e+00> : vector<16x256xf32>
    %73 = tpu.matmul %71, %61, %cst_23 {dimension_numbers = #tpu.dot_dimension_numbers<[1], [0], [0], [1], [0, 0, 1, 1], [], []>} : vector<16x16xf32>, vector<16x256xf32>, vector<16x256xf32> -> vector<16x256xf32>
    %74 = arith.mulf %53, %72 : vector<16x256xf32>
    %cst_24 = arith.constant dense<0.000000e+00> : vector<256xf32>
    %75 = vector.multi_reduction <add>, %74, %cst_24 [0] : vector<16x256xf32> to vector<256xf32>
    %76 = vector.shape_cast %75 : vector<256xf32> to vector<1x256xf32>
    %77 = arith.mulf %53, %73 : vector<16x256xf32>
    %cst_25 = arith.constant dense<0.000000e+00> : vector<256xf32>
    %78 = vector.multi_reduction <add>, %77, %cst_25 [0] : vector<16x256xf32> to vector<256xf32>
    %79 = vector.shape_cast %78 : vector<256xf32> to vector<1x256xf32>
    %80 = arith.addf %30, %76 : vector<1x256xf32>
    %81 = arith.addf %31, %79 : vector<1x256xf32>
    %c1_i32 = arith.constant 1 : i32
    %82 = vector.broadcast %cst_8 : f32 to vector<1x256xf32>
    %83 = arith.mulf %80, %82 : vector<1x256xf32>
    %84 = arith.addf %83, %0 : vector<1x256xf32>
    %cst_26 = arith.constant 0.000000e+00 : f32
    %85 = vector.broadcast %cst_26 : f32 to vector<1x256xf32>
    %86 = arith.maximumf %85, %84 : vector<1x256xf32>
    %87 = vector.broadcast %cst_9 : f32 to vector<1x256xf32>
    %88 = arith.minimumf %87, %86 : vector<1x256xf32>
    %89 = vector.broadcast %cst_10 : f32 to vector<1x256xf32>
    %90 = arith.mulf %81, %89 : vector<1x256xf32>
    %91 = arith.addf %90, %1 : vector<1x256xf32>
    %cst_27 = arith.constant 0.000000e+00 : f32
    %92 = vector.broadcast %cst_27 : f32 to vector<1x256xf32>
    %93 = arith.maximumf %92, %91 : vector<1x256xf32>
    %94 = vector.broadcast %cst_11 : f32 to vector<1x256xf32>
    %95 = arith.minimumf %94, %93 : vector<1x256xf32>
    %96 = vector.broadcast %3 : vector<16x1xf32> to vector<16x256xf32>
    %97 = vector.broadcast %88 : vector<1x256xf32> to vector<16x256xf32>
    %98 = arith.subf %96, %97 : vector<16x256xf32>
    %99 = math.absf %98 : vector<16x256xf32>
    %cst_28 = arith.constant 1.000000e+00 : f32
    %100 = vector.broadcast %cst_28 : f32 to vector<16x256xf32>
    %101 = arith.subf %100, %99 : vector<16x256xf32>
    %cst_29 = arith.constant 0.000000e+00 : f32
    %102 = vector.broadcast %cst_29 : f32 to vector<16x256xf32>
    %103 = arith.maximumf %101, %102 : vector<16x256xf32>
    %104 = vector.broadcast %5 : vector<16x1xf32> to vector<16x256xf32>
    %105 = vector.broadcast %95 : vector<1x256xf32> to vector<16x256xf32>
    %106 = arith.subf %104, %105 : vector<16x256xf32>
    %107 = math.absf %106 : vector<16x256xf32>
    %cst_30 = arith.constant 1.000000e+00 : f32
    %108 = vector.broadcast %cst_30 : f32 to vector<16x256xf32>
    %109 = arith.subf %108, %107 : vector<16x256xf32>
    %cst_31 = arith.constant 0.000000e+00 : f32
    %110 = vector.broadcast %cst_31 : f32 to vector<16x256xf32>
    %111 = arith.maximumf %109, %110 : vector<16x256xf32>
    %cst_32 = arith.constant 0.000000e+00 : f32
    %112 = vector.shape_cast %80 : vector<1x256xf32> to vector<1x256xf32>
    %113 = vector.broadcast %112 : vector<1x256xf32> to vector<16x256xf32>
    %114 = vector.broadcast %cst_32 : f32 to vector<16x256xf32>
    %115 = arith.select %8, %113, %114 : vector<16x256xi1>, vector<16x256xf32>
    %cst_33 = arith.constant dense<0.000000e+00> : vector<16x16xf32>
    %116 = tpu.matmul %115, %25, %cst_33 {dimension_numbers = #tpu.dot_dimension_numbers<[1], [0], [0], [1], [0, 0, 1, 1], [], []>} : vector<16x256xf32>, vector<256x16xf32>, vector<16x16xf32> -> vector<16x16xf32>
    %cst_34 = arith.constant 0.000000e+00 : f32
    %117 = vector.shape_cast %81 : vector<1x256xf32> to vector<1x256xf32>
    %118 = vector.broadcast %117 : vector<1x256xf32> to vector<16x256xf32>
    %119 = vector.broadcast %cst_34 : f32 to vector<16x256xf32>
    %120 = arith.select %8, %118, %119 : vector<16x256xi1>, vector<16x256xf32>
    %cst_35 = arith.constant dense<0.000000e+00> : vector<16x16xf32>
    %121 = tpu.matmul %120, %25, %cst_35 {dimension_numbers = #tpu.dot_dimension_numbers<[1], [0], [0], [1], [0, 0, 1, 1], [], []>} : vector<16x256xf32>, vector<256x16xf32>, vector<16x16xf32> -> vector<16x16xf32>
    %cst_36 = arith.constant dense<0.000000e+00> : vector<16x256xf32>
    %122 = tpu.matmul %116, %111, %cst_36 {dimension_numbers = #tpu.dot_dimension_numbers<[1], [0], [0], [1], [0, 0, 1, 1], [], []>} : vector<16x16xf32>, vector<16x256xf32>, vector<16x256xf32> -> vector<16x256xf32>
    %cst_37 = arith.constant dense<0.000000e+00> : vector<16x256xf32>
    %123 = tpu.matmul %121, %111, %cst_37 {dimension_numbers = #tpu.dot_dimension_numbers<[1], [0], [0], [1], [0, 0, 1, 1], [], []>} : vector<16x16xf32>, vector<16x256xf32>, vector<16x256xf32> -> vector<16x256xf32>
    %124 = arith.mulf %103, %122 : vector<16x256xf32>
    %cst_38 = arith.constant dense<0.000000e+00> : vector<256xf32>
    %125 = vector.multi_reduction <add>, %124, %cst_38 [0] : vector<16x256xf32> to vector<256xf32>
    %126 = vector.shape_cast %125 : vector<256xf32> to vector<1x256xf32>
    %127 = arith.mulf %103, %123 : vector<16x256xf32>
    %cst_39 = arith.constant dense<0.000000e+00> : vector<256xf32>
    %128 = vector.multi_reduction <add>, %127, %cst_39 [0] : vector<16x256xf32> to vector<256xf32>
    %129 = vector.shape_cast %128 : vector<256xf32> to vector<1x256xf32>
    %130 = arith.addf %80, %126 : vector<1x256xf32>
    %131 = arith.addf %81, %129 : vector<1x256xf32>
    %c2_i32 = arith.constant 2 : i32
    %132 = vector.broadcast %cst_8 : f32 to vector<1x256xf32>
    %133 = arith.mulf %130, %132 : vector<1x256xf32>
    %134 = arith.addf %133, %0 : vector<1x256xf32>
    %cst_40 = arith.constant 0.000000e+00 : f32
    %135 = vector.broadcast %cst_40 : f32 to vector<1x256xf32>
    %136 = arith.maximumf %135, %134 : vector<1x256xf32>
    %137 = vector.broadcast %cst_9 : f32 to vector<1x256xf32>
    %138 = arith.minimumf %137, %136 : vector<1x256xf32>
    %139 = vector.broadcast %cst_10 : f32 to vector<1x256xf32>
    %140 = arith.mulf %131, %139 : vector<1x256xf32>
    %141 = arith.addf %140, %1 : vector<1x256xf32>
    %cst_41 = arith.constant 0.000000e+00 : f32
    %142 = vector.broadcast %cst_41 : f32 to vector<1x256xf32>
    %143 = arith.maximumf %142, %141 : vector<1x256xf32>
    %144 = vector.broadcast %cst_11 : f32 to vector<1x256xf32>
    %145 = arith.minimumf %144, %143 : vector<1x256xf32>
    %146 = vector.broadcast %3 : vector<16x1xf32> to vector<16x256xf32>
    %147 = vector.broadcast %138 : vector<1x256xf32> to vector<16x256xf32>
    %148 = arith.subf %146, %147 : vector<16x256xf32>
    %149 = math.absf %148 : vector<16x256xf32>
    %cst_42 = arith.constant 1.000000e+00 : f32
    %150 = vector.broadcast %cst_42 : f32 to vector<16x256xf32>
    %151 = arith.subf %150, %149 : vector<16x256xf32>
    %cst_43 = arith.constant 0.000000e+00 : f32
    %152 = vector.broadcast %cst_43 : f32 to vector<16x256xf32>
    %153 = arith.maximumf %151, %152 : vector<16x256xf32>
    %154 = vector.broadcast %5 : vector<16x1xf32> to vector<16x256xf32>
    %155 = vector.broadcast %145 : vector<1x256xf32> to vector<16x256xf32>
    %156 = arith.subf %154, %155 : vector<16x256xf32>
    %157 = math.absf %156 : vector<16x256xf32>
    %cst_44 = arith.constant 1.000000e+00 : f32
    %158 = vector.broadcast %cst_44 : f32 to vector<16x256xf32>
    %159 = arith.subf %158, %157 : vector<16x256xf32>
    %cst_45 = arith.constant 0.000000e+00 : f32
    %160 = vector.broadcast %cst_45 : f32 to vector<16x256xf32>
    %161 = arith.maximumf %159, %160 : vector<16x256xf32>
    %cst_46 = arith.constant 0.000000e+00 : f32
    %162 = vector.shape_cast %130 : vector<1x256xf32> to vector<1x256xf32>
    %163 = vector.broadcast %162 : vector<1x256xf32> to vector<16x256xf32>
    %164 = vector.broadcast %cst_46 : f32 to vector<16x256xf32>
    %165 = arith.select %8, %163, %164 : vector<16x256xi1>, vector<16x256xf32>
    %cst_47 = arith.constant dense<0.000000e+00> : vector<16x16xf32>
    %166 = tpu.matmul %165, %25, %cst_47 {dimension_numbers = #tpu.dot_dimension_numbers<[1], [0], [0], [1], [0, 0, 1, 1], [], []>} : vector<16x256xf32>, vector<256x16xf32>, vector<16x16xf32> -> vector<16x16xf32>
    %cst_48 = arith.constant 0.000000e+00 : f32
    %167 = vector.shape_cast %131 : vector<1x256xf32> to vector<1x256xf32>
    %168 = vector.broadcast %167 : vector<1x256xf32> to vector<16x256xf32>
    %169 = vector.broadcast %cst_48 : f32 to vector<16x256xf32>
    %170 = arith.select %8, %168, %169 : vector<16x256xi1>, vector<16x256xf32>
    %cst_49 = arith.constant dense<0.000000e+00> : vector<16x16xf32>
    %171 = tpu.matmul %170, %25, %cst_49 {dimension_numbers = #tpu.dot_dimension_numbers<[1], [0], [0], [1], [0, 0, 1, 1], [], []>} : vector<16x256xf32>, vector<256x16xf32>, vector<16x16xf32> -> vector<16x16xf32>
    %cst_50 = arith.constant dense<0.000000e+00> : vector<16x256xf32>
    %172 = tpu.matmul %166, %161, %cst_50 {dimension_numbers = #tpu.dot_dimension_numbers<[1], [0], [0], [1], [0, 0, 1, 1], [], []>} : vector<16x16xf32>, vector<16x256xf32>, vector<16x256xf32> -> vector<16x256xf32>
    %cst_51 = arith.constant dense<0.000000e+00> : vector<16x256xf32>
    %173 = tpu.matmul %171, %161, %cst_51 {dimension_numbers = #tpu.dot_dimension_numbers<[1], [0], [0], [1], [0, 0, 1, 1], [], []>} : vector<16x16xf32>, vector<16x256xf32>, vector<16x256xf32> -> vector<16x256xf32>
    %174 = arith.mulf %153, %172 : vector<16x256xf32>
    %cst_52 = arith.constant dense<0.000000e+00> : vector<256xf32>
    %175 = vector.multi_reduction <add>, %174, %cst_52 [0] : vector<16x256xf32> to vector<256xf32>
    %176 = vector.shape_cast %175 : vector<256xf32> to vector<1x256xf32>
    %177 = arith.mulf %153, %173 : vector<16x256xf32>
    %cst_53 = arith.constant dense<0.000000e+00> : vector<256xf32>
    %178 = vector.multi_reduction <add>, %177, %cst_53 [0] : vector<16x256xf32> to vector<256xf32>
    %179 = vector.shape_cast %178 : vector<256xf32> to vector<1x256xf32>
    %180 = arith.addf %130, %176 : vector<1x256xf32>
    %181 = arith.addf %131, %179 : vector<1x256xf32>
    %c3_i32 = arith.constant 3 : i32
    %182 = vector.broadcast %cst_8 : f32 to vector<1x256xf32>
    %183 = arith.mulf %180, %182 : vector<1x256xf32>
    %184 = arith.addf %183, %0 : vector<1x256xf32>
    %cst_54 = arith.constant 0.000000e+00 : f32
    %185 = vector.broadcast %cst_54 : f32 to vector<1x256xf32>
    %186 = arith.maximumf %185, %184 : vector<1x256xf32>
    %187 = vector.broadcast %cst_9 : f32 to vector<1x256xf32>
    %188 = arith.minimumf %187, %186 : vector<1x256xf32>
    %189 = vector.broadcast %cst_10 : f32 to vector<1x256xf32>
    %190 = arith.mulf %181, %189 : vector<1x256xf32>
    %191 = arith.addf %190, %1 : vector<1x256xf32>
    %cst_55 = arith.constant 0.000000e+00 : f32
    %192 = vector.broadcast %cst_55 : f32 to vector<1x256xf32>
    %193 = arith.maximumf %192, %191 : vector<1x256xf32>
    %194 = vector.broadcast %cst_11 : f32 to vector<1x256xf32>
    %195 = arith.minimumf %194, %193 : vector<1x256xf32>
    %196 = vector.broadcast %3 : vector<16x1xf32> to vector<16x256xf32>
    %197 = vector.broadcast %188 : vector<1x256xf32> to vector<16x256xf32>
    %198 = arith.subf %196, %197 : vector<16x256xf32>
    %199 = math.absf %198 : vector<16x256xf32>
    %cst_56 = arith.constant 1.000000e+00 : f32
    %200 = vector.broadcast %cst_56 : f32 to vector<16x256xf32>
    %201 = arith.subf %200, %199 : vector<16x256xf32>
    %cst_57 = arith.constant 0.000000e+00 : f32
    %202 = vector.broadcast %cst_57 : f32 to vector<16x256xf32>
    %203 = arith.maximumf %201, %202 : vector<16x256xf32>
    %204 = vector.broadcast %5 : vector<16x1xf32> to vector<16x256xf32>
    %205 = vector.broadcast %195 : vector<1x256xf32> to vector<16x256xf32>
    %206 = arith.subf %204, %205 : vector<16x256xf32>
    %207 = math.absf %206 : vector<16x256xf32>
    %cst_58 = arith.constant 1.000000e+00 : f32
    %208 = vector.broadcast %cst_58 : f32 to vector<16x256xf32>
    %209 = arith.subf %208, %207 : vector<16x256xf32>
    %cst_59 = arith.constant 0.000000e+00 : f32
    %210 = vector.broadcast %cst_59 : f32 to vector<16x256xf32>
    %211 = arith.maximumf %209, %210 : vector<16x256xf32>
    %cst_60 = arith.constant 0.000000e+00 : f32
    %212 = vector.shape_cast %180 : vector<1x256xf32> to vector<1x256xf32>
    %213 = vector.broadcast %212 : vector<1x256xf32> to vector<16x256xf32>
    %214 = vector.broadcast %cst_60 : f32 to vector<16x256xf32>
    %215 = arith.select %8, %213, %214 : vector<16x256xi1>, vector<16x256xf32>
    %cst_61 = arith.constant dense<0.000000e+00> : vector<16x16xf32>
    %216 = tpu.matmul %215, %25, %cst_61 {dimension_numbers = #tpu.dot_dimension_numbers<[1], [0], [0], [1], [0, 0, 1, 1], [], []>} : vector<16x256xf32>, vector<256x16xf32>, vector<16x16xf32> -> vector<16x16xf32>
    %cst_62 = arith.constant 0.000000e+00 : f32
    %217 = vector.shape_cast %181 : vector<1x256xf32> to vector<1x256xf32>
    %218 = vector.broadcast %217 : vector<1x256xf32> to vector<16x256xf32>
    %219 = vector.broadcast %cst_62 : f32 to vector<16x256xf32>
    %220 = arith.select %8, %218, %219 : vector<16x256xi1>, vector<16x256xf32>
    %cst_63 = arith.constant dense<0.000000e+00> : vector<16x16xf32>
    %221 = tpu.matmul %220, %25, %cst_63 {dimension_numbers = #tpu.dot_dimension_numbers<[1], [0], [0], [1], [0, 0, 1, 1], [], []>} : vector<16x256xf32>, vector<256x16xf32>, vector<16x16xf32> -> vector<16x16xf32>
    %cst_64 = arith.constant dense<0.000000e+00> : vector<16x256xf32>
    %222 = tpu.matmul %216, %211, %cst_64 {dimension_numbers = #tpu.dot_dimension_numbers<[1], [0], [0], [1], [0, 0, 1, 1], [], []>} : vector<16x16xf32>, vector<16x256xf32>, vector<16x256xf32> -> vector<16x256xf32>
    %cst_65 = arith.constant dense<0.000000e+00> : vector<16x256xf32>
    %223 = tpu.matmul %221, %211, %cst_65 {dimension_numbers = #tpu.dot_dimension_numbers<[1], [0], [0], [1], [0, 0, 1, 1], [], []>} : vector<16x16xf32>, vector<16x256xf32>, vector<16x256xf32> -> vector<16x256xf32>
    %224 = arith.mulf %203, %222 : vector<16x256xf32>
    %cst_66 = arith.constant dense<0.000000e+00> : vector<256xf32>
    %225 = vector.multi_reduction <add>, %224, %cst_66 [0] : vector<16x256xf32> to vector<256xf32>
    %226 = vector.shape_cast %225 : vector<256xf32> to vector<1x256xf32>
    %227 = arith.mulf %203, %223 : vector<16x256xf32>
    %cst_67 = arith.constant dense<0.000000e+00> : vector<256xf32>
    %228 = vector.multi_reduction <add>, %227, %cst_67 [0] : vector<16x256xf32> to vector<256xf32>
    %229 = vector.shape_cast %228 : vector<256xf32> to vector<1x256xf32>
    %230 = arith.addf %180, %226 : vector<1x256xf32>
    %231 = arith.addf %181, %229 : vector<1x256xf32>
    %c4_i32 = arith.constant 4 : i32
    %232 = vector.broadcast %cst_8 : f32 to vector<1x256xf32>
    %233 = arith.mulf %230, %232 : vector<1x256xf32>
    %234 = arith.addf %233, %0 : vector<1x256xf32>
    %cst_68 = arith.constant 0.000000e+00 : f32
    %235 = vector.broadcast %cst_68 : f32 to vector<1x256xf32>
    %236 = arith.maximumf %235, %234 : vector<1x256xf32>
    %237 = vector.broadcast %cst_9 : f32 to vector<1x256xf32>
    %238 = arith.minimumf %237, %236 : vector<1x256xf32>
    %239 = vector.broadcast %cst_10 : f32 to vector<1x256xf32>
    %240 = arith.mulf %231, %239 : vector<1x256xf32>
    %241 = arith.addf %240, %1 : vector<1x256xf32>
    %cst_69 = arith.constant 0.000000e+00 : f32
    %242 = vector.broadcast %cst_69 : f32 to vector<1x256xf32>
    %243 = arith.maximumf %242, %241 : vector<1x256xf32>
    %244 = vector.broadcast %cst_11 : f32 to vector<1x256xf32>
    %245 = arith.minimumf %244, %243 : vector<1x256xf32>
    %246 = vector.broadcast %3 : vector<16x1xf32> to vector<16x256xf32>
    %247 = vector.broadcast %238 : vector<1x256xf32> to vector<16x256xf32>
    %248 = arith.subf %246, %247 : vector<16x256xf32>
    %249 = math.absf %248 : vector<16x256xf32>
    %cst_70 = arith.constant 1.000000e+00 : f32
    %250 = vector.broadcast %cst_70 : f32 to vector<16x256xf32>
    %251 = arith.subf %250, %249 : vector<16x256xf32>
    %cst_71 = arith.constant 0.000000e+00 : f32
    %252 = vector.broadcast %cst_71 : f32 to vector<16x256xf32>
    %253 = arith.maximumf %251, %252 : vector<16x256xf32>
    %254 = vector.broadcast %5 : vector<16x1xf32> to vector<16x256xf32>
    %255 = vector.broadcast %245 : vector<1x256xf32> to vector<16x256xf32>
    %256 = arith.subf %254, %255 : vector<16x256xf32>
    %257 = math.absf %256 : vector<16x256xf32>
    %cst_72 = arith.constant 1.000000e+00 : f32
    %258 = vector.broadcast %cst_72 : f32 to vector<16x256xf32>
    %259 = arith.subf %258, %257 : vector<16x256xf32>
    %cst_73 = arith.constant 0.000000e+00 : f32
    %260 = vector.broadcast %cst_73 : f32 to vector<16x256xf32>
    %261 = arith.maximumf %259, %260 : vector<16x256xf32>
    %cst_74 = arith.constant 0.000000e+00 : f32
    %262 = vector.shape_cast %230 : vector<1x256xf32> to vector<1x256xf32>
    %263 = vector.broadcast %262 : vector<1x256xf32> to vector<16x256xf32>
    %264 = vector.broadcast %cst_74 : f32 to vector<16x256xf32>
    %265 = arith.select %8, %263, %264 : vector<16x256xi1>, vector<16x256xf32>
    %cst_75 = arith.constant dense<0.000000e+00> : vector<16x16xf32>
    %266 = tpu.matmul %265, %25, %cst_75 {dimension_numbers = #tpu.dot_dimension_numbers<[1], [0], [0], [1], [0, 0, 1, 1], [], []>} : vector<16x256xf32>, vector<256x16xf32>, vector<16x16xf32> -> vector<16x16xf32>
    %cst_76 = arith.constant 0.000000e+00 : f32
    %267 = vector.shape_cast %231 : vector<1x256xf32> to vector<1x256xf32>
    %268 = vector.broadcast %267 : vector<1x256xf32> to vector<16x256xf32>
    %269 = vector.broadcast %cst_76 : f32 to vector<16x256xf32>
    %270 = arith.select %8, %268, %269 : vector<16x256xi1>, vector<16x256xf32>
    %cst_77 = arith.constant dense<0.000000e+00> : vector<16x16xf32>
    %271 = tpu.matmul %270, %25, %cst_77 {dimension_numbers = #tpu.dot_dimension_numbers<[1], [0], [0], [1], [0, 0, 1, 1], [], []>} : vector<16x256xf32>, vector<256x16xf32>, vector<16x16xf32> -> vector<16x16xf32>
    %cst_78 = arith.constant dense<0.000000e+00> : vector<16x256xf32>
    %272 = tpu.matmul %266, %261, %cst_78 {dimension_numbers = #tpu.dot_dimension_numbers<[1], [0], [0], [1], [0, 0, 1, 1], [], []>} : vector<16x16xf32>, vector<16x256xf32>, vector<16x256xf32> -> vector<16x256xf32>
    %cst_79 = arith.constant dense<0.000000e+00> : vector<16x256xf32>
    %273 = tpu.matmul %271, %261, %cst_79 {dimension_numbers = #tpu.dot_dimension_numbers<[1], [0], [0], [1], [0, 0, 1, 1], [], []>} : vector<16x16xf32>, vector<16x256xf32>, vector<16x256xf32> -> vector<16x256xf32>
    %274 = arith.mulf %253, %272 : vector<16x256xf32>
    %cst_80 = arith.constant dense<0.000000e+00> : vector<256xf32>
    %275 = vector.multi_reduction <add>, %274, %cst_80 [0] : vector<16x256xf32> to vector<256xf32>
    %276 = vector.shape_cast %275 : vector<256xf32> to vector<1x256xf32>
    %277 = arith.mulf %253, %273 : vector<16x256xf32>
    %cst_81 = arith.constant dense<0.000000e+00> : vector<256xf32>
    %278 = vector.multi_reduction <add>, %277, %cst_81 [0] : vector<16x256xf32> to vector<256xf32>
    %279 = vector.shape_cast %278 : vector<256xf32> to vector<1x256xf32>
    %280 = arith.addf %230, %276 : vector<1x256xf32>
    %281 = arith.addf %231, %279 : vector<1x256xf32>
    %c5_i32 = arith.constant 5 : i32
    %282 = vector.broadcast %cst_8 : f32 to vector<1x256xf32>
    %283 = arith.mulf %280, %282 : vector<1x256xf32>
    %284 = arith.addf %283, %0 : vector<1x256xf32>
    %cst_82 = arith.constant 0.000000e+00 : f32
    %285 = vector.broadcast %cst_82 : f32 to vector<1x256xf32>
    %286 = arith.maximumf %285, %284 : vector<1x256xf32>
    %287 = vector.broadcast %cst_9 : f32 to vector<1x256xf32>
    %288 = arith.minimumf %287, %286 : vector<1x256xf32>
    %289 = vector.broadcast %cst_10 : f32 to vector<1x256xf32>
    %290 = arith.mulf %281, %289 : vector<1x256xf32>
    %291 = arith.addf %290, %1 : vector<1x256xf32>
    %cst_83 = arith.constant 0.000000e+00 : f32
    %292 = vector.broadcast %cst_83 : f32 to vector<1x256xf32>
    %293 = arith.maximumf %292, %291 : vector<1x256xf32>
    %294 = vector.broadcast %cst_11 : f32 to vector<1x256xf32>
    %295 = arith.minimumf %294, %293 : vector<1x256xf32>
    %296 = vector.broadcast %3 : vector<16x1xf32> to vector<16x256xf32>
    %297 = vector.broadcast %288 : vector<1x256xf32> to vector<16x256xf32>
    %298 = arith.subf %296, %297 : vector<16x256xf32>
    %299 = math.absf %298 : vector<16x256xf32>
    %cst_84 = arith.constant 1.000000e+00 : f32
    %300 = vector.broadcast %cst_84 : f32 to vector<16x256xf32>
    %301 = arith.subf %300, %299 : vector<16x256xf32>
    %cst_85 = arith.constant 0.000000e+00 : f32
    %302 = vector.broadcast %cst_85 : f32 to vector<16x256xf32>
    %303 = arith.maximumf %301, %302 : vector<16x256xf32>
    %304 = vector.broadcast %5 : vector<16x1xf32> to vector<16x256xf32>
    %305 = vector.broadcast %295 : vector<1x256xf32> to vector<16x256xf32>
    %306 = arith.subf %304, %305 : vector<16x256xf32>
    %307 = math.absf %306 : vector<16x256xf32>
    %cst_86 = arith.constant 1.000000e+00 : f32
    %308 = vector.broadcast %cst_86 : f32 to vector<16x256xf32>
    %309 = arith.subf %308, %307 : vector<16x256xf32>
    %cst_87 = arith.constant 0.000000e+00 : f32
    %310 = vector.broadcast %cst_87 : f32 to vector<16x256xf32>
    %311 = arith.maximumf %309, %310 : vector<16x256xf32>
    %cst_88 = arith.constant 0.000000e+00 : f32
    %312 = vector.shape_cast %280 : vector<1x256xf32> to vector<1x256xf32>
    %313 = vector.broadcast %312 : vector<1x256xf32> to vector<16x256xf32>
    %314 = vector.broadcast %cst_88 : f32 to vector<16x256xf32>
    %315 = arith.select %8, %313, %314 : vector<16x256xi1>, vector<16x256xf32>
    %cst_89 = arith.constant dense<0.000000e+00> : vector<16x16xf32>
    %316 = tpu.matmul %315, %25, %cst_89 {dimension_numbers = #tpu.dot_dimension_numbers<[1], [0], [0], [1], [0, 0, 1, 1], [], []>} : vector<16x256xf32>, vector<256x16xf32>, vector<16x16xf32> -> vector<16x16xf32>
    %cst_90 = arith.constant 0.000000e+00 : f32
    %317 = vector.shape_cast %281 : vector<1x256xf32> to vector<1x256xf32>
    %318 = vector.broadcast %317 : vector<1x256xf32> to vector<16x256xf32>
    %319 = vector.broadcast %cst_90 : f32 to vector<16x256xf32>
    %320 = arith.select %8, %318, %319 : vector<16x256xi1>, vector<16x256xf32>
    %cst_91 = arith.constant dense<0.000000e+00> : vector<16x16xf32>
    %321 = tpu.matmul %320, %25, %cst_91 {dimension_numbers = #tpu.dot_dimension_numbers<[1], [0], [0], [1], [0, 0, 1, 1], [], []>} : vector<16x256xf32>, vector<256x16xf32>, vector<16x16xf32> -> vector<16x16xf32>
    %cst_92 = arith.constant dense<0.000000e+00> : vector<16x256xf32>
    %322 = tpu.matmul %316, %311, %cst_92 {dimension_numbers = #tpu.dot_dimension_numbers<[1], [0], [0], [1], [0, 0, 1, 1], [], []>} : vector<16x16xf32>, vector<16x256xf32>, vector<16x256xf32> -> vector<16x256xf32>
    %cst_93 = arith.constant dense<0.000000e+00> : vector<16x256xf32>
    %323 = tpu.matmul %321, %311, %cst_93 {dimension_numbers = #tpu.dot_dimension_numbers<[1], [0], [0], [1], [0, 0, 1, 1], [], []>} : vector<16x16xf32>, vector<16x256xf32>, vector<16x256xf32> -> vector<16x256xf32>
    %324 = arith.mulf %303, %322 : vector<16x256xf32>
    %cst_94 = arith.constant dense<0.000000e+00> : vector<256xf32>
    %325 = vector.multi_reduction <add>, %324, %cst_94 [0] : vector<16x256xf32> to vector<256xf32>
    %326 = vector.shape_cast %325 : vector<256xf32> to vector<1x256xf32>
    %327 = arith.mulf %303, %323 : vector<16x256xf32>
    %cst_95 = arith.constant dense<0.000000e+00> : vector<256xf32>
    %328 = vector.multi_reduction <add>, %327, %cst_95 [0] : vector<16x256xf32> to vector<256xf32>
    %329 = vector.shape_cast %328 : vector<256xf32> to vector<1x256xf32>
    %330 = arith.addf %280, %326 : vector<1x256xf32>
    %331 = arith.addf %281, %329 : vector<1x256xf32>
    %c6_i32 = arith.constant 6 : i32
    %332 = vector.broadcast %cst_8 : f32 to vector<1x256xf32>
    %333 = arith.mulf %330, %332 : vector<1x256xf32>
    %334 = arith.addf %333, %0 : vector<1x256xf32>
    %cst_96 = arith.constant 0.000000e+00 : f32
    %335 = vector.broadcast %cst_96 : f32 to vector<1x256xf32>
    %336 = arith.maximumf %335, %334 : vector<1x256xf32>
    %337 = vector.broadcast %cst_9 : f32 to vector<1x256xf32>
    %338 = arith.minimumf %337, %336 : vector<1x256xf32>
    %339 = vector.broadcast %cst_10 : f32 to vector<1x256xf32>
    %340 = arith.mulf %331, %339 : vector<1x256xf32>
    %341 = arith.addf %340, %1 : vector<1x256xf32>
    %cst_97 = arith.constant 0.000000e+00 : f32
    %342 = vector.broadcast %cst_97 : f32 to vector<1x256xf32>
    %343 = arith.maximumf %342, %341 : vector<1x256xf32>
    %344 = vector.broadcast %cst_11 : f32 to vector<1x256xf32>
    %345 = arith.minimumf %344, %343 : vector<1x256xf32>
    %346 = vector.broadcast %3 : vector<16x1xf32> to vector<16x256xf32>
    %347 = vector.broadcast %338 : vector<1x256xf32> to vector<16x256xf32>
    %348 = arith.subf %346, %347 : vector<16x256xf32>
    %349 = math.absf %348 : vector<16x256xf32>
    %cst_98 = arith.constant 1.000000e+00 : f32
    %350 = vector.broadcast %cst_98 : f32 to vector<16x256xf32>
    %351 = arith.subf %350, %349 : vector<16x256xf32>
    %cst_99 = arith.constant 0.000000e+00 : f32
    %352 = vector.broadcast %cst_99 : f32 to vector<16x256xf32>
    %353 = arith.maximumf %351, %352 : vector<16x256xf32>
    %354 = vector.broadcast %5 : vector<16x1xf32> to vector<16x256xf32>
    %355 = vector.broadcast %345 : vector<1x256xf32> to vector<16x256xf32>
    %356 = arith.subf %354, %355 : vector<16x256xf32>
    %357 = math.absf %356 : vector<16x256xf32>
    %cst_100 = arith.constant 1.000000e+00 : f32
    %358 = vector.broadcast %cst_100 : f32 to vector<16x256xf32>
    %359 = arith.subf %358, %357 : vector<16x256xf32>
    %cst_101 = arith.constant 0.000000e+00 : f32
    %360 = vector.broadcast %cst_101 : f32 to vector<16x256xf32>
    %361 = arith.maximumf %359, %360 : vector<16x256xf32>
    %cst_102 = arith.constant 0.000000e+00 : f32
    %362 = vector.shape_cast %330 : vector<1x256xf32> to vector<1x256xf32>
    %363 = vector.broadcast %362 : vector<1x256xf32> to vector<16x256xf32>
    %364 = vector.broadcast %cst_102 : f32 to vector<16x256xf32>
    %365 = arith.select %8, %363, %364 : vector<16x256xi1>, vector<16x256xf32>
    %cst_103 = arith.constant dense<0.000000e+00> : vector<16x16xf32>
    %366 = tpu.matmul %365, %25, %cst_103 {dimension_numbers = #tpu.dot_dimension_numbers<[1], [0], [0], [1], [0, 0, 1, 1], [], []>} : vector<16x256xf32>, vector<256x16xf32>, vector<16x16xf32> -> vector<16x16xf32>
    %cst_104 = arith.constant 0.000000e+00 : f32
    %367 = vector.shape_cast %331 : vector<1x256xf32> to vector<1x256xf32>
    %368 = vector.broadcast %367 : vector<1x256xf32> to vector<16x256xf32>
    %369 = vector.broadcast %cst_104 : f32 to vector<16x256xf32>
    %370 = arith.select %8, %368, %369 : vector<16x256xi1>, vector<16x256xf32>
    %cst_105 = arith.constant dense<0.000000e+00> : vector<16x16xf32>
    %371 = tpu.matmul %370, %25, %cst_105 {dimension_numbers = #tpu.dot_dimension_numbers<[1], [0], [0], [1], [0, 0, 1, 1], [], []>} : vector<16x256xf32>, vector<256x16xf32>, vector<16x16xf32> -> vector<16x16xf32>
    %cst_106 = arith.constant dense<0.000000e+00> : vector<16x256xf32>
    %372 = tpu.matmul %366, %361, %cst_106 {dimension_numbers = #tpu.dot_dimension_numbers<[1], [0], [0], [1], [0, 0, 1, 1], [], []>} : vector<16x16xf32>, vector<16x256xf32>, vector<16x256xf32> -> vector<16x256xf32>
    %cst_107 = arith.constant dense<0.000000e+00> : vector<16x256xf32>
    %373 = tpu.matmul %371, %361, %cst_107 {dimension_numbers = #tpu.dot_dimension_numbers<[1], [0], [0], [1], [0, 0, 1, 1], [], []>} : vector<16x16xf32>, vector<16x256xf32>, vector<16x256xf32> -> vector<16x256xf32>
    %374 = arith.mulf %353, %372 : vector<16x256xf32>
    %cst_108 = arith.constant dense<0.000000e+00> : vector<256xf32>
    %375 = vector.multi_reduction <add>, %374, %cst_108 [0] : vector<16x256xf32> to vector<256xf32>
    %376 = vector.shape_cast %375 : vector<256xf32> to vector<1x256xf32>
    %377 = arith.mulf %353, %373 : vector<16x256xf32>
    %cst_109 = arith.constant dense<0.000000e+00> : vector<256xf32>
    %378 = vector.multi_reduction <add>, %377, %cst_109 [0] : vector<16x256xf32> to vector<256xf32>
    %379 = vector.shape_cast %378 : vector<256xf32> to vector<1x256xf32>
    %380 = arith.addf %330, %376 : vector<1x256xf32>
    %381 = arith.addf %331, %379 : vector<1x256xf32>
    %382 = tpu.concatenate %380, %381 in 0 : vector<1x256xf32>, vector<1x256xf32> -> vector<2x256xf32>
    %c0_110 = arith.constant 0 : index
    %c0_111 = arith.constant 0 : index
    %c0_112 = arith.constant 0 : index
    %383 = vector.load %arg3[%c0_110, %c0_111, %c0_112] : memref<1x2x256xf32, #tpu.memory_space<vmem>>, vector<1x2x256xf32>
    %384 = vector.shape_cast %383 : vector<1x2x256xf32> to vector<2x256xf32>
    %385 = vector.shape_cast %382 : vector<2x256xf32> to vector<1x2x256xf32>
    tpu.vector_store %arg3[%c0_110, %c0_111, %c0_112], %385 {strides = array<i32>} : memref<1x2x256xf32, #tpu.memory_space<vmem>>, vector<1x2x256xf32>,
    return
  }
  func.func @transform_0(%arg0: i32) -> (i32, i32) {
    %c0_i32 = arith.constant 0 : i32
    %c0_i32_0 = arith.constant 0 : i32
    %c0_i32_1 = arith.constant 0 : i32
    return %c0_i32, %c0_i32_0 : i32, i32
  }
  func.func @transform_1(%arg0: i32) -> (i32, i32, i32) {
    %c0_i32 = arith.constant 0 : i32
    %c0_i32_0 = arith.constant 0 : i32
    %c0_i32_1 = arith.constant 0 : i32
    return %arg0, %c0_i32, %c0_i32_0 : i32, i32, i32
  }
  func.func @transform_2(%arg0: i32) -> (i32, i32, i32) {
    %c0_i32 = arith.constant 0 : i32
    %c0_i32_0 = arith.constant 0 : i32
    %c0_i32_1 = arith.constant 0 : i32
    return %arg0, %c0_i32, %c0_i32_0 : i32, i32, i32
  }
}

</mosaic_0001>

<bundles_post_ra>
// kernel: tpu_custom_call.1
= control target key start
LH: loop header
LB: loop body
LE: loop exit
PB: predicated region body
PF: predicated region fallthrough
CT: control target
= control target key end

     0   :  { %7 = vsyncpa [#allocation3], 0  ;;  %s7740_s0 = inlined_call_operand.hbm [shape: f32[2,256], index: 0, kind: input, shape index: {}]   ;;  %s7741_s1 = inlined_call_operand.hbm [shape: f32[2,2,256], index: 1, kind: input, shape index: {}]   ;;  %s7742_s2 = inlined_call_operand.hbm [shape: f32[2,2,256], index: 2, kind: output, shape index: {}]  }
   0x1   :  { %8 = vsyncpa [#allocation6], 0 }
   0x2   :  { %10 = vsyncpa [#allocation6 + $0x1], 0 }
   0x3   :  { %11 = vsyncpa [#allocation4], 0 }
   0x4   :  { %13 = vsyncpa [#allocation4 + $0x1], 0  ;;  %s5496_s9 = smov 0   ;;  %s5498_s10 = smov 0  }
   0x5   :  { %s5500_s11 = smov 0   ;;  %s5502_s12 = smov 0  }
   0x6 LB: > { %s5517_s13 = sadd.s32 4294967295, %s5472_s12   ;;  %s4174_s14 = sadd.s32 4294967294, %s5472_s12   ;;  %s5472_s12 = sphi %s5502_s12, %s8408_s12   ;;  %s5468_s11 = sphi %s5500_s11, %s8407_s11   ;;  %s5464_s10 = sphi %s5498_s10, %s8406_s10   ;;  %s5460_s9 = sphi %s5496_s9, %s8405_s9  }
   0x7   : > { %p60_p0 = scmp.ne.s32.totalorder %s5464_s10, %s5460_s9  ;;  %p7743_p1 = scmp.eq.s32.totalorder %s5517_s13, 0 }
   0x8   : > { %p90_p3 = scmp.eq.s32.totalorder %s4174_s14, 1  ;;  %p4175_p5 = scmp.ge.s32.totalorder %s5472_s12, 1 }
   0x9   : > { %p5526_p4 = por %p7743_p1, %p60_p0  ;;  %p97_p7 = scmp.lt.s32.totalorder %s5472_s12, 3 }
   0xa   : > { %p5531_p6 = por %p90_p3, %p60_p0  ;;  %s5474_s18 = smov [#allocation2]  }
   0xb   : > { %s8039_s15 = scalar_select %p5526_p4, 1, 0 }
   0xc   : > { %s8040_s16 = scalar_select %p5531_p6, 1, 0 }
   0xd   : > { %p5536_p8 = pnand %p4175_p5, %p97_p7  ;;  %s110_s19 = sshll.u32 %s5474_s18, 4  ;;  %s111_s19 = int_to_ptr.vmem [resolvable:$true] %s110_s19 }
   0xe   : > { %s5544_s20 = sadd.s32 1, %s5472_s12   ;;  %s47_s24 = sadd.s32 1, %s5468_s11 }
   0xf   : > { %s8041_s17 = scalar_select %p5536_p8, 1, 0 }
  0x10   : > { %p5297_p10 = pneg %p5536_p8  ;;  %s44_s22 = ssub.s32 %s5472_s12, %s5544_s20 }
  0x11   : > { %p5554_p12 = scmp.eq.s32.totalorder %s44_s22, 0  ;;  %p54_p13 = scmp.ne.s32.totalorder %s5468_s11, %s5464_s10 }
  0x12   : > { %p5548_p11 = pnand %p5297_p10, %p7743_p1  ;;  %s5361_s25 = scalar_lea.vmem %s111_s19, 64 }
  0x13   : > { %p5362_p3 = scmp.ne.s32.totalorder %s111_s19, %s5361_s25  ;;  %p5369_p9 = scmp.lt.s32.totalorder %s111_s19, %s111_s19 }
  0x14   : > { %p5352_p0 = pneg %p5548_p11  ;;  %p5370_p2 = scmp.lt.s32.totalorder %s5361_s25, %s5361_s25 }
  0x16   : > { %p5364_p5 = pnand %p5362_p3, %p5352_p0  ;;  %p5371_p10 = por %p5370_p2, %p5369_p9 }
  0x18   : > { %p5365_p7 = pneg %p5364_p5 }
  0x1a   : > { %p5372_p1 = pnand %p5371_p10, %p5365_p7 }
  0x1c   : > { %5375 = shalt.err (!%p5372_p1)
}
  0x1d   : > { %5300 = dma.hbm_to_vmem [thread:$0]  (!%p5548_p11), %s7740_s0, 64, %s111_s19, [#allocation3]  }
  0x1e   : > { %s5571_s28 = scalar_select %p5554_p12, %s5468_s11, %s47_s24  }
  0x1f   : > { %p55_p1 = scmp.eq.s32.totalorder %s5472_s12, 0  ;;  %p8044_p2 = scmp.eq.s32.totalorder %s5517_s13, 1 }
  0x20   : > { %p5310_p0 = scmp.lt.s32.totalorder %s5472_s12, 2  ;;  %s121_s30 = sand.u32 1, %s5468_s11  }
  0x21   : > { %p5579_p9 = por %p8044_p2, %p54_p13  ;;  %p56_p3 = por %p55_p1, %p54_p13 }
  0x22   : > { %s4178_s3 = sshll.u32 %s121_s30, 2  ;;  %s4755_s4 = sshll.u32 %s5472_s12, 6 }
  0x23   : > { %s8045_s29 = scalar_select %p5579_p9, 1, 0 }
  0x24   : > { %s5592_s7 = scalar_lea.hbm %s7741_s1, %s4755_s4  ;;  %s125_s8 = scalar_lea.vmem [#allocation5], %s4178_s3 }
  0x25   : > { %s133_s14 = sshll.u32 %s125_s8, 4  ;;  %p5594_p11 = pnand %p5310_p0, %p56_p3  ;;  %s134_s14 = int_to_ptr.vmem [resolvable:$true] %s133_s14 }
  0x26   : > { %s122_s19 = scalar_lea.sflag [#allocation6], %s121_s30  ;;  %s5376_s21 = scalar_lea.hbm %s5592_s7, 64 }
  0x27   : > { %p5377_p12 = scmp.ne.s32.totalorder %s5592_s7, %s5376_s21  ;;  %p5378_p13 = pneg %p5594_p11 }
  0x28   : > { %s5381_s24 = scalar_lea.hbm %s7741_s1, 128  ;;  %p5382_p10 = scmp.lt.s32.totalorder %s5592_s7, %s7741_s1 }
  0x29   : > { %p5379_p5 = pnand %p5378_p13, %p5377_p12  ;;  %p5383_p1 = scmp.lt.s32.totalorder %s5381_s24, %s5376_s21 }
  0x2b   : > { %p5380_p7 = pneg %p5379_p5  ;;  %p5384_p2 = por %p5383_p1, %p5382_p10 }
  0x2d   : > { %p5385_p0 = pnand %p5384_p2, %p5380_p7 }
  0x2f   : > { %5388 = shalt.err (!%p5385_p0)
}
  0x30   : > { %s5389_s27 = scalar_lea.vmem %s134_s14, 64  ;;  %s5475_s30 = smov [#allocation5]  }
  0x31   : > { %p5390_p3 = scmp.ne.s32.totalorder %s134_s14, %s5389_s27  ;;  %s5394_s3 = sshll.u32 %s5475_s30, 4  ;;  %s5395_s3 = int_to_ptr.vmem [resolvable:$false] %s5394_s3 }
  0x32   : > { %s5396_s4 = scalar_lea.vmem %s5395_s3, 128  ;;  %p5397_p12 = scmp.lt.s32.totalorder %s134_s14, %s5395_s3 }
  0x33   : > { %p5392_p6 = pnand %p5390_p3, %p5378_p13  ;;  %p5398_p5 = scmp.lt.s32.totalorder %s5396_s4, %s5389_s27 }
  0x35   : > { %p5393_p9 = pneg %p5392_p6  ;;  %p5399_p4 = por %p5398_p5, %p5397_p12 }
  0x37   : > { %p5400_p8 = pnand %p5399_p4, %p5393_p9 }
  0x39   : > { %5403 = shalt.err (!%p5400_p8)
}
  0x3a   : > { %5304 = dma.hbm_to_vmem [thread:$0]  (!%p5594_p11), %s5592_s7, 64, %s134_s14, %s122_s19  }
  0x3b   : > { %p8047_p7 = scmp.ne.s32.totalorder %s8041_s17, 0 }
  0x3d   : > { %142 = sbr.rel (%p8047_p7) target bundleno = 3150 (0xc4e), region = 28 }
  0x42   : > { %p8048_p10 = scmp.eq.s32.totalorder %s5517_s13, 0 }
  0x44   : > { %5447 = dma.done.wait (%p8048_p10), [#allocation3], 64   ;;  %p8049_p6 = pmov %p8048_p10 }
  0x45   : > { %s5619_s5 = sand.u32 1, %s5464_s10   ;;  %v176_v0 = vlaneseq  ;;  %p8050_p4 = scmp.ne.s32.totalorder %s8039_s15, 0 }
  0x46   : > { %5449 = vsyncadd (%p8049_p6), [#allocation3], 4294967232  ;;  %s4183_s6 = sshll.u32 %s5619_s5, 2  ;;  %s149_s8 = scalar_lea.sflag [#allocation6], %s5619_s5 }
  0x47   : > { %s5625_s7 = scalar_lea.vmem [#allocation5], %s4183_s6 }
  0x48   : > { %5451 = dma.done.wait (%p8050_p4), %s149_s8, 64  }
  0x49   : > { %5453 = vsyncadd (%p8050_p4), %s149_s8, 4294967232  ;;  %v5631_v1 = vshrl.u32 %v176_v0, 7  ;;  %v417_v2 = vand.u32 127, %v176_v0  ;;  %v8051_v59 = vmov 0  ;;  %v8053_v60 = vmov 0  ;;  %s4756_s15 = sshll.u32 %s5517_s13, 6 }
  0x4a   : > { %v8055_v61 = vmov 0  ;;  %v7787_v63 = vmov 1.0   ;;  %v8057_v0 = vmov 0  ;;  %s172_s17 = scalar_lea.vmem [#allocation7], %s4183_s6  ;;  %s4090_s21 = scalar_lea.hbm %s7742_s2, %s4756_s15 }
  0x4b   : > { %v225_v3 = vadd.s32 248, %v5631_v1  ;;  %v5634_v4 = vcvt.s32.f32 %v417_v2  ;;  %v209_v5 = vadd.s32 120, %v5631_v1  ;;  %v224_v6 = vadd.s32 240, %v5631_v1  ;;  %s4092_s14 = sshll.u32 %s172_s17, 4  ;;  %s4078_s22 = scalar_lea.sflag [#allocation4], %s5619_s5  ;;  %s4093_s14 = int_to_ptr.vmem [resolvable:$true] %s4092_s14 }
  0x4c   : > { %v208_v7 = vadd.s32 112, %v5631_v1  ;;  %v223_v8 = vadd.s32 232, %v5631_v1  ;;  %v207_v9 = vadd.s32 104, %v5631_v1  ;;  %v222_v10 = vadd.s32 224, %v5631_v1  ;;  %s5404_s23 = scalar_lea.vmem %s4093_s14, 64  ;;  %p8402_p9 = scmp.ne.s32.totalorder %s8045_s29, 0 }
  0x4d   : > { %v255_v11 = vcvt.s32.f32 %v225_v3  ;;  %v239_v12 = vcvt.s32.f32 %v209_v5  ;;  %v254_v13 = vcvt.s32.f32 %v224_v6  ;;  %v206_v14 = vadd.s32 96, %v5631_v1  ;;  %p5405_p8 = scmp.ne.s32.totalorder %s4093_s14, %s5404_s23  ;;  %s5480_s24 = smov [#allocation7]  }
  0x4e   : > { %v238_v15 = vcvt.s32.f32 %v208_v7  ;;  %v253_v16 = vcvt.s32.f32 %v223_v8  ;;  %v237_v17 = vcvt.s32.f32 %v207_v9  ;;  %v252_v18 = vcvt.s32.f32 %v222_v10  ;;  %s5408_s13 = sshll.u32 %s5480_s24, 4  ;;  %s5409_s13 = int_to_ptr.vmem [resolvable:$false] %s5408_s13 }
  0x4f   : > { %v287_v19 = vadd.f32 0.5, %v255_v11  ;;  %v271_v20 = vadd.f32 0.5, %v239_v12  ;;  %v286_v21 = vadd.f32 0.5, %v254_v13  ;;  %v236_v22 = vcvt.s32.f32 %v206_v14  ;;  %p5406_p11 = pnand %p5405_p8, %p8402_p9  ;;  %s5410_s25 = scalar_lea.vmem %s5409_s13, 128 }
  0x50   : > { %v270_v23 = vadd.f32 0.5, %v238_v15  ;;  %v285_v24 = vadd.f32 0.5, %v253_v16  ;;  %v269_v25 = vadd.f32 0.5, %v237_v17  ;;  %v284_v26 = vadd.f32 0.5, %v252_v18  ;;  %p5411_p1 = scmp.lt.s32.totalorder %s4093_s14, %s5409_s13  ;;  %p5412_p2 = scmp.lt.s32.totalorder %s5410_s25, %s5404_s23 }
  0x51   : > { %v319_v27 = vmul.f32 0.0625, %v287_v19  ;;  %v303_v28 = vmul.f32 0.0625, %v271_v20  ;;  %v318_v29 = vmul.f32 0.0625, %v286_v21  ;;  %v268_v30 = vadd.f32 0.5, %v236_v22  ;;  %p5407_p13 = pneg %p5406_p11 }
  0x52   : > { %v302_v31 = vmul.f32 0.0625, %v270_v23  ;;  %v317_v32 = vmul.f32 0.0625, %v285_v24  ;;  %v301_v33 = vmul.f32 0.0625, %v269_v25  ;;  %v316_v34 = vmul.f32 0.0625, %v284_v26  ;;  %p5413_p0 = por %p5412_p2, %p5411_p1 }
  0x53   : > { %v351_v35 = vfloor.f32 %v319_v27  ;;  %v335_v36 = vfloor.f32 %v303_v28  ;;  %v350_v37 = vfloor.f32 %v318_v29  ;;  %v300_v38 = vmul.f32 0.0625, %v268_v30 }
  0x54   : > { %v334_v39 = vfloor.f32 %v302_v31  ;;  %v349_v40 = vfloor.f32 %v317_v32  ;;  %v333_v41 = vfloor.f32 %v301_v33  ;;  %v348_v42 = vfloor.f32 %v316_v34  ;;  %p5414_p3 = pnand %p5413_p0, %p5407_p13 }
  0x55   : > { %v383_v43 = vmul.f32 16.0, %v351_v35  ;;  %v367_v44 = vmul.f32 16.0, %v335_v36  ;;  %v382_v45 = vmul.f32 16.0, %v350_v37  ;;  %v332_v46 = vfloor.f32 %v300_v38 }
  0x56   : > { %v366_v47 = vmul.f32 16.0, %v334_v39  ;;  %v381_v48 = vmul.f32 16.0, %v349_v40  ;;  %v365_v49 = vmul.f32 16.0, %v333_v41  ;;  %v380_v50 = vmul.f32 16.0, %v348_v42 }
  0x57   : > { %v415_v51 = vsub.f32 %v255_v11, %v383_v43  ;;  %v399_v52 = vsub.f32 %v239_v12, %v367_v44  ;;  %v414_v53 = vsub.f32 %v254_v13, %v382_v45  ;;  %v364_v54 = vmul.f32 16.0, %v332_v46 }
  0x58   : > { %v398_v55 = vsub.f32 %v238_v15, %v366_v47  ;;  %v413_v56 = vsub.f32 %v253_v16, %v381_v48  ;;  %v397_v57 = vsub.f32 %v237_v17, %v365_v49  ;;  %v412_v58 = vsub.f32 %v252_v18, %v380_v50 }
  0x59   : > { %vm5644_vm0 = vcmp.eq.f32.partialorder %v415_v51, %v5634_v4  ;;  %vm5649_vm1 = vcmp.eq.f32.partialorder %v399_v52, %v5634_v4  ;;  %vm5654_vm2 = vcmp.eq.f32.partialorder %v414_v53, %v5634_v4  ;;  %v396_v62 = vsub.f32 %v236_v22, %v364_v54 }
  0x5a   : > { %v8052_v59 = vsel %vm5644_vm0, 4294967295, %v8051_v59  ;;  %v8054_v60 = vsel %vm5649_vm1, 4294967295, %v8053_v60  ;;  %v8056_v61 = vsel %vm5654_vm2, 4294967295, %v8055_v61  ;;  %4757 = vmatprep.subr.msk.mxu0 %vm5644_vm0, %v7787_v63  ;;  %4795 = vmatprep.subr.msk.mxu1 %vm5644_vm0, %v7787_v63  ;;  %vm5665_vm3 = vcmp.eq.f32.partialorder %v398_v55, %v5634_v4 }
  0x5b   : > { %v8058_v0 = vsel %vm5665_vm3, 4294967295, %v8057_v0  ;;  %vm5670_vm4 = vcmp.eq.f32.partialorder %v413_v56, %v5634_v4  ;;  %v8059_v2 = vmov 0  ;;  %vm5675_vm5 = vcmp.eq.f32.partialorder %v397_v57, %v5634_v4  ;;  %4758 = vmatpush3.msk.msra.mxu0 %vm5649_vm1, %v7787_v63  ;;  %4796 = vmatpush3.msk.msra.mxu1 %vm5649_vm1, %v7787_v63 }
  0x5c   : > { %v8060_v2 = vsel %vm5670_vm4, 4294967295, %v8059_v2  ;;  %v8061_v3 = vmov 0  ;;  %v221_v5 = vadd.s32 216, %v5631_v1  ;;  %vm5687_vm6 = vcmp.eq.f32.partialorder %v412_v58, %v5634_v4  ;;  %4759 = vmatprep.subr.msk.mxu0 %vm5654_vm2, %v7787_v63  ;;  %4797 = vmatprep.subr.msk.mxu1 %vm5654_vm2, %v7787_v63 }
  0x5d   : > { %v8062_v3 = vsel %vm5675_vm5, 4294967295, %v8061_v3  ;;  %v8063_v6 = vmov 0  ;;  %vm5692_vm7 = vcmp.eq.f32.partialorder %v396_v62, %v5634_v4  ;;  %v8065_v7 = vmov 0  ;;  %4760 = vmatpush3.msk.msra.mxu0 %vm5665_vm3, %v7787_v63  ;;  %4798 = vmatpush3.msk.msra.mxu1 %vm5665_vm3, %v7787_v63 }
  0x5e   : > { %v8064_v6 = vsel %vm5687_vm6, 4294967295, %v8063_v6  ;;  %v8066_v7 = vsel %vm5692_vm7, 4294967295, %v8065_v7  ;;  %v205_v8 = vadd.s32 88, %v5631_v1  ;;  %v220_v9 = vadd.s32 208, %v5631_v1  ;;  %4761 = vmatprep.subr.msk.mxu0 %vm5670_vm4, %v7787_v63  ;;  %4799 = vmatprep.subr.msk.mxu1 %vm5670_vm4, %v7787_v63 }
  0x5f   : > { %v251_v10 = vcvt.s32.f32 %v221_v5  ;;  %v204_v11 = vadd.s32 80, %v5631_v1  ;;  %v219_v12 = vadd.s32 200, %v5631_v1  ;;  %v203_v13 = vadd.s32 72, %v5631_v1  ;;  %4762 = vmatpush3.msk.msra.mxu0 %vm5675_vm5, %v7787_v63  ;;  %4800 = vmatpush3.msk.msra.mxu1 %vm5675_vm5, %v7787_v63 }
  0x60   : > { %v235_v14 = vcvt.s32.f32 %v205_v8  ;;  %v250_v15 = vcvt.s32.f32 %v220_v9  ;;  %v218_v16 = vadd.s32 192, %v5631_v1  ;;  %v5715_v17 = vadd.s32 64, %v5631_v1  ;;  %4763 = vmatprep.subr.msk.mxu0 %vm5687_vm6, %v7787_v63  ;;  %4801 = vmatprep.subr.msk.mxu1 %vm5687_vm6, %v7787_v63 }
  0x61   : > { %v283_v18 = vadd.f32 0.5, %v251_v10  ;;  %v234_v19 = vcvt.s32.f32 %v204_v11  ;;  %v249_v20 = vcvt.s32.f32 %v219_v12  ;;  %v233_v21 = vcvt.s32.f32 %v203_v13  ;;  %4764 = vmatpush3.msk.msra.mxu0 %vm5692_vm7, %v7787_v63  ;;  %4802 = vmatpush3.msk.msra.mxu1 %vm5692_vm7, %v7787_v63 }
  0x62   : > { %v267_v22 = vadd.f32 0.5, %v235_v14  ;;  %v282_v23 = vadd.f32 0.5, %v250_v15  ;;  %v248_v24 = vcvt.s32.f32 %v218_v16  ;;  %v232_v25 = vcvt.s32.f32 %v5715_v17 }
  0x63   : > { %v315_v26 = vmul.f32 0.0625, %v283_v18  ;;  %v266_v27 = vadd.f32 0.5, %v234_v19  ;;  %v281_v28 = vadd.f32 0.5, %v249_v20  ;;  %v265_v29 = vadd.f32 0.5, %v233_v21 }
  0x64   : > { %v299_v30 = vmul.f32 0.0625, %v267_v22  ;;  %v314_v31 = vmul.f32 0.0625, %v282_v23  ;;  %v280_v32 = vadd.f32 0.5, %v248_v24  ;;  %v264_v33 = vadd.f32 0.5, %v232_v25 }
  0x65   : > { %v347_v34 = vfloor.f32 %v315_v26  ;;  %v298_v35 = vmul.f32 0.0625, %v266_v27  ;;  %v313_v36 = vmul.f32 0.0625, %v281_v28  ;;  %v297_v37 = vmul.f32 0.0625, %v265_v29  ;;  %v5823_v27 = vld [vmem:[#allocation2] ss:$2 sm:$0x3] }
  0x66   : > { %v331_v38 = vfloor.f32 %v299_v30  ;;  %v346_v39 = vfloor.f32 %v314_v31  ;;  %v312_v40 = vmul.f32 0.0625, %v280_v32  ;;  %v296_v41 = vmul.f32 0.0625, %v264_v33 }
  0x67   : > { %v379_v42 = vmul.f32 16.0, %v347_v34  ;;  %v330_v43 = vfloor.f32 %v298_v35  ;;  %v345_v44 = vfloor.f32 %v313_v36  ;;  %v329_v45 = vfloor.f32 %v297_v37 }
  0x68   : > { %v363_v46 = vmul.f32 16.0, %v331_v38  ;;  %v378_v47 = vmul.f32 16.0, %v346_v39  ;;  %v344_v48 = vfloor.f32 %v312_v40  ;;  %v328_v49 = vfloor.f32 %v296_v41 }
  0x69   : > { %v411_v50 = vsub.f32 %v251_v10, %v379_v42  ;;  %v362_v51 = vmul.f32 16.0, %v330_v43  ;;  %v377_v52 = vmul.f32 16.0, %v345_v44  ;;  %v361_v53 = vmul.f32 16.0, %v329_v45 }
  0x6a   : > { %v395_v54 = vsub.f32 %v235_v14, %v363_v46  ;;  %v410_v55 = vsub.f32 %v250_v15, %v378_v47  ;;  %v376_v56 = vmul.f32 16.0, %v344_v48  ;;  %v360_v57 = vmul.f32 16.0, %v328_v49 }
  0x6b   : > { %vm5743_vm8 = vcmp.eq.f32.partialorder %v411_v50, %v5634_v4  ;;  %v8067_v58 = vmov 0  ;;  %v394_v62 = vsub.f32 %v234_v19, %v362_v51  ;;  %v409_v5 = vsub.f32 %v249_v20, %v377_v52 }
  0x6c   : > { %v8068_v58 = vsel %vm5743_vm8, 4294967295, %v8067_v58  ;;  %v393_v8 = vsub.f32 %v233_v21, %v361_v53  ;;  %4765 = vmatprep.subr.msk.mxu0 %vm5743_vm8, %v7787_v63  ;;  %4803 = vmatprep.subr.msk.mxu1 %vm5743_vm8, %v7787_v63  ;;  %vm5754_vm9 = vcmp.eq.f32.partialorder %v395_v54, %v5634_v4  ;;  %v8069_v9 = vmov 0 }
  0x6d   : > { %v8070_v9 = vsel %vm5754_vm9, 4294967295, %v8069_v9  ;;  %vm5759_vm10 = vcmp.eq.f32.partialorder %v410_v55, %v5634_v4  ;;  %v8071_v10 = vmov 0  ;;  %v408_v11 = vsub.f32 %v248_v24, %v376_v56  ;;  %4766 = vmatpush3.msk.msra.mxu0 %vm5754_vm9, %v7787_v63  ;;  %4804 = vmatpush3.msk.msra.mxu1 %vm5754_vm9, %v7787_v63 }
  0x6e   : > { %v8072_v10 = vsel %vm5759_vm10, 4294967295, %v8071_v10  ;;  %v217_v12 = vadd.s32 184, %v5631_v1  ;;  %vm5771_vm11 = vcmp.eq.f32.partialorder %v394_v62, %v5634_v4  ;;  %v8073_v13 = vmov 0  ;;  %4767 = vmatprep.subr.msk.mxu0 %vm5759_vm10, %v7787_v63  ;;  %4805 = vmatprep.subr.msk.mxu1 %vm5759_vm10, %v7787_v63 }
  0x6f   : > { %v8074_v13 = vsel %vm5771_vm11, 4294967295, %v8073_v13  ;;  %vm5776_vm12 = vcmp.eq.f32.partialorder %v409_v5, %v5634_v4  ;;  %v8075_v14 = vmov 0  ;;  %v5477_v15 = vmov 857870592   ;;  %4768 = vmatpush3.msk.msra.mxu0 %vm5771_vm11, %v7787_v63  ;;  %4806 = vmatpush3.msk.msra.mxu1 %vm5771_vm11, %v7787_v63 }
  0x70   : > { %v8076_v14 = vsel %vm5776_vm12, 4294967295, %v8075_v14  ;;  %v5780_v16 = vunpack.c.l.s4 %v5477_v15  ;;  %vm5789_vm13 = vcmp.eq.f32.partialorder %v393_v8, %v5634_v4  ;;  %v8077_v17 = vmov 0  ;;  %4769 = vmatprep.subr.msk.mxu0 %vm5776_vm12, %v7787_v63  ;;  %4807 = vmatprep.subr.msk.mxu1 %vm5776_vm12, %v7787_v63 }
  0x71   : > { %v8078_v17 = vsel %vm5789_vm13, 4294967295, %v8077_v17  ;;  %v392_v18 = vsub.f32 %v232_v25, %v360_v57  ;;  %v247_v19 = vcvt.s32.f32 %v217_v12  ;;  %v178_v20 = vadd.s32 8, %v5631_v1  ;;  %4770 = vmatpush3.msk.msra.mxu0 %vm5789_vm13, %v7787_v63  ;;  %4808 = vmatpush3.msk.msra.mxu1 %vm5789_vm13, %v7787_v63 }
  0x72   : > { %vm5801_vm14 = vcmp.eq.f32.partialorder %v408_v11, %v5634_v4  ;;  %v8079_v21 = vmov 0  ;;  %v5806_v22 = vsub.s32 0, %v5631_v1  ;;  %v5809_v23 = vsub.s32 1, %v5631_v1 }
  0x73   : > { %v8080_v21 = vsel %vm5801_vm14, 4294967295, %v8079_v21  ;;  %v201_v24 = vadd.s32 56, %v5631_v1  ;;  %vm5819_vm15 = vcmp.eq.f32.partialorder %v392_v18, %v5634_v4  ;;  %v8081_v25 = vmov 0  ;;  %4771 = vmatprep.subr.msk.mxu0 %vm5801_vm14, %v7787_v63  ;;  %4809 = vmatprep.subr.msk.mxu1 %vm5801_vm14, %v7787_v63 }
  0x74   : > { %v8082_v25 = vsel %vm5819_vm15, 4294967295, %v8081_v25  ;;  %v279_v26 = vadd.f32 0.5, %v247_v19  ;;  %v216_v28 = vadd.s32 176, %v5631_v1  ;;  %v200_v29 = vadd.s32 48, %v5631_v1  ;;  %4772 = vmatpush3.msk.msra.mxu0 %vm5819_vm15, %v7787_v63  ;;  %4810 = vmatpush3.msk.msra.mxu1 %vm5819_vm15, %v7787_v63 }
  0x75   : > { %v231_v30 = vcvt.s32.f32 %v201_v24  ;;  %v5834_v31 = vadd.s32 168, %v5631_v1  ;;  %v520_v32 = vunpack.c.0.s8 %v5780_v16  ;;  %v199_v36 = vadd.s32 40, %v5631_v1 }
  0x76   : > { %v311_v33 = vmul.f32 0.0625, %v279_v26  ;;  %v246_v34 = vcvt.s32.f32 %v216_v28  ;;  %v230_v35 = vcvt.s32.f32 %v200_v29  ;;  %v5851_v37 = vcvt.s32.f32 %v5631_v1 }
  0x77   : > { %v5853_v38 = vcvt.s32.f32 %v178_v20  ;;  %v5857_v39 = vrot.slane %v5823_v27, %v5806_v22  ;;  %v263_v40 = vadd.f32 0.5, %v231_v30  ;;  %v5861_v42 = vrot.slane %v5823_v27, %v5809_v23 }
  0x78   : > { %v343_v41 = vfloor.f32 %v311_v33  ;;  %v278_v43 = vadd.f32 0.5, %v246_v34  ;;  %v262_v44 = vadd.f32 0.5, %v230_v35  ;;  %v245_v46 = vcvt.s32.f32 %v5834_v31 }
  0x79   : > { %v295_v45 = vmul.f32 0.0625, %v263_v40  ;;  %v229_v47 = vcvt.s32.f32 %v199_v36  ;;  %v214_v48 = vadd.s32 160, %v5631_v1  ;;  %v198_v52 = vadd.s32 32, %v5631_v1 }
  0x7a   : > { %v375_v49 = vmul.f32 16.0, %v343_v41  ;;  %v310_v50 = vmul.f32 0.0625, %v278_v43  ;;  %v294_v51 = vmul.f32 0.0625, %v262_v44  ;;  %v277_v54 = vadd.f32 0.5, %v245_v46 }
  0x7b   : > { %v327_v53 = vfloor.f32 %v295_v45  ;;  %v261_v55 = vadd.f32 0.5, %v229_v47  ;;  %v244_v56 = vcvt.s32.f32 %v214_v48  ;;  %v228_v8 = vcvt.s32.f32 %v198_v52 }
  0x7c   : > { %v407_v57 = vsub.f32 %v247_v19, %v375_v49  ;;  %v342_v62 = vfloor.f32 %v310_v50  ;;  %v326_v5 = vfloor.f32 %v294_v51  ;;  %v309_v12 = vmul.f32 0.0625, %v277_v54 }
  0x7d   : > { %v359_v11 = vmul.f32 16.0, %v327_v53  ;;  %v293_v15 = vmul.f32 0.0625, %v261_v55  ;;  %v276_v18 = vadd.f32 0.5, %v244_v56  ;;  %v8083_v20 = vmov 0 }
  0x7e   : > { %vm5867_vm15 = vcmp.eq.f32.partialorder %v407_v57, %v5634_v4  ;;  %v374_v24 = vmul.f32 16.0, %v342_v62  ;;  %v358_v26 = vmul.f32 16.0, %v326_v5  ;;  %v260_v28 = vadd.f32 0.5, %v228_v8 }
  0x7f   : > { %v8084_v20 = vsel %vm5867_vm15, 4294967295, %v8083_v20  ;;  %4773 = vmatprep.subr.msk.mxu0 %vm5867_vm15, %v7787_v63  ;;  %4811 = vmatprep.subr.msk.mxu1 %vm5867_vm15, %v7787_v63  ;;  %v391_v19 = vsub.f32 %v231_v30, %v359_v11  ;;  %v341_v29 = vfloor.f32 %v309_v12  ;;  %v325_v31 = vfloor.f32 %v293_v15 }
  0x80   : > { %v308_v33 = vmul.f32 0.0625, %v276_v18  ;;  %v406_v36 = vsub.f32 %v246_v34, %v374_v24  ;;  %v390_v40 = vsub.f32 %v230_v35, %v358_v26  ;;  %v292_v41 = vmul.f32 0.0625, %v260_v28 }
  0x81   : > { %v213_v43 = vadd.s32 152, %v5631_v1  ;;  %vm5879_vm14 = vcmp.eq.f32.partialorder %v391_v19, %v5634_v4  ;;  %v8085_v44 = vmov 0  ;;  %v373_v45 = vmul.f32 16.0, %v341_v29 }
  0x82   : > { %v8086_v44 = vsel %vm5879_vm14, 4294967295, %v8085_v44  ;;  %v357_v48 = vmul.f32 16.0, %v325_v31  ;;  %v340_v49 = vfloor.f32 %v308_v33  ;;  %4774 = vmatpush3.msk.msra.mxu0 %vm5879_vm14, %v7787_v63  ;;  %4812 = vmatpush3.msk.msra.mxu1 %vm5879_vm14, %v7787_v63  ;;  %vm5890_vm15 = vcmp.eq.f32.partialorder %v406_v36, %v5634_v4 }
  0x83   : > { %8087 = vst [vmem:[#allocation11_spill] sm:$0xff] %v8086_v44  ;;  %v8088_v30 = vmov 0  ;;  %vm5895_vm13 = vcmp.eq.f32.partialorder %v390_v40, %v5634_v4  ;;  %v8091_v34 = vmov 0  ;;  %v324_v35 = vfloor.f32 %v292_v41  ;;  %4775 = vmatprep.subr.msk.mxu0 %vm5890_vm15, %v7787_v63  ;;  %4813 = vmatprep.subr.msk.mxu1 %vm5890_vm15, %v7787_v63 }
  0x84   : > { %v8089_v30 = vsel %vm5890_vm15, 4294967295, %v8088_v30  ;;  %v8092_v34 = vsel %vm5895_vm13, 4294967295, %v8091_v34  ;;  %v243_v50 = vcvt.s32.f32 %v213_v43  ;;  %v405_v51 = vsub.f32 %v245_v46, %v373_v45  ;;  %4776 = vmatpush3.msk.msra.mxu0 %vm5895_vm13, %v7787_v63  ;;  %4814 = vmatpush3.msk.msra.mxu1 %vm5895_vm13, %v7787_v63 }
  0x85   : > { %8090 = vst [vmem:[#allocation12_spill] sm:$0xff] %v8089_v30  ;;  %8093 = vst [vmem:[#allocation13_spill] sm:$0xff] %v8092_v34  ;;  %v389_v52 = vsub.f32 %v229_v47, %v357_v48  ;;  %v372_v53 = vmul.f32 16.0, %v340_v49  ;;  %v197_v54 = vadd.s32 24, %v5631_v1  ;;  %v356_v55 = vmul.f32 16.0, %v324_v35 }
  0x86   : > { %v275_v57 = vadd.f32 0.5, %v243_v50  ;;  %v212_v62 = vadd.s32 144, %v5631_v1  ;;  %v196_v5 = vadd.s32 16, %v5631_v1  ;;  %vm5915_vm15 = vcmp.eq.f32.partialorder %v405_v51, %v5634_v4 }
  0x87   : > { %v8094_v46 = vmov 0  ;;  %vm5920_vm14 = vcmp.eq.f32.partialorder %v389_v52, %v5634_v4  ;;  %v8097_v47 = vmov 0  ;;  %v404_v11 = vsub.f32 %v244_v56, %v372_v53  ;;  %4777 = vmatprep.subr.msk.mxu0 %vm5915_vm15, %v7787_v63  ;;  %4815 = vmatprep.subr.msk.mxu1 %vm5915_vm15, %v7787_v63 }
  0x88   : > { %v8095_v46 = vsel %vm5915_vm15, 4294967295, %v8094_v46  ;;  %v8098_v47 = vsel %vm5920_vm14, 4294967295, %v8097_v47  ;;  %v227_v12 = vcvt.s32.f32 %v197_v54  ;;  %v388_v15 = vsub.f32 %v228_v8, %v356_v55  ;;  %4778 = vmatpush3.msk.msra.mxu0 %vm5920_vm14, %v7787_v63  ;;  %4816 = vmatpush3.msk.msra.mxu1 %vm5920_vm14, %v7787_v63 }
  0x89   : > { %8096 = vst [vmem:[#allocation14_spill] sm:$0xff] %v8095_v46  ;;  %8099 = vst [vmem:[#allocation15_spill] sm:$0xff] %v8098_v47  ;;  %v307_v18 = vmul.f32 0.0625, %v275_v57  ;;  %v242_v24 = vcvt.s32.f32 %v212_v62  ;;  %v226_v26 = vcvt.s32.f32 %v196_v5  ;;  %vm5937_vm13 = vcmp.eq.f32.partialorder %v404_v11, %v5634_v4 }
  0x8a   : > { %v8100_v56 = vmov 0  ;;  %v259_v28 = vadd.f32 0.5, %v227_v12  ;;  %v211_v19 = vadd.s32 136, %v5631_v1  ;;  %v257_v8 = vadd.f32 0.5, %v5853_v38  ;;  %4779 = vmatprep.subr.msk.mxu0 %vm5937_vm13, %v7787_v63  ;;  %4817 = vmatprep.subr.msk.mxu1 %vm5937_vm13, %v7787_v63 }
  0x8b   : > { %v8101_v56 = vsel %vm5937_vm13, 4294967295, %v8100_v56  ;;  %vm5950_vm14 = vcmp.eq.f32.partialorder %v388_v15, %v5634_v4  ;;  %v8103_v29 = vmov 0  ;;  %v339_v31 = vfloor.f32 %v307_v18 }
  0x8c   : > { %8102 = vst [vmem:[#allocation16_spill] sm:$0xff] %v8101_v56  ;;  %v8104_v29 = vsel %vm5950_vm14, 4294967295, %v8103_v29  ;;  %v274_v33 = vadd.f32 0.5, %v242_v24  ;;  %v258_v36 = vadd.f32 0.5, %v226_v26  ;;  %4780 = vmatpush3.msk.msra.mxu0 %vm5950_vm14, %v7787_v63  ;;  %4818 = vmatpush3.msk.msra.mxu1 %vm5950_vm14, %v7787_v63  ;;  %v291_v40 = vmul.f32 0.0625, %v259_v28 }
  0x8d   : > { %8105 = vst [vmem:[#allocation17_spill] sm:$0xff] %v8104_v29  ;;  %v241_v41 = vcvt.s32.f32 %v211_v19  ;;  %v289_v43 = vmul.f32 0.0625, %v257_v8  ;;  %v210_v45 = vadd.s32 128, %v5631_v1  ;;  %v371_v48 = vmul.f32 16.0, %v339_v31  ;;  %v515_v8 = vld [vmem:[%s5625_s7] sm:$0xf] }
  0x8e   : > { %v306_v49 = vmul.f32 0.0625, %v274_v33  ;;  %v290_v35 = vmul.f32 0.0625, %v258_v36  ;;  %v256_v51 = vadd.f32 0.5, %v5851_v37  ;;  %v323_v52 = vfloor.f32 %v291_v40 }
  0x8f   : > { %v273_v53 = vadd.f32 0.5, %v241_v41  ;;  %v321_v54 = vfloor.f32 %v289_v43  ;;  %v240_v55 = vcvt.s32.f32 %v210_v45  ;;  %v403_v57 = vsub.f32 %v243_v50, %v371_v48 }
  0x90   : > { %v338_v62 = vfloor.f32 %v306_v49  ;;  %v322_v5 = vfloor.f32 %v290_v35  ;;  %v288_v11 = vmul.f32 0.0625, %v256_v51  ;;  %v355_v15 = vmul.f32 16.0, %v323_v52 }
  0x91   : > { %v305_v18 = vmul.f32 0.0625, %v273_v53  ;;  %v353_v28 = vmul.f32 16.0, %v321_v54  ;;  %v272_v19 = vadd.f32 0.5, %v240_v55  ;;  %vm5964_vm14 = vcmp.eq.f32.partialorder %v403_v57, %v5634_v4 }
  0x92   : > { %v8106_v31 = vmov 0  ;;  %v370_v33 = vmul.f32 16.0, %v338_v62  ;;  %v354_v36 = vmul.f32 16.0, %v322_v5  ;;  %v320_v40 = vfloor.f32 %v288_v11  ;;  %4781 = vmatprep.subr.msk.mxu0 %vm5964_vm14, %v7787_v63  ;;  %4819 = vmatprep.subr.msk.mxu1 %vm5964_vm14, %v7787_v63 }
  0x93   : > { %v8107_v31 = vsel %vm5964_vm14, 4294967295, %v8106_v31  ;;  %v387_v50 = vsub.f32 %v227_v12, %v355_v15  ;;  %v337_v43 = vfloor.f32 %v305_v18  ;;  %v385_v45 = vsub.f32 %v5853_v38, %v353_v28 }
  0x94   : > { %8108 = vst [vmem:[#allocation18_spill] sm:$0xff] %v8107_v31  ;;  %v304_v48 = vmul.f32 0.0625, %v272_v19  ;;  %v402_v49 = vsub.f32 %v242_v24, %v370_v33  ;;  %v386_v35 = vsub.f32 %v226_v26, %v354_v36  ;;  %v352_v51 = vmul.f32 16.0, %v320_v40 }
  0x95   : > { %v5975_v52 = vmul.f32 0.0078125, %v515_v8  ;;  %vm5979_vm13 = vcmp.eq.f32.partialorder %v5851_v37, %v5861_v42  ;;  %v8109_v53 = vmov 0  ;;  %vm5984_vm15 = vcmp.eq.f32.partialorder %v387_v50, %v5634_v4 }
  0x96   : > { %v8110_v53 = vsel %vm5979_vm13, 4294967295, %v8109_v53  ;;  %v8111_v54 = vmov 0  ;;  %v369_v12 = vmul.f32 16.0, %v337_v43  ;;  %v336_v57 = vfloor.f32 %v304_v48  ;;  %4782 = vmatpush3.msk.msra.mxu0 %vm5984_vm15, %v7787_v63  ;;  %4820 = vmatpush3.msk.msra.mxu1 %vm5984_vm15, %v7787_v63  ;;  %v175_v43 = vld [vmem:[#allocation2 + $0x1] ss:$2 sm:$0x3] }
  0x97   : > { %v8112_v54 = vsel %vm5984_vm15, 4294967295, %v8111_v54  ;;  %vm5995_vm14 = vcmp.eq.f32.partialorder %v402_v49, %v5634_v4  ;;  %v8114_v24 = vmov 0  ;;  %vm6000_vm12 = vcmp.eq.f32.partialorder %v386_v35, %v5634_v4 }
  0x98   : > { %8113 = vst [vmem:[#allocation19_spill] sm:$0xff] %v8112_v54  ;;  %v8115_v24 = vsel %vm5995_vm14, 4294967295, %v8114_v24  ;;  %v8117_v26 = vmov 0  ;;  %v384_v62 = vsub.f32 %v5851_v37, %v352_v51  ;;  %v6006_v5 = vsub.s32 2, %v5631_v1  ;;  %4783 = vmatprep.subr.msk.mxu0 %vm5995_vm14, %v7787_v63  ;;  %4821 = vmatprep.subr.msk.mxu1 %vm5995_vm14, %v7787_v63 }
  0x99   : > { %8116 = vst [vmem:[#allocation20_spill] sm:$0xff] %v8115_v24  ;;  %v8118_v26 = vsel %vm6000_vm12, 4294967295, %v8117_v26  ;;  %v401_v11 = vsub.f32 %v241_v41, %v369_v12  ;;  %v368_v15 = vmul.f32 16.0, %v336_v57  ;;  %v6015_v18 = vsub.s32 3, %v5631_v1  ;;  %4784 = vmatpush3.msk.msra.mxu0 %vm6000_vm12, %v7787_v63  ;;  %4822 = vmatpush3.msk.msra.mxu1 %vm6000_vm12, %v7787_v63 }
  0x9a   : > { %8119 = vst [vmem:[#allocation21_spill] sm:$0xff] %v8118_v26  ;;  %v615_v28 = vrot.slane %v5975_v52, %v5806_v22  ;;  %vm6026_vm15 = vcmp.eq.f32.partialorder %v385_v45, %v5634_v4  ;;  %v8120_v19 = vmov 0  ;;  %v619_v41 = vrot.slane %v5975_v52, %v6006_v5 }
  0x9b   : > { %v8121_v19 = vsel %vm6026_vm15, 4294967295, %v8120_v19  ;;  %v712_v8 = vrot.slane %v5975_v52, %v5809_v23  ;;  %vm6035_vm14 = vcmp.eq.f32.partialorder %v401_v11, %v5634_v4  ;;  %v8123_v33 = vmov 0 }
  0x9c   : > { %8122 = vst [vmem:[#allocation22_spill] sm:$0xff] %v8121_v19  ;;  %v8124_v33 = vsel %vm6035_vm14, 4294967295, %v8123_v33  ;;  %v400_v36 = vsub.f32 %v240_v55, %v368_v15  ;;  %vm6040_vm11 = vcmp.eq.f32.partialorder %v384_v62, %v5634_v4  ;;  %v8126_v40 = vmov 0  ;;  %4785 = vmatprep.subr.msk.mxu0 %vm6035_vm14, %v7787_v63  ;;  %4823 = vmatprep.subr.msk.mxu1 %vm6035_vm14, %v7787_v63 }
  0x9d   : > { %8125 = vst [vmem:[#allocation23_spill] sm:$0xff] %v8124_v33  ;;  %v8127_v40 = vsel %vm6040_vm11, 4294967295, %v8126_v40  ;;  %v716_v50 = vrot.slane %v5975_v52, %v6015_v18  ;;  %v629_v45 = vrot.slane %v619_v41, %v5806_v22  ;;  %v625_v55 = vrot.slane %v615_v28, %v5806_v22  ;;  %4786 = vmatpush3.msk.msra.mxu0 %vm6026_vm15, %v7787_v63 }
  0x9e   : > { %8128 = vst [vmem:[#allocation24_spill] sm:$0xff] %v8127_v40  ;;  %v6055_v48 = vmul.f32 7.5, %v5975_v52  ;;  %v6060_v49 = vsub.s32 %v520_v32, %v5631_v1  ;;  %4824 = vmatpush3.msk.msra.mxu1 %vm6026_vm15, %v7787_v63  ;;  %vm6069_vm14 = vcmp.eq.f32.partialorder %v400_v36, %v5634_v4  ;;  %v8129_v35 = vmov 0 }
  0x9f   : > { %v8130_v35 = vsel %vm6069_vm14, 4294967295, %v8129_v35  ;;  %v726_v51 = vrot.slane %v716_v50, %v5809_v23  ;;  %v722_v12 = vrot.slane %v712_v8, %v5809_v23  ;;  %vm6077_vm12 = vcmp.eq.f32.partialorder %v5851_v37, %v5857_v39  ;;  %4787 = vmatprep.subr.msk.mxu0 %vm6069_vm14, %v7787_v63  ;;  %4825 = vmatprep.subr.msk.mxu1 %vm6069_vm14, %v7787_v63 }
  0xa0   : > { %8131 = vst [vmem:[#allocation25_spill] sm:$0xff] %v8130_v35  ;;  %v8132_v16 = vmov 0  ;;  %v6088_v4 = vrot.slane %v175_v43, %v6060_v49  ;;  %vm6092_vm15 = vcmp.eq.f32.partialorder %v5853_v38, %v5861_v42  ;;  %v8134_v32 = vmov 0  ;;  %4788 = vmatpush3.msk.msra.mxu0 %vm6040_vm11, %v7787_v63  ;;  %4249 = vmatprep.mubr.msk.f32.mxu0 %vm5979_vm13, %v629_v45 }
  0xa1   : > { %v8133_v16 = vsel %vm6077_vm12, 4294967295, %v8132_v16  ;;  %v8135_v32 = vsel %vm6092_vm15, 4294967295, %v8134_v32  ;;  %4826 = vmatpush3.msk.msra.mxu1 %vm6040_vm11, %v7787_v63  ;;  %4285 = vmatprep.mubr.msk.f32.mxu1 %vm5979_vm13, %v726_v51  ;;  %vm6114_vm14 = vcmp.eq.f32.partialorder %v5853_v38, %v5857_v39  ;;  %v8137_v57 = vmov 0 }
  0xa2   : > { %8136 = vst [vmem:[#allocation26_spill] sm:$0xff] %v8135_v32  ;;  %v538_v42 = vadd.f32 %v6088_v4, %v6055_v48  ;;  %4250 = vmatmul.mubr.msk.f32.vlgmr.msra.gmra.mxu0 %vm6077_vm12, %v625_v55  ;;  %4286 = vmatmul.mubr.msk.f32.vlgmr.msra.gmra.mxu1 %vm6077_vm12, %v722_v12  ;;  %v8138_v57 = vsel %vm6114_vm14, 4294967295, %v8137_v57 }
  0xa3   : > { %8139 = vst [vmem:[#allocation27_spill] sm:$0xff] %v8138_v57  ;;  %4251 = vmatprep.mubr.msk.f32.mxu0 %vm6092_vm15, %v629_v45  ;;  %4287 = vmatprep.mubr.msk.f32.mxu1 %vm6092_vm15, %v726_v51 }
  0xa4   : > { %v539_v62 = vmax.f32 %v538_v42, 0.0 }
  0xa6   : > { %v540_v11 = vmin.f32 %v539_v62, 15.0  ;;  %4252 = vmatmul.mubr.msk.f32.gmra.mxu0 %vm6114_vm14, %v625_v55  ;;  %4288 = vmatmul.mubr.msk.f32.gmra.mxu1 %vm6114_vm14, %v722_v12  ;;  %vm7795_vm14 = vcmask 130048  }
  0xa8   : > { %v584_v15 = vrot.slane %v540_v11, %v6015_v18  ;;  %v580_v39 = vrot.slane %v540_v11, %v5809_v23 }
  0xaa   : > { %v594_v28 = vrot.slane %v584_v15, %v5809_v23  ;;  %v590_v41 = vrot.slane %v580_v39, %v5809_v23 }
  0xac   : > { %v598_v8 = vsub.f32 %v5853_v38, %v594_v28  ;;  %v597_v36 = vsub.f32 %v5853_v38, %v590_v41  ;;  %v596_v12 = vsub.f32 %v5851_v37, %v594_v28  ;;  %v595_v62 = vsub.f32 %v5851_v37, %v590_v41 }
  0xae   : > { %v602_v50 = vand.u32 2147483647, %v598_v8  ;;  %v601_v43 = vand.u32 2147483647, %v597_v36  ;;  %v600_v11 = vand.u32 2147483647, %v596_v12 }
  0xaf   : > { %v599_v15 = vand.u32 2147483647, %v595_v62  ;;  %v7818_v8 = vmov 0.0   ;;  %v8140_v36 = vmov 1.0   ;;  %v6336_v62 = vrot.slane %v5823_v27, %v6060_v49 }
  0xb0   : > { %v606_v45 = vsub.f32 1.0, %v602_v50  ;;  %v605_v51 = vsub.f32 1.0, %v601_v43  ;;  %v604_v39 = vsub.f32 1.0, %v600_v11  ;;  %877 = vmatprep.mubr.f32.mxu0 %v7818_v8  ;;  %960 = vmatprep.mubr.f32.mxu1 %v7818_v8 }
  0xb1   : > { %v603_v63 = vsub.f32 1.0, %v599_v15  ;;  %8161 = vst [vmem:[#allocation28_spill] sm:$0xff] %v6336_v62  ;;  %v526_v11 = vadd.f32 %v6336_v62, %v6055_v48 }
  0xb2   : > { %v610_v55 = vmax.f32 %v606_v45, 0.0  ;;  %v609_v42 = vmax.f32 %v605_v51, 0.0  ;;  %v608_v57 = vmax.f32 %v604_v39, 0.0 }
  0xb3   : > { %v607_v32 = vmax.f32 %v603_v63, 0.0  ;;  %v527_v15 = vmax.f32 %v526_v11, 0.0 }
  0xb4   : > { %924 = vmatprep.subr.mxu1 %v610_v55  ;;  %841 = vmatprep.subr.mxu0 %v610_v55 }
  0xb5   : > { %925 = vmatpush1.msra.mxu1 %v609_v42  ;;  %842 = vmatpush1.msra.mxu0 %v609_v42  ;;  %v528_v39 = vmin.f32 %v527_v15, 15.0 }
  0xb6   : > { %926 = vmatprep.subr.mxu1 %v608_v57  ;;  %843 = vmatprep.subr.mxu0 %v608_v57 }
  0xb7   : > { %927 = vmatpush1.msra.mxu1 %v607_v32  ;;  %844 = vmatpush1.msra.mxu0 %v607_v32 }
  0xb8   : > { %4833 = vmatprep.subr.msk.mxu0 %vm5644_vm0, %v8140_v36  ;;  %4871 = vmatprep.subr.msk.mxu1 %vm5644_vm0, %v8140_v36 }
 0x162   : > { %v4789_v28 = vpop.f32.mrf.mxu0  ;;  %v4827_v41 = vpop.f32.mrf.mxu1 }
 0x164   : > { %v4790_v63 = vpop.f32.mrf.mxu0  ;;  %v4828_v50 = vpop.f32.mrf.mxu1 }
 0x165   : > { %v4791_v57 = vadd.f32 %v4790_v63, %v4789_v28  ;;  %v4829_v32 = vadd.f32 %v4828_v50, %v4827_v41  ;;  %v545_v28 = vrot.slane %v528_v39, %v5806_v22  ;;  %v549_v41 = vrot.slane %v528_v39, %v6006_v5 }
 0x166   : > { %v4792_v43 = vpop.f32.mrf.mxu0  ;;  %v4830_v45 = vpop.f32.mrf.mxu1 }
 0x167   : > { %4289 = vmatmul.mubr.msk.f32.vlgmr.msra.gmra.mxu0 %vm7795_vm14, %v4791_v57  ;;  %4291 = vmatmul.mubr.msk.f32.vlgmr.msra.gmra.mxu1 %vm7795_vm14, %v4829_v32  ;;  %v555_v63 = vrot.slane %v545_v28, %v5806_v22  ;;  %v559_v50 = vrot.slane %v549_v41, %v5806_v22 }
 0x168   : > { %v4793_v51 = vpop.f32.mrf.mxu0  ;;  %v4831_v55 = vpop.f32.mrf.mxu1  ;;  %883 = vmatprep.mubr.f32.mxu0 %v7818_v8  ;;  %966 = vmatprep.mubr.f32.mxu1 %v7818_v8 }
 0x169   : > { %v4794_v42 = vadd.f32 %v4793_v51, %v4792_v43  ;;  %v4832_v12 = vadd.f32 %v4831_v55, %v4830_v45  ;;  %4834 = vmatpush3.msk.msra.mxu0 %vm5649_vm1, %v8140_v36  ;;  %4872 = vmatpush3.msk.msra.mxu1 %vm5649_vm1, %v8140_v36  ;;  %v560_v57 = vsub.f32 %v5851_v37, %v555_v63 }
 0x16a   : > { %4835 = vmatprep.subr.msk.mxu0 %vm5654_vm2, %v8140_v36  ;;  %4873 = vmatprep.subr.msk.mxu1 %vm5654_vm2, %v8140_v36  ;;  %v562_v32 = vsub.f32 %v5853_v38, %v555_v63  ;;  %v561_v27 = vsub.f32 %v5851_v37, %v559_v50  ;;  %v563_v49 = vsub.f32 %v5853_v38, %v559_v50 }
 0x16b   : > { %4290 = vmatmul.mubr.msk.f32.gmra.mxu0 %vm7795_vm14, %v4794_v42  ;;  %4292 = vmatmul.mubr.msk.f32.gmra.mxu1 %vm7795_vm14, %v4832_v12  ;;  %vm8141_vm14 = vnez %v8074_v13  ;;  %v564_v43 = vand.u32 2147483647, %v560_v57 }
 0x16c   : > { %4836 = vmatpush3.msk.msra.mxu0 %vm5665_vm3, %v8140_v36  ;;  %4874 = vmatpush3.msk.msra.mxu1 %vm5665_vm3, %v8140_v36  ;;  %v566_v48 = vand.u32 2147483647, %v562_v32  ;;  %v565_v45 = vand.u32 2147483647, %v561_v27  ;;  %v567_v51 = vand.u32 2147483647, %v563_v49 }
 0x16d   : > { %4837 = vmatprep.subr.msk.mxu0 %vm5670_vm4, %v8140_v36  ;;  %4875 = vmatprep.subr.msk.mxu1 %vm5670_vm4, %v8140_v36  ;;  %v568_v55 = vsub.f32 1.0, %v564_v43 }
 0x16e   : > { %4838 = vmatpush3.msk.msra.mxu0 %vm5675_vm5, %v8140_v36  ;;  %4876 = vmatpush3.msk.msra.mxu1 %vm5675_vm5, %v8140_v36  ;;  %v570_v42 = vsub.f32 1.0, %v566_v48  ;;  %v569_v12 = vsub.f32 1.0, %v565_v45  ;;  %v571_v11 = vsub.f32 1.0, %v567_v51 }
 0x16f   : > { %4839 = vmatprep.subr.msk.mxu0 %vm5687_vm6, %v8140_v36  ;;  %4877 = vmatprep.subr.msk.mxu1 %vm5687_vm6, %v8140_v36  ;;  %v572_v28 = vmax.f32 %v568_v55, 0.0 }
 0x170   : > { %4840 = vmatpush3.msk.msra.mxu0 %vm5692_vm7, %v8140_v36  ;;  %4878 = vmatpush3.msk.msra.mxu1 %vm5692_vm7, %v8140_v36  ;;  %v574_v41 = vmax.f32 %v570_v42, 0.0  ;;  %v573_v8 = vmax.f32 %v569_v12, 0.0 }
 0x171   : > { %4841 = vmatprep.subr.msk.mxu0 %vm5743_vm8, %v8140_v36  ;;  %4879 = vmatprep.subr.msk.mxu1 %vm5743_vm8, %v8140_v36  ;;  %vm8142_vm8 = vnez %v8076_v14 }
 0x172   : > { %4842 = vmatpush3.msk.msra.mxu0 %vm5754_vm9, %v8140_v36  ;;  %4880 = vmatpush3.msk.msra.mxu1 %vm5754_vm9, %v8140_v36  ;;  %vm8143_vm9 = vnez %v8078_v17 }
 0x173   : > { %4843 = vmatprep.subr.msk.mxu0 %vm5759_vm10, %v8140_v36  ;;  %4881 = vmatprep.subr.msk.mxu1 %vm5759_vm10, %v8140_v36  ;;  %vm8144_vm10 = vnez %v8080_v21 }
 0x174   : > { %4844 = vmatpush3.msk.msra.mxu0 %vm8141_vm14, %v8140_v36  ;;  %4882 = vmatpush3.msk.msra.mxu1 %vm8141_vm14, %v8140_v36  ;;  %vm8145_vm14 = vnez %v8082_v25 }
 0x175   : > { %4845 = vmatprep.subr.msk.mxu0 %vm8142_vm8, %v8140_v36  ;;  %4883 = vmatprep.subr.msk.mxu1 %vm8142_vm8, %v8140_v36  ;;  %vm8146_vm8 = vnez %v8084_v20 }
 0x176   : > { %4846 = vmatpush3.msk.msra.mxu0 %vm8143_vm9, %v8140_v36  ;;  %4884 = vmatpush3.msk.msra.mxu1 %vm8143_vm9, %v8140_v36  ;;  %vm8147_vm9 = vnez %v8086_v44 }
 0x177   : > { %4847 = vmatprep.subr.msk.mxu0 %vm8144_vm10, %v8140_v36  ;;  %4885 = vmatprep.subr.msk.mxu1 %vm8144_vm10, %v8140_v36  ;;  %vm8148_vm10 = vnez %v8089_v30 }
 0x178   : > { %4848 = vmatpush3.msk.msra.mxu0 %vm8145_vm14, %v8140_v36  ;;  %4886 = vmatpush3.msk.msra.mxu1 %vm8145_vm14, %v8140_v36  ;;  %vm8149_vm14 = vnez %v8092_v34 }
 0x179   : > { %4849 = vmatprep.subr.msk.mxu0 %vm8146_vm8, %v8140_v36  ;;  %4887 = vmatprep.subr.msk.mxu1 %vm8146_vm8, %v8140_v36  ;;  %vm8150_vm8 = vnez %v8095_v46 }
 0x17a   : > { %4850 = vmatpush3.msk.msra.mxu0 %vm8147_vm9, %v8140_v36  ;;  %4888 = vmatpush3.msk.msra.mxu1 %vm8147_vm9, %v8140_v36  ;;  %vm8151_vm9 = vnez %v8098_v47 }
 0x17b   : > { %4851 = vmatprep.subr.msk.mxu0 %vm8148_vm10, %v8140_v36  ;;  %4889 = vmatprep.subr.msk.mxu1 %vm8148_vm10, %v8140_v36  ;;  %vm8152_vm10 = vnez %v8101_v56  ;;  %v5479_v56 = vmov 1983009808  }
 0x17c   : > { %4852 = vmatpush3.msk.msra.mxu0 %vm8149_vm14, %v8140_v36  ;;  %4890 = vmatpush3.msk.msra.mxu1 %vm8149_vm14, %v8140_v36  ;;  %vm8153_vm14 = vnez %v8104_v29 }
 0x17d   : > { %4853 = vmatprep.subr.msk.mxu0 %vm8150_vm8, %v8140_v36  ;;  %4891 = vmatprep.subr.msk.mxu1 %vm8150_vm8, %v8140_v36  ;;  %vm8154_vm8 = vnez %v8107_v31 }
 0x17e   : > { %4854 = vmatpush3.msk.msra.mxu0 %vm8151_vm9, %v8140_v36  ;;  %4892 = vmatpush3.msk.msra.mxu1 %vm8151_vm9, %v8140_v36  ;;  %vm8155_vm9 = vnez %v8112_v54 }
 0x17f   : > { %4855 = vmatprep.subr.msk.mxu0 %vm8152_vm10, %v8140_v36  ;;  %4893 = vmatprep.subr.msk.mxu1 %vm8152_vm10, %v8140_v36  ;;  %vm8156_vm10 = vnez %v8115_v24 }
 0x180   : > { %4856 = vmatpush3.msk.msra.mxu0 %vm8153_vm14, %v8140_v36  ;;  %4894 = vmatpush3.msk.msra.mxu1 %vm8153_vm14, %v8140_v36  ;;  %vm8157_vm14 = vnez %v8118_v26 }
 0x181   : > { %4857 = vmatprep.subr.msk.mxu0 %vm8154_vm8, %v8140_v36  ;;  %4895 = vmatprep.subr.msk.mxu1 %vm8154_vm8, %v8140_v36  ;;  %vm8158_vm8 = vnez %v8124_v33 }
 0x182   : > { %4858 = vmatpush3.msk.msra.mxu0 %vm8155_vm9, %v8140_v36  ;;  %4896 = vmatpush3.msk.msra.mxu1 %vm8155_vm9, %v8140_v36  ;;  %vm8159_vm9 = vnez %v8121_v19 }
 0x183   : > { %4859 = vmatprep.subr.msk.mxu0 %vm8156_vm10, %v8140_v36  ;;  %4897 = vmatprep.subr.msk.mxu1 %vm8156_vm10, %v8140_v36  ;;  %vm8160_vm10 = vnez %v8130_v35  ;;  %v575_v35 = vmax.f32 %v571_v11, 0.0 }
 0x184   : > { %4860 = vmatpush3.msk.msra.mxu0 %vm8157_vm14, %v8140_v36  ;;  %4898 = vmatpush3.msk.msra.mxu1 %vm8157_vm14, %v8140_v36 }
 0x185   : > { %4861 = vmatprep.subr.msk.mxu0 %vm8158_vm8, %v8140_v36  ;;  %4899 = vmatprep.subr.msk.mxu1 %vm8158_vm8, %v8140_v36 }
 0x186   : > { %4862 = vmatpush3.msk.msra.mxu0 %vm8159_vm9, %v8140_v36  ;;  %4900 = vmatpush3.msk.msra.mxu1 %vm8159_vm9, %v8140_v36 }
 0x187   : > { %4863 = vmatprep.subr.msk.mxu0 %vm8160_vm10, %v8140_v36  ;;  %4901 = vmatprep.subr.msk.mxu1 %vm8160_vm10, %v8140_v36 }
 0x188   : > { %4864 = vmatpush3.msk.msra.mxu0 %vm6040_vm11, %v8140_v36  ;;  %4902 = vmatpush3.msk.msra.mxu1 %vm6040_vm11, %v8140_v36 }
 0x227   : > { %v879_v15 = vpop.f32.mrf.mxu0  ;;  %v962_v39 = vpop.f32.mrf.mxu1 }
 0x228   : > { %v973_v63 = vmul.f32 %v879_v15, %v572_v28  ;;  %v991_v50 = vmul.f32 %v962_v39, %v572_v28  ;;  %v1013_v39 = vunpack.c.l.s4 %v5479_v56 }
 0x229   : > { %v881_v62 = vpop.f32.mrf.mxu0  ;;  %v964_v40 = vpop.f32.mrf.mxu1 }
 0x22a   : > { %v974_v57 = vmul.f32 %v881_v62, %v573_v8  ;;  %v992_v49 = vmul.f32 %v964_v40, %v573_v8 }
 0x22b   : > { %v885_v19 = vpop.f32.mrf.mxu0  ;;  %v968_v33 = vpop.f32.mrf.mxu1 }
 0x22c   : > { %v975_v32 = vmul.f32 %v885_v19, %v574_v41  ;;  %v993_v27 = vmul.f32 %v968_v33, %v574_v41 }
 0x22d   : > { %v887_v43 = vpop.f32.mrf.mxu0  ;;  %v970_v48 = vpop.f32.mrf.mxu1 }
 0x22e   : > { %v977_v45 = vadd.f32 %v975_v32, %v973_v63  ;;  %v995_v51 = vadd.f32 %v993_v27, %v991_v50  ;;  %v976_v26 = vmul.f32 %v887_v43, %v575_v35  ;;  %v994_v24 = vmul.f32 %v970_v48, %v575_v35 }
 0x22f   : > { %v1014_v50 = vunpack.c.0.s8 %v1013_v39 }
 0x230   : > { %v978_v55 = vrot.slane %v977_v45, 4  ;;  %v996_v42 = vrot.slane %v995_v51, 4  ;;  %v984_v12 = vadd.f32 %v976_v26, %v974_v57  ;;  %v1002_v54 = vadd.f32 %v994_v24, %v992_v49 }
 0x231   : > { %v6349_v56 = vsub.s32 %v1014_v50, %v5631_v1 }
 0x232   : > { %v979_v31 = vadd.f32 %v978_v55, %v977_v45  ;;  %v997_v15 = vadd.f32 %v996_v42, %v995_v51  ;;  %v985_v11 = vrot.slane %v984_v12, 4  ;;  %v1003_v29 = vrot.slane %v1002_v54, 4 }
 0x234   : > { %v980_v62 = vrot.slane %v979_v31, 2  ;;  %v998_v19 = vrot.slane %v997_v15, 2  ;;  %v986_v33 = vadd.f32 %v985_v11, %v984_v12  ;;  %v1004_v40 = vadd.f32 %v1003_v29, %v1002_v54 }
 0x236   : > { %v981_v8 = vadd.f32 %v980_v62, %v979_v31  ;;  %v999_v28 = vadd.f32 %v998_v19, %v997_v15  ;;  %v987_v41 = vrot.slane %v986_v33, 2  ;;  %v1005_v63 = vrot.slane %v1004_v40, 2 }
 0x238   : > { %v982_v35 = vrot.slane %v981_v8, 1  ;;  %v1000_v32 = vrot.slane %v999_v28, 1  ;;  %v988_v27 = vadd.f32 %v987_v41, %v986_v33  ;;  %v1006_v26 = vadd.f32 %v1005_v63, %v1004_v40  ;;  %v8163_v63 = vld [vmem:[#allocation27_spill] sm:$0xff] }
 0x239   : > { %vm8164_vm11 = vnez %v8163_v63 }
 0x23a   : > { %v983_v24 = vadd.f32 %v982_v35, %v981_v8  ;;  %v989_v57 = vrot.slane %v988_v27, 1  ;;  %v1007_v49 = vrot.slane %v1006_v26, 1  ;;  %v1001_v43 = vadd.f32 %v1000_v32, %v999_v28  ;;  %v8162_v28 = vld [vmem:[#allocation26_spill] sm:$0xff] }
 0x23b   : > { %v8165_v35 = vmov 0.0  }
 0x23c   : > { %v990_v48 = vadd.f32 %v989_v57, %v988_v27  ;;  %v1008_v45 = vadd.f32 %v1007_v49, %v1006_v26 }
 0x23e   : > { %v1011_v51 = vcombine.low %v983_v24, %v990_v48  ;;  %v1023_v29 = vcombine.low %v1001_v43, %v1008_v45 }
 0x240   : > { %v1018_v31 = vrot.slane %v1011_v51, %v6349_v56  ;;  %v1030_v54 = vrot.slane %v1023_v29, %v6349_v56 }
 0x242   : > { %v6354_v55 = vadd.f32 %v1018_v31, %v5975_v52  ;;  %v1031_v42 = vrot.slane %v1030_v54, 7 }
 0x244   : > { %v6357_v12 = vadd.f32 %v1031_v42, %v5975_v52  ;;  %v1120_v15 = vrot.slane %v6354_v55, %v6006_v5  ;;  %v1116_v1 = vrot.slane %v6354_v55, %v5806_v22 }
 0x246   : > { %v1130_v11 = vrot.slane %v1120_v15, %v5806_v22  ;;  %v1126_v39 = vrot.slane %v1116_v1, %v5806_v22  ;;  %v1218_v62 = vrot.slane %v6357_v12, %v6015_v18  ;;  %v1214_v19 = vrot.slane %v6357_v12, %v5809_v23 }
 0x247   : > { %v1038_v33 = vmul.f32 7.5, %v6357_v12 }
 0x248   : > { %4325 = vmatprep.mubr.msk.f32.mxu0 %vm5979_vm13, %v1130_v11  ;;  %v1228_v52 = vrot.slane %v1218_v62, %v5809_v23  ;;  %v1224_v40 = vrot.slane %v1214_v19, %v5809_v23 }
 0x249   : > { %4326 = vmatmul.mubr.msk.f32.vlgmr.msra.gmra.mxu0 %vm6077_vm12, %v1126_v39  ;;  %v1039_v8 = vadd.f32 %v1038_v33, %v6088_v4 }
 0x24a   : > { %4327 = vmatprep.mubr.msk.f32.mxu0 %vm6092_vm15, %v1130_v11  ;;  %4361 = vmatprep.mubr.msk.f32.mxu1 %vm5979_vm13, %v1228_v52 }
 0x24b   : > { %4362 = vmatmul.mubr.msk.f32.vlgmr.msra.gmra.mxu1 %vm6077_vm12, %v1224_v40  ;;  %v1040_v41 = vmax.f32 %v1039_v8, 0.0 }
 0x24c   : > { %4363 = vmatprep.mubr.msk.f32.mxu1 %vm6092_vm15, %v1228_v52 }
 0x24d   : > { %4328 = vmatmul.mubr.msk.f32.gmra.mxu0 %vm8164_vm11, %v1126_v39  ;;  %v1041_v50 = vmin.f32 %v1040_v41, 15.0 }
 0x24e   : > { %1378 = vmatprep.mubr.f32.mxu0 %v8165_v35 }
 0x24f   : > { %4364 = vmatmul.mubr.msk.f32.gmra.mxu1 %vm8164_vm11, %v1224_v40  ;;  %v1085_v32 = vrot.slane %v1041_v50, %v6015_v18  ;;  %v1081_v27 = vrot.slane %v1041_v50, %v5809_v23  ;;  %vm8166_vm11 = vcmask 130048  }
 0x250   : > { %1461 = vmatprep.mubr.f32.mxu1 %v8165_v35  ;;  %vm8167_vm15 = vmmov %vm8166_vm11 }
 0x251   : > { %v1095_v26 = vrot.slane %v1085_v32, %v5809_v23  ;;  %v1091_v24 = vrot.slane %v1081_v27, %v5809_v23 }
 0x253   : > { %v1099_v57 = vsub.f32 %v5853_v38, %v1095_v26  ;;  %v1098_v49 = vsub.f32 %v5853_v38, %v1091_v24  ;;  %v1097_v43 = vsub.f32 %v5851_v37, %v1095_v26  ;;  %v1096_v48 = vsub.f32 %v5851_v37, %v1091_v24 }
 0x255   : > { %v1103_v45 = vand.u32 2147483647, %v1099_v57  ;;  %v1102_v51 = vand.u32 2147483647, %v1098_v49  ;;  %v1101_v29 = vand.u32 2147483647, %v1097_v43 }
 0x256   : > { %v1100_v31 = vand.u32 2147483647, %v1096_v48  ;;  %v8183_v43 = vld [vmem:[#allocation16_spill] sm:$0xff]  ;;  %v8185_v48 = vld [vmem:[#allocation17_spill] sm:$0xff] }
 0x257   : > { %v1107_v54 = vsub.f32 1.0, %v1103_v45  ;;  %v1106_v42 = vsub.f32 1.0, %v1102_v51  ;;  %v1105_v15 = vsub.f32 1.0, %v1101_v29  ;;  %v8187_v45 = vld [vmem:[#allocation18_spill] sm:$0xff]  ;;  %v8189_v51 = vld [vmem:[#allocation19_spill] sm:$0xff]  ;;  %v8191_v29 = vld [vmem:[#allocation20_spill] sm:$0xff] }
 0x258   : > { %v1104_v1 = vsub.f32 1.0, %v1100_v31 }
 0x259   : > { %v1111_v11 = vmax.f32 %v1107_v54, 0.0  ;;  %v1110_v39 = vmax.f32 %v1106_v42, 0.0  ;;  %v1109_v62 = vmax.f32 %v1105_v15, 0.0 }
 0x25a   : > { %v1108_v19 = vmax.f32 %v1104_v1, 0.0  ;;  %v8197_v1 = vld [vmem:[#allocation24_spill] sm:$0xff] }
 0x25b   : > { %1342 = vmatprep.subr.mxu0 %v1111_v11  ;;  %1425 = vmatprep.subr.mxu1 %v1111_v11  ;;  %v1034_v11 = vmul.f32 7.5, %v6354_v55 }
 0x25c   : > { %1343 = vmatpush1.msra.mxu0 %v1110_v39  ;;  %1426 = vmatpush1.msra.mxu1 %v1110_v39  ;;  %v8199_v39 = vld [vmem:[#allocation28_spill] sm:$0xff] }
 0x25d   : > { %1344 = vmatprep.subr.mxu0 %v1109_v62  ;;  %1427 = vmatprep.subr.mxu1 %v1109_v62  ;;  %v1035_v62 = vadd.f32 %v1034_v11, %v8199_v39 }
 0x25e   : > { %1345 = vmatpush1.msra.mxu0 %v1108_v19  ;;  %1428 = vmatpush1.msra.mxu1 %v1108_v19 }
 0x25f   : > { %4909 = vmatprep.subr.msk.mxu0 %vm5644_vm0, %v8140_v36  ;;  %4947 = vmatprep.subr.msk.mxu1 %vm5644_vm0, %v8140_v36  ;;  %v1036_v19 = vmax.f32 %v1035_v62, 0.0 }
 0x309   : > { %v4865_v33 = vpop.f32.mrf.mxu0 }
 0x30b   : > { %v4866_v52 = vpop.f32.mrf.mxu0  ;;  %v4903_v40 = vpop.f32.mrf.mxu1 }
 0x30c   : > { %v4867_v8 = vadd.f32 %v4866_v52, %v4865_v33  ;;  %v1037_v33 = vmin.f32 %v1036_v19, 15.0 }
 0x30d   : > { %v4868_v41 = vpop.f32.mrf.mxu0  ;;  %v4904_v50 = vpop.f32.mrf.mxu1 }
 0x30e   : > { %v4905_v32 = vadd.f32 %v4904_v50, %v4903_v40  ;;  %4365 = vmatmul.mubr.msk.f32.vlgmr.msra.gmra.mxu0 %vm8166_vm11, %v4867_v8  ;;  %v1046_v52 = vrot.slane %v1037_v33, %v5806_v22  ;;  %v1050_v40 = vrot.slane %v1037_v33, %v6006_v5 }
 0x30f   : > { %v4869_v27 = vpop.f32.mrf.mxu0  ;;  %v4906_v26 = vpop.f32.mrf.mxu1  ;;  %1384 = vmatprep.mubr.f32.mxu0 %v8165_v35  ;;  %4910 = vmatpush3.msk.msra.mxu0 %vm5649_vm1, %v8140_v36 }
 0x310   : > { %v4870_v24 = vadd.f32 %v4869_v27, %v4868_v41  ;;  %4367 = vmatmul.mubr.msk.f32.vlgmr.msra.gmra.mxu1 %vm8167_vm15, %v4905_v32  ;;  %4911 = vmatprep.subr.msk.mxu0 %vm5654_vm2, %v8140_v36  ;;  %vm8168_vm15 = vmmov %vm8166_vm11  ;;  %v1056_v8 = vrot.slane %v1046_v52, %v5806_v22  ;;  %v1060_v41 = vrot.slane %v1050_v40, %v5806_v22 }
 0x311   : > { %v4907_v57 = vpop.f32.mrf.mxu1  ;;  %1467 = vmatprep.mubr.f32.mxu1 %v8165_v35  ;;  %4912 = vmatpush3.msk.msra.mxu0 %vm5665_vm3, %v8140_v36 }
 0x312   : > { %v4908_v49 = vadd.f32 %v4907_v57, %v4906_v26  ;;  %4366 = vmatmul.mubr.msk.f32.gmra.mxu0 %vm8166_vm11, %v4870_v24  ;;  %4913 = vmatprep.subr.msk.mxu0 %vm5670_vm4, %v8140_v36  ;;  %vm8169_vm11 = vnez %v8068_v58  ;;  %v1061_v50 = vsub.f32 %v5851_v37, %v1056_v8  ;;  %v1063_v32 = vsub.f32 %v5853_v38, %v1056_v8 }
 0x313   : > { %4914 = vmatpush3.msk.msra.mxu0 %vm5675_vm5, %v8140_v36  ;;  %4948 = vmatpush3.msk.msra.mxu1 %vm5649_vm1, %v8140_v36  ;;  %v1062_v27 = vsub.f32 %v5851_v37, %v1060_v41  ;;  %v1064_v26 = vsub.f32 %v5853_v38, %v1060_v41 }
 0x314   : > { %4368 = vmatmul.mubr.msk.f32.gmra.mxu1 %vm8168_vm15, %v4908_v49  ;;  %4915 = vmatprep.subr.msk.mxu0 %vm5687_vm6, %v8140_v36  ;;  %vm8170_vm15 = vnez %v8070_v9  ;;  %v1065_v24 = vand.u32 2147483647, %v1061_v50  ;;  %v1067_v57 = vand.u32 2147483647, %v1063_v32 }
 0x315   : > { %4949 = vmatprep.subr.msk.mxu1 %vm5654_vm2, %v8140_v36  ;;  %4916 = vmatpush3.msk.msra.mxu0 %vm5692_vm7, %v8140_v36  ;;  %vm8171_vm2 = vnez %v8072_v10  ;;  %v1066_v49 = vand.u32 2147483647, %v1062_v27  ;;  %v1068_v11 = vand.u32 2147483647, %v1064_v26 }
 0x316   : > { %4950 = vmatpush3.msk.msra.mxu1 %vm5665_vm3, %v8140_v36  ;;  %4917 = vmatprep.subr.msk.mxu0 %vm8169_vm11, %v8140_v36  ;;  %vm8172_vm3 = vnez %v8074_v13  ;;  %v1069_v62 = vsub.f32 1.0, %v1065_v24  ;;  %v1071_v19 = vsub.f32 1.0, %v1067_v57 }
 0x317   : > { %4951 = vmatprep.subr.msk.mxu1 %vm5670_vm4, %v8140_v36  ;;  %4918 = vmatpush3.msk.msra.mxu0 %vm8170_vm15, %v8140_v36  ;;  %vm8173_vm4 = vnez %v8076_v14  ;;  %v1070_v33 = vsub.f32 1.0, %v1066_v49 }
 0x318   : > { %4952 = vmatpush3.msk.msra.mxu1 %vm5675_vm5, %v8140_v36  ;;  %4919 = vmatprep.subr.msk.mxu0 %vm8171_vm2, %v8140_v36  ;;  %vm8174_vm5 = vnez %v8078_v17  ;;  %v1073_v40 = vmax.f32 %v1069_v62, 0.0  ;;  %v1075_v42 = vmax.f32 %v1071_v19, 0.0 }
 0x319   : > { %4953 = vmatprep.subr.msk.mxu1 %vm5687_vm6, %v8140_v36  ;;  %4920 = vmatpush3.msk.msra.mxu0 %vm8172_vm3, %v8140_v36  ;;  %vm8175_vm6 = vnez %v8080_v21  ;;  %v1074_v54 = vmax.f32 %v1070_v33, 0.0 }
 0x31a   : > { %4954 = vmatpush3.msk.msra.mxu1 %vm5692_vm7, %v8140_v36  ;;  %4921 = vmatprep.subr.msk.mxu0 %vm8173_vm4, %v8140_v36  ;;  %vm8176_vm7 = vnez %v8082_v25 }
 0x31b   : > { %4955 = vmatprep.subr.msk.mxu1 %vm8169_vm11, %v8140_v36  ;;  %4922 = vmatpush3.msk.msra.mxu0 %vm8174_vm5, %v8140_v36  ;;  %vm8177_vm11 = vnez %v8084_v20 }
 0x31c   : > { %4956 = vmatpush3.msk.msra.mxu1 %vm8170_vm15, %v8140_v36  ;;  %4923 = vmatprep.subr.msk.mxu0 %vm8175_vm6, %v8140_v36  ;;  %vm8178_vm15 = vnez %v8086_v44 }
 0x31d   : > { %4957 = vmatprep.subr.msk.mxu1 %vm8171_vm2, %v8140_v36  ;;  %4924 = vmatpush3.msk.msra.mxu0 %vm8176_vm7, %v8140_v36  ;;  %vm8179_vm2 = vnez %v8089_v30 }
 0x31e   : > { %4958 = vmatpush3.msk.msra.mxu1 %vm8172_vm3, %v8140_v36  ;;  %4925 = vmatprep.subr.msk.mxu0 %vm8177_vm11, %v8140_v36  ;;  %vm8180_vm3 = vnez %v8092_v34 }
 0x31f   : > { %4959 = vmatprep.subr.msk.mxu1 %vm8173_vm4, %v8140_v36  ;;  %4926 = vmatpush3.msk.msra.mxu0 %vm8178_vm15, %v8140_v36  ;;  %vm8181_vm4 = vnez %v8095_v46 }
 0x320   : > { %4960 = vmatpush3.msk.msra.mxu1 %vm8174_vm5, %v8140_v36  ;;  %4927 = vmatprep.subr.msk.mxu0 %vm8179_vm2, %v8140_v36  ;;  %vm8182_vm5 = vnez %v8098_v47 }
 0x321   : > { %4961 = vmatprep.subr.msk.mxu1 %vm8175_vm6, %v8140_v36  ;;  %4928 = vmatpush3.msk.msra.mxu0 %vm8180_vm3, %v8140_v36  ;;  %vm8184_vm6 = vnez %v8183_v43 }
 0x322   : > { %4962 = vmatpush3.msk.msra.mxu1 %vm8176_vm7, %v8140_v36  ;;  %4929 = vmatprep.subr.msk.mxu0 %vm8181_vm4, %v8140_v36  ;;  %vm8186_vm7 = vnez %v8185_v48 }
 0x323   : > { %4963 = vmatprep.subr.msk.mxu1 %vm8177_vm11, %v8140_v36  ;;  %4930 = vmatpush3.msk.msra.mxu0 %vm8182_vm5, %v8140_v36  ;;  %vm8188_vm11 = vnez %v8187_v45 }
 0x324   : > { %4964 = vmatpush3.msk.msra.mxu1 %vm8178_vm15, %v8140_v36  ;;  %4931 = vmatprep.subr.msk.mxu0 %vm8184_vm6, %v8140_v36  ;;  %vm8190_vm15 = vnez %v8189_v51 }
 0x325   : > { %4965 = vmatprep.subr.msk.mxu1 %vm8179_vm2, %v8140_v36  ;;  %4932 = vmatpush3.msk.msra.mxu0 %vm8186_vm7, %v8140_v36  ;;  %vm8192_vm2 = vnez %v8191_v29 }
 0x326   : > { %4966 = vmatpush3.msk.msra.mxu1 %vm8180_vm3, %v8140_v36  ;;  %4933 = vmatprep.subr.msk.mxu0 %vm8188_vm11, %v8140_v36 }
 0x327   : > { %4967 = vmatprep.subr.msk.mxu1 %vm8181_vm4, %v8140_v36  ;;  %4934 = vmatpush3.msk.msra.mxu0 %vm8190_vm15, %v8140_v36 }
 0x328   : > { %4968 = vmatpush3.msk.msra.mxu1 %vm8182_vm5, %v8140_v36  ;;  %4935 = vmatprep.subr.msk.mxu0 %vm8192_vm2, %v8140_v36 }
 0x329   : > { %4969 = vmatprep.subr.msk.mxu1 %vm8184_vm6, %v8140_v36  ;;  %4936 = vmatpush3.msk.msra.mxu0 %vm8157_vm14, %v8140_v36 }
 0x32a   : > { %4970 = vmatpush3.msk.msra.mxu1 %vm8186_vm7, %v8140_v36  ;;  %4937 = vmatprep.subr.msk.mxu0 %vm8158_vm8, %v8140_v36  ;;  %vm8198_vm7 = vnez %v8197_v1  ;;  %v1072_v1 = vsub.f32 1.0, %v1068_v11 }
 0x32b   : > { %4971 = vmatprep.subr.msk.mxu1 %vm8188_vm11, %v8140_v36  ;;  %4938 = vmatpush3.msk.msra.mxu0 %vm8159_vm9, %v8140_v36 }
 0x32c   : > { %4972 = vmatpush3.msk.msra.mxu1 %vm8190_vm15, %v8140_v36  ;;  %4939 = vmatprep.subr.msk.mxu0 %vm8160_vm10, %v8140_v36  ;;  %v1076_v45 = vmax.f32 %v1072_v1, 0.0 }
 0x32d   : > { %4973 = vmatprep.subr.msk.mxu1 %vm8192_vm2, %v8140_v36  ;;  %4940 = vmatpush3.msk.msra.mxu0 %vm8198_vm7, %v8140_v36 }
 0x32e   : > { %4974 = vmatpush3.msk.msra.mxu1 %vm8157_vm14, %v8140_v36  ;;  %vm8210_vm14 = vnez %v8068_v58 }
 0x32f   : > { %4975 = vmatprep.subr.msk.mxu1 %vm8158_vm8, %v8140_v36  ;;  %vm8209_vm8 = vnez %v8066_v7 }
 0x330   : > { %4976 = vmatpush3.msk.msra.mxu1 %vm8159_vm9, %v8140_v36  ;;  %vm8207_vm9 = vnez %v8062_v3 }
 0x331   : > { %4977 = vmatprep.subr.msk.mxu1 %vm8160_vm10, %v8140_v36  ;;  %vm8201_vm10 = vnez %v8163_v63 }
 0x332   : > { %4978 = vmatpush3.msk.msra.mxu1 %vm8198_vm7, %v8140_v36  ;;  %vm8200_vm7 = vnez %v8162_v28 }
 0x3ce   : > { %v1380_v39 = vpop.f32.mrf.mxu0 }
 0x3cf   : > { %v1474_v29 = vmul.f32 %v1380_v39, %v1073_v40 }
 0x3d0   : > { %v1382_v52 = vpop.f32.mrf.mxu0  ;;  %v1463_v15 = vpop.f32.mrf.mxu1 }
 0x3d1   : > { %v1475_v41 = vmul.f32 %v1382_v52, %v1074_v54  ;;  %v1492_v27 = vmul.f32 %v1463_v15, %v1073_v40 }
 0x3d2   : > { %v1386_v31 = vpop.f32.mrf.mxu0  ;;  %v1465_v8 = vpop.f32.mrf.mxu1 }
 0x3d3   : > { %v1476_v51 = vmul.f32 %v1386_v31, %v1075_v42  ;;  %v1493_v48 = vmul.f32 %v1465_v8, %v1074_v54 }
 0x3d4   : > { %v1388_v50 = vpop.f32.mrf.mxu0  ;;  %v1469_v32 = vpop.f32.mrf.mxu1 }
 0x3d5   : > { %v1478_v26 = vadd.f32 %v1476_v51, %v1474_v29  ;;  %v1477_v24 = vmul.f32 %v1388_v50, %v1076_v45  ;;  %v1494_v57 = vmul.f32 %v1469_v32, %v1075_v42 }
 0x3d6   : > { %v1471_v49 = vpop.f32.mrf.mxu1 }
 0x3d7   : > { %v1479_v11 = vrot.slane %v1478_v26, 4  ;;  %v1485_v43 = vadd.f32 %v1477_v24, %v1475_v41  ;;  %v1496_v47 = vadd.f32 %v1494_v57, %v1492_v27  ;;  %v1495_v62 = vmul.f32 %v1471_v49, %v1076_v45 }
 0x3d9   : > { %v1480_v19 = vadd.f32 %v1479_v11, %v1478_v26  ;;  %v1486_v33 = vrot.slane %v1485_v43, 4  ;;  %v1497_v46 = vrot.slane %v1496_v47, 4  ;;  %v1503_v34 = vadd.f32 %v1495_v62, %v1493_v48 }
 0x3db   : > { %v1481_v39 = vrot.slane %v1480_v19, 2  ;;  %v1487_v31 = vadd.f32 %v1486_v33, %v1485_v43  ;;  %v1498_v1 = vadd.f32 %v1497_v46, %v1496_v47  ;;  %v1504_v52 = vrot.slane %v1503_v34, 4 }
 0x3dd   : > { %v1482_v30 = vadd.f32 %v1481_v39, %v1480_v19  ;;  %v1488_v44 = vrot.slane %v1487_v31, 2  ;;  %v1499_v15 = vrot.slane %v1498_v1, 2  ;;  %v1505_v51 = vadd.f32 %v1504_v52, %v1503_v34 }
 0x3df   : > { %v1483_v29 = vrot.slane %v1482_v30, 1  ;;  %v1489_v42 = vadd.f32 %v1488_v44, %v1487_v31  ;;  %v1500_v54 = vadd.f32 %v1499_v15, %v1498_v1  ;;  %v1506_v40 = vrot.slane %v1505_v51, 2 }
 0x3e1   : > { %v1490_v8 = vrot.slane %v1489_v42, 1  ;;  %v1501_v41 = vrot.slane %v1500_v54, 1  ;;  %v1507_v50 = vadd.f32 %v1506_v40, %v1505_v51  ;;  %v1484_v45 = vadd.f32 %v1483_v29, %v1482_v30 }
 0x3e3   : > { %v1491_v32 = vadd.f32 %v1490_v8, %v1489_v42  ;;  %v1508_v27 = vrot.slane %v1507_v50, 1  ;;  %v1502_v48 = vadd.f32 %v1501_v41, %v1500_v54 }
 0x3e5   : > { %v1512_v26 = vcombine.low %v1484_v45, %v1491_v32  ;;  %v1509_v24 = vadd.f32 %v1508_v27, %v1507_v50 }
 0x3e7   : > { %v1519_v46 = vrot.slane %v1512_v26, %v6349_v56  ;;  %v1524_v47 = vcombine.low %v1502_v48, %v1509_v24 }
 0x3e9   : > { %v6609_v43 = vadd.f32 %v1519_v46, %v6354_v55  ;;  %v1531_v34 = vrot.slane %v1524_v47, %v6349_v56 }
 0x3eb   : > { %v1532_v44 = vrot.slane %v1531_v34, 7  ;;  %v1621_v57 = vrot.slane %v6609_v43, %v6006_v5  ;;  %v1617_v30 = vrot.slane %v6609_v43, %v5806_v22 }
 0x3ed   : > { %v6617_v49 = vadd.f32 %v1532_v44, %v6357_v12  ;;  %v1631_v11 = vrot.slane %v1621_v57, %v5806_v22  ;;  %v1627_v62 = vrot.slane %v1617_v30, %v5806_v22 }
 0x3ef   : > { %4401 = vmatprep.mubr.msk.f32.mxu0 %vm5979_vm13, %v1631_v11  ;;  %v1719_v55 = vrot.slane %v6617_v49, %v6015_v18  ;;  %v1715_v19 = vrot.slane %v6617_v49, %v5809_v23  ;;  %v1539_v33 = vmul.f32 7.5, %v6617_v49 }
 0x3f0   : > { %4402 = vmatmul.mubr.msk.f32.vlgmr.msra.gmra.mxu0 %vm6077_vm12, %v1627_v62 }
 0x3f1   : > { %4403 = vmatprep.mubr.msk.f32.mxu0 %vm8200_vm7, %v1631_v11  ;;  %v1729_v12 = vrot.slane %v1719_v55, %v5809_v23  ;;  %v1725_v39 = vrot.slane %v1715_v19, %v5809_v23  ;;  %v1540_v31 = vadd.f32 %v1539_v33, %v6088_v4 }
 0x3f3   : > { %4437 = vmatprep.mubr.msk.f32.mxu1 %vm5979_vm13, %v1729_v12  ;;  %v1541_v1 = vmax.f32 %v1540_v31, 0.0  ;;  %vm8206_vm13 = vnez %v8060_v2 }
 0x3f4   : > { %4404 = vmatmul.mubr.msk.f32.gmra.mxu0 %vm8201_vm10, %v1627_v62  ;;  %4438 = vmatmul.mubr.msk.f32.vlgmr.msra.gmra.mxu1 %vm6077_vm12, %v1725_v39 }
 0x3f5   : > { %4439 = vmatprep.mubr.msk.f32.mxu1 %vm8200_vm7, %v1729_v12  ;;  %v1542_v52 = vmin.f32 %v1541_v1, 15.0  ;;  %1879 = vmatprep.mubr.f32.mxu0 %v8165_v35  ;;  %vm8204_vm7 = vnez %v8058_v0 }
 0x3f7   : > { %v1586_v15 = vrot.slane %v1542_v52, %v6015_v18  ;;  %v1582_v51 = vrot.slane %v1542_v52, %v5809_v23 }
 0x3f8   : > { %4440 = vmatmul.mubr.msk.f32.gmra.mxu1 %vm8201_vm10, %v1725_v39  ;;  %vm8202_vm10 = vcmask 130048  }
 0x3f9   : > { %v1596_v29 = vrot.slane %v1586_v15, %v5809_v23  ;;  %v1592_v42 = vrot.slane %v1582_v51, %v5809_v23  ;;  %1962 = vmatprep.mubr.f32.mxu1 %v8165_v35  ;;  %vm8205_vm12 = vmmov %vm8202_vm10  ;;  %v8219_v51 = vld [vmem:[#allocation11_spill] sm:$0xff] }
 0x3fb   : > { %v1600_v54 = vsub.f32 %v5853_v38, %v1596_v29  ;;  %v1599_v40 = vsub.f32 %v5853_v38, %v1592_v42  ;;  %v1598_v8 = vsub.f32 %v5851_v37, %v1596_v29  ;;  %v1597_v41 = vsub.f32 %v5851_v37, %v1592_v42  ;;  %v8221_v29 = vld [vmem:[#allocation12_spill] sm:$0xff] }
 0x3fd   : > { %v1604_v50 = vand.u32 2147483647, %v1600_v54  ;;  %v1603_v45 = vand.u32 2147483647, %v1599_v40  ;;  %v1602_v32 = vand.u32 2147483647, %v1598_v8 }
 0x3fe   : > { %v1601_v27 = vand.u32 2147483647, %v1597_v41  ;;  %v8227_v41 = vld [vmem:[#allocation17_spill] sm:$0xff] }
 0x3ff   : > { %v1608_v26 = vsub.f32 1.0, %v1604_v50  ;;  %v1607_v48 = vsub.f32 1.0, %v1603_v45  ;;  %v1606_v24 = vsub.f32 1.0, %v1602_v32 }
 0x400   : > { %v1605_v46 = vsub.f32 1.0, %v1601_v27  ;;  %v8232_v27 = vld [vmem:[#allocation21_spill] sm:$0xff] }
 0x401   : > { %v1612_v47 = vmax.f32 %v1608_v26, 0.0  ;;  %v1611_v34 = vmax.f32 %v1607_v48, 0.0  ;;  %v1610_v44 = vmax.f32 %v1606_v24, 0.0  ;;  %v8234_v26 = vld [vmem:[#allocation23_spill] sm:$0xff]  ;;  %v8236_v48 = vld [vmem:[#allocation22_spill] sm:$0xff]  ;;  %v8238_v24 = vld [vmem:[#allocation25_spill] sm:$0xff] }
 0x402   : > { %v1609_v57 = vmax.f32 %v1605_v46, 0.0  ;;  %v8240_v46 = vld [vmem:[#allocation24_spill] sm:$0xff] }
 0x403   : > { %1843 = vmatprep.subr.mxu0 %v1612_v47  ;;  %1926 = vmatprep.subr.mxu1 %v1612_v47  ;;  %v1535_v47 = vmul.f32 7.5, %v6609_v43 }
 0x404   : > { %1844 = vmatpush1.msra.mxu0 %v1611_v34  ;;  %1927 = vmatpush1.msra.mxu1 %v1611_v34  ;;  %v8242_v34 = vld [vmem:[#allocation28_spill] sm:$0xff] }
 0x405   : > { %1845 = vmatprep.subr.mxu0 %v1610_v44  ;;  %1928 = vmatprep.subr.mxu1 %v1610_v44  ;;  %v1536_v44 = vadd.f32 %v1535_v47, %v8242_v34 }
 0x406   : > { %1846 = vmatpush1.msra.mxu0 %v1609_v57  ;;  %1929 = vmatpush1.msra.mxu1 %v1609_v57 }
 0x407   : > { %4985 = vmatprep.subr.msk.mxu0 %vm5644_vm0, %v8140_v36  ;;  %5023 = vmatprep.subr.msk.mxu1 %vm5644_vm0, %v8140_v36  ;;  %vm8203_vm0 = vnez %v8056_v61  ;;  %v1537_v57 = vmax.f32 %v1536_v44, 0.0 }
 0x4b0   : > { %v4941_v30 = vpop.f32.mrf.mxu0 }
 0x4b2   : > { %v4942_v11 = vpop.f32.mrf.mxu0 }
 0x4b3   : > { %v4943_v62 = vadd.f32 %v4942_v11, %v4941_v30  ;;  %v1538_v30 = vmin.f32 %v1537_v57, 15.0 }
 0x4b4   : > { %v4944_v55 = vpop.f32.mrf.mxu0  ;;  %v4979_v19 = vpop.f32.mrf.mxu1 }
 0x4b5   : > { %4441 = vmatmul.mubr.msk.f32.vlgmr.msra.gmra.mxu0 %vm8202_vm10, %v4943_v62  ;;  %v1547_v11 = vrot.slane %v1538_v30, %v5806_v22  ;;  %v1551_v62 = vrot.slane %v1538_v30, %v6006_v5 }
 0x4b6   : > { %v4945_v33 = vpop.f32.mrf.mxu0  ;;  %v4980_v12 = vpop.f32.mrf.mxu1  ;;  %1885 = vmatprep.mubr.f32.mxu0 %v8165_v35  ;;  %4986 = vmatpush3.msk.msra.mxu0 %vm5649_vm1, %v8140_v36 }
 0x4b7   : > { %v4946_v39 = vadd.f32 %v4945_v33, %v4944_v55  ;;  %v4981_v31 = vadd.f32 %v4980_v12, %v4979_v19  ;;  %4987 = vmatprep.subr.msk.mxu0 %vm8203_vm0, %v8140_v36  ;;  %v1557_v55 = vrot.slane %v1547_v11, %v5806_v22  ;;  %v1561_v19 = vrot.slane %v1551_v62, %v5806_v22 }
 0x4b8   : > { %v4982_v1 = vpop.f32.mrf.mxu1  ;;  %4988 = vmatpush3.msk.msra.mxu0 %vm8204_vm7, %v8140_v36 }
 0x4b9   : > { %4442 = vmatmul.mubr.msk.f32.gmra.mxu0 %vm8202_vm10, %v4946_v39  ;;  %4443 = vmatmul.mubr.msk.f32.vlgmr.msra.gmra.mxu1 %vm8205_vm12, %v4981_v31  ;;  %vm8208_vm10 = vnez %v8064_v6  ;;  %v1562_v33 = vsub.f32 %v5851_v37, %v1557_v55  ;;  %v1564_v12 = vsub.f32 %v5853_v38, %v1557_v55  ;;  %v1563_v39 = vsub.f32 %v5851_v37, %v1561_v19 }
 0x4ba   : > { %v4983_v52 = vpop.f32.mrf.mxu1  ;;  %1968 = vmatprep.mubr.f32.mxu1 %v8165_v35  ;;  %4989 = vmatprep.subr.msk.mxu0 %vm8206_vm13, %v8140_v36  ;;  %v1565_v31 = vsub.f32 %v5853_v38, %v1561_v19 }
 0x4bb   : > { %v4984_v15 = vadd.f32 %v4983_v52, %v4982_v1  ;;  %4990 = vmatpush3.msk.msra.mxu0 %vm8207_vm9, %v8140_v36  ;;  %5024 = vmatpush3.msk.msra.mxu1 %vm5649_vm1, %v8140_v36  ;;  %vm8211_vm1 = vnez %v8070_v9  ;;  %v1566_v1 = vand.u32 2147483647, %v1562_v33  ;;  %v1568_v52 = vand.u32 2147483647, %v1564_v12 }
 0x4bc   : > { %4991 = vmatprep.subr.msk.mxu0 %vm8208_vm10, %v8140_v36  ;;  %5025 = vmatprep.subr.msk.mxu1 %vm8203_vm0, %v8140_v36  ;;  %vm8213_vm0 = vnez %v8074_v13  ;;  %v1569_v47 = vand.u32 2147483647, %v1565_v31 }
 0x4bd   : > { %4444 = vmatmul.mubr.msk.f32.gmra.mxu1 %vm8205_vm12, %v4984_v15  ;;  %4992 = vmatpush3.msk.msra.mxu0 %vm8209_vm8, %v8140_v36  ;;  %vm8212_vm12 = vnez %v8072_v10  ;;  %v1567_v15 = vand.u32 2147483647, %v1563_v39  ;;  %v1570_v44 = vsub.f32 1.0, %v1566_v1  ;;  %v1572_v57 = vsub.f32 1.0, %v1568_v52 }
 0x4be   : > { %4993 = vmatprep.subr.msk.mxu0 %vm8210_vm14, %v8140_v36  ;;  %5026 = vmatpush3.msk.msra.mxu1 %vm8204_vm7, %v8140_v36  ;;  %vm8214_vm7 = vnez %v8076_v14 }
 0x4bf   : > { %4994 = vmatpush3.msk.msra.mxu0 %vm8211_vm1, %v8140_v36  ;;  %5027 = vmatprep.subr.msk.mxu1 %vm8206_vm13, %v8140_v36  ;;  %vm8215_vm13 = vnez %v8078_v17  ;;  %v1571_v30 = vsub.f32 1.0, %v1567_v15  ;;  %v1576_v62 = vmax.f32 %v1572_v57, 0.0 }
 0x4c0   : > { %4995 = vmatprep.subr.msk.mxu0 %vm8212_vm12, %v8140_v36  ;;  %5028 = vmatpush3.msk.msra.mxu1 %vm8207_vm9, %v8140_v36  ;;  %vm8216_vm9 = vnez %v8080_v21 }
 0x4c1   : > { %4996 = vmatpush3.msk.msra.mxu0 %vm8213_vm0, %v8140_v36  ;;  %5029 = vmatprep.subr.msk.mxu1 %vm8208_vm10, %v8140_v36  ;;  %vm8217_vm10 = vnez %v8082_v25  ;;  %v1575_v55 = vmax.f32 %v1571_v30, 0.0 }
 0x4c2   : > { %4997 = vmatprep.subr.msk.mxu0 %vm8214_vm7, %v8140_v36  ;;  %5030 = vmatpush3.msk.msra.mxu1 %vm8209_vm8, %v8140_v36  ;;  %vm8218_vm8 = vnez %v8084_v20 }
 0x4c3   : > { %4998 = vmatpush3.msk.msra.mxu0 %vm8215_vm13, %v8140_v36  ;;  %5031 = vmatprep.subr.msk.mxu1 %vm8210_vm14, %v8140_v36  ;;  %vm8220_vm14 = vnez %v8219_v51 }
 0x4c4   : > { %4999 = vmatprep.subr.msk.mxu0 %vm8216_vm9, %v8140_v36  ;;  %5032 = vmatpush3.msk.msra.mxu1 %vm8211_vm1, %v8140_v36  ;;  %vm8222_vm1 = vnez %v8221_v29 }
 0x4c5   : > { %5000 = vmatpush3.msk.msra.mxu0 %vm8217_vm10, %v8140_v36  ;;  %5033 = vmatprep.subr.msk.mxu1 %vm8212_vm12, %v8140_v36 }
 0x4c6   : > { %5001 = vmatprep.subr.msk.mxu0 %vm8218_vm8, %v8140_v36  ;;  %5034 = vmatpush3.msk.msra.mxu1 %vm8213_vm0, %v8140_v36 }
 0x4c7   : > { %5002 = vmatpush3.msk.msra.mxu0 %vm8220_vm14, %v8140_v36  ;;  %5035 = vmatprep.subr.msk.mxu1 %vm8214_vm7, %v8140_v36 }
 0x4c8   : > { %5003 = vmatprep.subr.msk.mxu0 %vm8222_vm1, %v8140_v36  ;;  %5036 = vmatpush3.msk.msra.mxu1 %vm8215_vm13, %v8140_v36 }
 0x4c9   : > { %5004 = vmatpush3.msk.msra.mxu0 %vm8180_vm3, %v8140_v36  ;;  %5037 = vmatprep.subr.msk.mxu1 %vm8216_vm9, %v8140_v36  ;;  %vm8228_vm9 = vnez %v8227_v41 }
 0x4ca   : > { %5005 = vmatprep.subr.msk.mxu0 %vm8181_vm4, %v8140_v36  ;;  %5038 = vmatpush3.msk.msra.mxu1 %vm8217_vm10, %v8140_v36 }
 0x4cb   : > { %5006 = vmatpush3.msk.msra.mxu0 %vm8182_vm5, %v8140_v36  ;;  %5039 = vmatprep.subr.msk.mxu1 %vm8218_vm8, %v8140_v36 }
 0x4cc   : > { %5007 = vmatprep.subr.msk.mxu0 %vm8184_vm6, %v8140_v36  ;;  %5040 = vmatpush3.msk.msra.mxu1 %vm8220_vm14, %v8140_v36  ;;  %vm8259_vm14 = vcmask 130048  }
 0x4cd   : > { %5008 = vmatpush3.msk.msra.mxu0 %vm8228_vm9, %v8140_v36  ;;  %5041 = vmatprep.subr.msk.mxu1 %vm8222_vm1, %v8140_v36  ;;  %vm8233_vm1 = vnez %v8232_v27 }
 0x4ce   : > { %5009 = vmatprep.subr.msk.mxu0 %vm8188_vm11, %v8140_v36  ;;  %5042 = vmatpush3.msk.msra.mxu1 %vm8180_vm3, %v8140_v36  ;;  %vm8235_vm3 = vnez %v8234_v26 }
 0x4cf   : > { %5010 = vmatpush3.msk.msra.mxu0 %vm8190_vm15, %v8140_v36  ;;  %5043 = vmatprep.subr.msk.mxu1 %vm8181_vm4, %v8140_v36  ;;  %vm8237_vm4 = vnez %v8236_v48 }
 0x4d0   : > { %5011 = vmatprep.subr.msk.mxu0 %vm8192_vm2, %v8140_v36  ;;  %5044 = vmatpush3.msk.msra.mxu1 %vm8182_vm5, %v8140_v36  ;;  %vm8239_vm5 = vnez %v8238_v24  ;;  %v1574_v24 = vmax.f32 %v1570_v44, 0.0 }
 0x4d1   : > { %5012 = vmatpush3.msk.msra.mxu0 %vm8233_vm1, %v8140_v36  ;;  %5045 = vmatprep.subr.msk.mxu1 %vm8184_vm6, %v8140_v36  ;;  %vm8241_vm6 = vnez %v8240_v46  ;;  %v1573_v46 = vsub.f32 1.0, %v1569_v47 }
 0x4d2   : > { %5013 = vmatprep.subr.msk.mxu0 %vm8235_vm3, %v8140_v36  ;;  %5046 = vmatpush3.msk.msra.mxu1 %vm8228_vm9, %v8140_v36  ;;  %vm8257_vm9 = vnez %v8068_v58 }
 0x4d3   : > { %5014 = vmatpush3.msk.msra.mxu0 %vm8237_vm4, %v8140_v36  ;;  %5047 = vmatprep.subr.msk.mxu1 %vm8188_vm11, %v8140_v36  ;;  %v1577_v45 = vmax.f32 %v1573_v46, 0.0  ;;  %vm8255_vm11 = vnez %v8064_v6 }
 0x4d4   : > { %5015 = vmatprep.subr.msk.mxu0 %vm8239_vm5, %v8140_v36  ;;  %5048 = vmatpush3.msk.msra.mxu1 %vm8190_vm15, %v8140_v36 }
 0x4d5   : > { %5016 = vmatpush3.msk.msra.mxu0 %vm8241_vm6, %v8140_v36  ;;  %5049 = vmatprep.subr.msk.mxu1 %vm8192_vm2, %v8140_v36  ;;  %vm8253_vm2 = vnez %v8062_v3 }
 0x4d6   : > { %5050 = vmatpush3.msk.msra.mxu1 %vm8233_vm1, %v8140_v36  ;;  %vm8252_vm1 = vnez %v8060_v2 }
 0x4d7   : > { %5051 = vmatprep.subr.msk.mxu1 %vm8235_vm3, %v8140_v36  ;;  %vm8246_vm3 = vnez %v8163_v63 }
 0x4d8   : > { %5052 = vmatpush3.msk.msra.mxu1 %vm8237_vm4, %v8140_v36  ;;  %vm8245_vm4 = vnez %v8162_v28 }
 0x4d9   : > { %5053 = vmatprep.subr.msk.mxu1 %vm8239_vm5, %v8140_v36  ;;  %vm8244_vm5 = vnez %v8133_v16 }
 0x4da   : > { %5054 = vmatpush3.msk.msra.mxu1 %vm8241_vm6, %v8140_v36  ;;  %vm8243_vm6 = vnez %v8110_v53 }
 0x575   : > { %v1881_v34 = vpop.f32.mrf.mxu0 }
 0x576   : > { %v1975_v27 = vmul.f32 %v1881_v34, %v1574_v24 }
 0x577   : > { %v1883_v11 = vpop.f32.mrf.mxu0 }
 0x578   : > { %v1976_v33 = vmul.f32 %v1883_v11, %v1575_v55 }
 0x579   : > { %v1887_v48 = vpop.f32.mrf.mxu0  ;;  %v1964_v26 = vpop.f32.mrf.mxu1 }
 0x57a   : > { %v1977_v32 = vmul.f32 %v1887_v48, %v1576_v62  ;;  %v1993_v52 = vmul.f32 %v1964_v26, %v1574_v24 }
 0x57b   : > { %v1889_v50 = vpop.f32.mrf.mxu0  ;;  %v1966_v19 = vpop.f32.mrf.mxu1 }
 0x57c   : > { %v1979_v12 = vadd.f32 %v1977_v32, %v1975_v27  ;;  %v1978_v39 = vmul.f32 %v1889_v50, %v1577_v45  ;;  %v1994_v47 = vmul.f32 %v1966_v19, %v1575_v55 }
 0x57d   : > { %v1970_v31 = vpop.f32.mrf.mxu1 }
 0x57e   : > { %v1980_v1 = vrot.slane %v1979_v12, 4  ;;  %v1986_v41 = vadd.f32 %v1978_v39, %v1976_v33  ;;  %v1995_v15 = vmul.f32 %v1970_v31, %v1576_v62 }
 0x57f   : > { %v1972_v8 = vpop.f32.mrf.mxu1 }
 0x580   : > { %v1981_v44 = vadd.f32 %v1980_v1, %v1979_v12  ;;  %v1987_v57 = vrot.slane %v1986_v41, 4  ;;  %v1997_v40 = vadd.f32 %v1995_v15, %v1993_v52  ;;  %v1996_v54 = vmul.f32 %v1972_v8, %v1577_v45 }
 0x582   : > { %v1982_v34 = vrot.slane %v1981_v44, 2  ;;  %v1988_v30 = vadd.f32 %v1987_v57, %v1986_v41  ;;  %v1998_v48 = vrot.slane %v1997_v40, 4  ;;  %v2004_v46 = vadd.f32 %v1996_v54, %v1994_v47 }
 0x584   : > { %v1983_v42 = vadd.f32 %v1982_v34, %v1981_v44  ;;  %v1989_v29 = vrot.slane %v1988_v30, 2  ;;  %v1999_v11 = vadd.f32 %v1998_v48, %v1997_v40  ;;  %v2005_v32 = vrot.slane %v2004_v46, 4 }
 0x586   : > { %v1984_v50 = vrot.slane %v1983_v42, 1  ;;  %v1990_v27 = vadd.f32 %v1989_v29, %v1988_v30  ;;  %v2000_v51 = vrot.slane %v1999_v11, 2  ;;  %v2006_v26 = vadd.f32 %v2005_v32, %v2004_v46 }
 0x588   : > { %v1991_v24 = vrot.slane %v1990_v27, 1  ;;  %v2001_v62 = vadd.f32 %v2000_v51, %v1999_v11  ;;  %v2007_v55 = vrot.slane %v2006_v26, 2  ;;  %v1985_v19 = vadd.f32 %v1984_v50, %v1983_v42 }
 0x58a   : > { %v1992_v33 = vadd.f32 %v1991_v24, %v1990_v27  ;;  %v2002_v12 = vrot.slane %v2001_v62, 1  ;;  %v2008_v39 = vadd.f32 %v2007_v55, %v2006_v26 }
 0x58c   : > { %v2013_v8 = vcombine.low %v1985_v19, %v1992_v33  ;;  %v2009_v45 = vrot.slane %v2008_v39, 1  ;;  %v2003_v54 = vadd.f32 %v2002_v12, %v2001_v62 }
 0x58e   : > { %v2020_v41 = vrot.slane %v2013_v8, %v6349_v56  ;;  %v2010_v31 = vadd.f32 %v2009_v45, %v2008_v39 }
 0x590   : > { %v6865_v40 = vadd.f32 %v2020_v41, %v6609_v43  ;;  %v2025_v1 = vcombine.low %v2003_v54, %v2010_v31 }
 0x592   : > { %v2032_v29 = vrot.slane %v2025_v1, %v6349_v56  ;;  %v2122_v51 = vrot.slane %v6865_v40, %v6006_v5  ;;  %v2118_v42 = vrot.slane %v6865_v40, %v5806_v22 }
 0x594   : > { %v2033_v52 = vrot.slane %v2032_v29, 7  ;;  %v2132_v15 = vrot.slane %v2122_v51, %v5806_v22  ;;  %v2128_v47 = vrot.slane %v2118_v42, %v5806_v22 }
 0x596   : > { %v6875_v44 = vadd.f32 %v2033_v52, %v6617_v49  ;;  %4477 = vmatprep.mubr.msk.f32.mxu0 %vm8243_vm6, %v2132_v15 }
 0x597   : > { %4478 = vmatmul.mubr.msk.f32.vlgmr.msra.gmra.mxu0 %vm8244_vm5, %v2128_v47 }
 0x598   : > { %4479 = vmatprep.mubr.msk.f32.mxu0 %vm8245_vm4, %v2132_v15  ;;  %v2220_v43 = vrot.slane %v6875_v44, %v6015_v18  ;;  %v2216_v57 = vrot.slane %v6875_v44, %v5809_v23  ;;  %v2040_v34 = vmul.f32 7.5, %v6875_v44 }
 0x59a   : > { %v2230_v49 = vrot.slane %v2220_v43, %v5809_v23  ;;  %v2226_v30 = vrot.slane %v2216_v57, %v5809_v23  ;;  %v2041_v48 = vadd.f32 %v2040_v34, %v6088_v4 }
 0x59b   : > { %4480 = vmatmul.mubr.msk.f32.gmra.mxu0 %vm8246_vm3, %v2128_v47 }
 0x59c   : > { %4513 = vmatprep.mubr.msk.f32.mxu1 %vm8243_vm6, %v2230_v49  ;;  %v2042_v46 = vmax.f32 %v2041_v48, 0.0  ;;  %2380 = vmatprep.mubr.f32.mxu0 %v8165_v35  ;;  %vm8250_vm6 = vnez %v8056_v61 }
 0x59d   : > { %4514 = vmatmul.mubr.msk.f32.vlgmr.msra.gmra.mxu1 %vm8244_vm5, %v2226_v30  ;;  %vm8249_vm5 = vnez %v8054_v60 }
 0x59e   : > { %4515 = vmatprep.mubr.msk.f32.mxu1 %vm8245_vm4, %v2230_v49  ;;  %v2043_v11 = vmin.f32 %v2042_v46, 15.0  ;;  %vm8248_vm4 = vcmask 130048  }
 0x59f   : > { %vm8254_vm15 = vmmov %vm8248_vm4 }
 0x5a0   : > { %v2087_v32 = vrot.slane %v2043_v11, %v6015_v18  ;;  %v2083_v50 = vrot.slane %v2043_v11, %v5809_v23 }
 0x5a1   : > { %4516 = vmatmul.mubr.msk.f32.gmra.mxu1 %vm8246_vm3, %v2226_v30  ;;  %vm8247_vm3 = vnez %v8052_v59 }
 0x5a2   : > { %v2097_v27 = vrot.slane %v2087_v32, %v5809_v23  ;;  %v2093_v26 = vrot.slane %v2083_v50, %v5809_v23  ;;  %2463 = vmatprep.mubr.f32.mxu1 %v8165_v35  ;;  %v8261_v50 = vld [vmem:[#allocation11_spill] sm:$0xff] }
 0x5a4   : > { %v2101_v24 = vsub.f32 %v5853_v38, %v2097_v27  ;;  %v2100_v62 = vsub.f32 %v5853_v38, %v2093_v26  ;;  %v2099_v55 = vsub.f32 %v5851_v37, %v2097_v27  ;;  %v2098_v19 = vsub.f32 %v5851_v37, %v2093_v26  ;;  %v8263_v27 = vld [vmem:[#allocation12_spill] sm:$0xff]  ;;  %v8265_v26 = vld [vmem:[#allocation13_spill] sm:$0xff] }
 0x5a6   : > { %v2105_v33 = vand.u32 2147483647, %v2101_v24  ;;  %v2104_v12 = vand.u32 2147483647, %v2100_v62  ;;  %v2103_v39 = vand.u32 2147483647, %v2099_v55 }
 0x5a7   : > { %v2102_v8 = vand.u32 2147483647, %v2098_v19  ;;  %v8267_v24 = vld [vmem:[#allocation14_spill] sm:$0xff]  ;;  %v8269_v62 = vld [vmem:[#allocation15_spill] sm:$0xff]  ;;  %v8271_v55 = vld [vmem:[#allocation16_spill] sm:$0xff] }
 0x5a8   : > { %v2109_v45 = vsub.f32 1.0, %v2105_v33  ;;  %v2108_v41 = vsub.f32 1.0, %v2104_v12  ;;  %v2107_v54 = vsub.f32 1.0, %v2103_v39  ;;  %v8273_v19 = vld [vmem:[#allocation17_spill] sm:$0xff]  ;;  %v8275_v33 = vld [vmem:[#allocation18_spill] sm:$0xff]  ;;  %v8277_v12 = vld [vmem:[#allocation19_spill] sm:$0xff] }
 0x5a9   : > { %v2106_v31 = vsub.f32 1.0, %v2102_v8  ;;  %v8279_v39 = vld [vmem:[#allocation20_spill] sm:$0xff]  ;;  %v8281_v8 = vld [vmem:[#allocation21_spill] sm:$0xff] }
 0x5aa   : > { %v2113_v1 = vmax.f32 %v2109_v45, 0.0  ;;  %v2112_v29 = vmax.f32 %v2108_v41, 0.0  ;;  %v2111_v51 = vmax.f32 %v2107_v54, 0.0  ;;  %v8283_v45 = vld [vmem:[#allocation23_spill] sm:$0xff]  ;;  %v8285_v41 = vld [vmem:[#allocation22_spill] sm:$0xff]  ;;  %v8287_v54 = vld [vmem:[#allocation25_spill] sm:$0xff] }
 0x5ab   : > { %v2110_v42 = vmax.f32 %v2106_v31, 0.0  ;;  %v8289_v31 = vld [vmem:[#allocation24_spill] sm:$0xff] }
 0x5ac   : > { %2344 = vmatprep.subr.mxu0 %v2113_v1  ;;  %2427 = vmatprep.subr.mxu1 %v2113_v1  ;;  %v2036_v1 = vmul.f32 7.5, %v6865_v40 }
 0x5ad   : > { %2345 = vmatpush1.msra.mxu0 %v2112_v29  ;;  %2428 = vmatpush1.msra.mxu1 %v2112_v29  ;;  %v8291_v29 = vld [vmem:[#allocation28_spill] sm:$0xff] }
 0x5ae   : > { %2346 = vmatprep.subr.mxu0 %v2111_v51  ;;  %2429 = vmatprep.subr.mxu1 %v2111_v51  ;;  %v2037_v51 = vadd.f32 %v2036_v1, %v8291_v29 }
 0x5af   : > { %2347 = vmatpush1.msra.mxu0 %v2110_v42  ;;  %2430 = vmatpush1.msra.mxu1 %v2110_v42 }
 0x5b0   : > { %5061 = vmatprep.subr.msk.mxu0 %vm8247_vm3, %v8140_v36  ;;  %5099 = vmatprep.subr.msk.mxu1 %vm8247_vm3, %v8140_v36  ;;  %vm8251_vm3 = vnez %v8058_v0  ;;  %v2038_v42 = vmax.f32 %v2037_v51, 0.0 }
 0x657   : > { %v5017_v52 = vpop.f32.mrf.mxu0 }
 0x659   : > { %v5018_v15 = vpop.f32.mrf.mxu0 }
 0x65a   : > { %v5019_v47 = vadd.f32 %v5018_v15, %v5017_v52  ;;  %v2039_v52 = vmin.f32 %v2038_v42, 15.0 }
 0x65b   : > { %v5020_v43 = vpop.f32.mrf.mxu0 }
 0x65c   : > { %4517 = vmatmul.mubr.msk.f32.vlgmr.msra.gmra.mxu0 %vm8248_vm4, %v5019_v47  ;;  %v2048_v15 = vrot.slane %v2039_v52, %v5806_v22  ;;  %v2052_v47 = vrot.slane %v2039_v52, %v6006_v5 }
 0x65d   : > { %v5021_v57 = vpop.f32.mrf.mxu0  ;;  %v5055_v34 = vpop.f32.mrf.mxu1  ;;  %2386 = vmatprep.mubr.f32.mxu0 %v8165_v35  ;;  %5062 = vmatpush3.msk.msra.mxu0 %vm8249_vm5, %v8140_v36 }
 0x65e   : > { %v5022_v49 = vadd.f32 %v5021_v57, %v5020_v43  ;;  %5063 = vmatprep.subr.msk.mxu0 %vm8250_vm6, %v8140_v36  ;;  %v2058_v43 = vrot.slane %v2048_v15, %v5806_v22  ;;  %v2062_v57 = vrot.slane %v2052_v47, %v5806_v22 }
 0x65f   : > { %v5056_v30 = vpop.f32.mrf.mxu1  ;;  %5064 = vmatpush3.msk.msra.mxu0 %vm8251_vm3, %v8140_v36 }
 0x660   : > { %v5057_v48 = vadd.f32 %v5056_v30, %v5055_v34  ;;  %4518 = vmatmul.mubr.msk.f32.gmra.mxu0 %vm8248_vm4, %v5022_v49  ;;  %5065 = vmatprep.subr.msk.mxu0 %vm8252_vm1, %v8140_v36  ;;  %vm8256_vm4 = vnez %v8066_v7  ;;  %v2063_v34 = vsub.f32 %v5851_v37, %v2058_v43  ;;  %v2065_v49 = vsub.f32 %v5853_v38, %v2058_v43 }
 0x661   : > { %v5058_v46 = vpop.f32.mrf.mxu1  ;;  %5066 = vmatpush3.msk.msra.mxu0 %vm8253_vm2, %v8140_v36  ;;  %v2064_v30 = vsub.f32 %v5851_v37, %v2062_v57 }
 0x662   : > { %4519 = vmatmul.mubr.msk.f32.vlgmr.msra.gmra.mxu1 %vm8254_vm15, %v5057_v48  ;;  %5067 = vmatprep.subr.msk.mxu0 %vm8255_vm11, %v8140_v36  ;;  %vm8258_vm15 = vnez %v8070_v9  ;;  %v2066_v48 = vsub.f32 %v5853_v38, %v2062_v57 }
 0x663   : > { %v5059_v11 = vpop.f32.mrf.mxu1  ;;  %2469 = vmatprep.mubr.f32.mxu1 %v8165_v35  ;;  %5068 = vmatpush3.msk.msra.mxu0 %vm8256_vm4, %v8140_v36 }
 0x664   : > { %v5060_v32 = vadd.f32 %v5059_v11, %v5058_v46  ;;  %5069 = vmatprep.subr.msk.mxu0 %vm8257_vm9, %v8140_v36  ;;  %5100 = vmatpush3.msk.msra.mxu1 %vm8249_vm5, %v8140_v36  ;;  %v2067_v46 = vand.u32 2147483647, %v2063_v34  ;;  %v2069_v11 = vand.u32 2147483647, %v2065_v49  ;;  %v2070_v1 = vand.u32 2147483647, %v2066_v48 }
 0x665   : > { %5070 = vmatpush3.msk.msra.mxu0 %vm8258_vm15, %v8140_v36  ;;  %5101 = vmatprep.subr.msk.mxu1 %vm8250_vm6, %v8140_v36 }
 0x666   : > { %4520 = vmatmul.mubr.msk.f32.gmra.mxu1 %vm8259_vm14, %v5060_v32  ;;  %5071 = vmatprep.subr.msk.mxu0 %vm8212_vm12, %v8140_v36  ;;  %vm8260_vm14 = vnez %v8080_v21  ;;  %v2068_v32 = vand.u32 2147483647, %v2064_v30  ;;  %v2071_v51 = vsub.f32 1.0, %v2067_v46  ;;  %v2073_v42 = vsub.f32 1.0, %v2069_v11 }
 0x667   : > { %5072 = vmatpush3.msk.msra.mxu0 %vm8213_vm0, %v8140_v36  ;;  %5102 = vmatpush3.msk.msra.mxu1 %vm8251_vm3, %v8140_v36 }
 0x668   : > { %5073 = vmatprep.subr.msk.mxu0 %vm8214_vm7, %v8140_v36  ;;  %5103 = vmatprep.subr.msk.mxu1 %vm8252_vm1, %v8140_v36  ;;  %v2072_v52 = vsub.f32 1.0, %v2068_v32  ;;  %v2077_v47 = vmax.f32 %v2073_v42, 0.0 }
 0x669   : > { %5074 = vmatpush3.msk.msra.mxu0 %vm8215_vm13, %v8140_v36  ;;  %5104 = vmatpush3.msk.msra.mxu1 %vm8253_vm2, %v8140_v36  ;;  %vm8262_vm2 = vnez %v8261_v50 }
 0x66a   : > { %5075 = vmatprep.subr.msk.mxu0 %vm8260_vm14, %v8140_v36  ;;  %5105 = vmatprep.subr.msk.mxu1 %vm8255_vm11, %v8140_v36  ;;  %vm8264_vm11 = vnez %v8263_v27 }
 0x66b   : > { %5076 = vmatpush3.msk.msra.mxu0 %vm8217_vm10, %v8140_v36  ;;  %5106 = vmatpush3.msk.msra.mxu1 %vm8256_vm4, %v8140_v36  ;;  %vm8266_vm4 = vnez %v8265_v26 }
 0x66c   : > { %5077 = vmatprep.subr.msk.mxu0 %vm8218_vm8, %v8140_v36  ;;  %5107 = vmatprep.subr.msk.mxu1 %vm8257_vm9, %v8140_v36  ;;  %vm8268_vm9 = vnez %v8267_v24 }
 0x66d   : > { %5078 = vmatpush3.msk.msra.mxu0 %vm8262_vm2, %v8140_v36  ;;  %5108 = vmatpush3.msk.msra.mxu1 %vm8258_vm15, %v8140_v36  ;;  %vm8270_vm15 = vnez %v8269_v62 }
 0x66e   : > { %5079 = vmatprep.subr.msk.mxu0 %vm8264_vm11, %v8140_v36  ;;  %5109 = vmatprep.subr.msk.mxu1 %vm8212_vm12, %v8140_v36  ;;  %vm8272_vm12 = vnez %v8271_v55 }
 0x66f   : > { %5080 = vmatpush3.msk.msra.mxu0 %vm8266_vm4, %v8140_v36  ;;  %5110 = vmatpush3.msk.msra.mxu1 %vm8213_vm0, %v8140_v36  ;;  %vm8274_vm0 = vnez %v8273_v19 }
 0x670   : > { %5081 = vmatprep.subr.msk.mxu0 %vm8268_vm9, %v8140_v36  ;;  %5111 = vmatprep.subr.msk.mxu1 %vm8214_vm7, %v8140_v36  ;;  %vm8276_vm7 = vnez %v8275_v33 }
 0x671   : > { %5082 = vmatpush3.msk.msra.mxu0 %vm8270_vm15, %v8140_v36  ;;  %5112 = vmatpush3.msk.msra.mxu1 %vm8215_vm13, %v8140_v36  ;;  %vm8278_vm13 = vnez %v8277_v12 }
 0x672   : > { %5083 = vmatprep.subr.msk.mxu0 %vm8272_vm12, %v8140_v36  ;;  %5113 = vmatprep.subr.msk.mxu1 %vm8260_vm14, %v8140_v36  ;;  %vm8280_vm14 = vnez %v8279_v39 }
 0x673   : > { %5084 = vmatpush3.msk.msra.mxu0 %vm8274_vm0, %v8140_v36  ;;  %5114 = vmatpush3.msk.msra.mxu1 %vm8217_vm10, %v8140_v36  ;;  %vm8282_vm10 = vnez %v8281_v8  ;;  %v2076_v8 = vmax.f32 %v2072_v52, 0.0 }
 0x674   : > { %5085 = vmatprep.subr.msk.mxu0 %vm8276_vm7, %v8140_v36  ;;  %5115 = vmatprep.subr.msk.mxu1 %vm8218_vm8, %v8140_v36  ;;  %vm8284_vm8 = vnez %v8283_v45 }
 0x675   : > { %5086 = vmatpush3.msk.msra.mxu0 %vm8278_vm13, %v8140_v36  ;;  %5116 = vmatpush3.msk.msra.mxu1 %vm8262_vm2, %v8140_v36  ;;  %vm8286_vm2 = vnez %v8285_v41 }
 0x676   : > { %5087 = vmatprep.subr.msk.mxu0 %vm8280_vm14, %v8140_v36  ;;  %5117 = vmatprep.subr.msk.mxu1 %vm8264_vm11, %v8140_v36  ;;  %vm8288_vm11 = vnez %v8287_v54  ;;  %v2075_v54 = vmax.f32 %v2071_v51, 0.0 }
 0x677   : > { %5088 = vmatpush3.msk.msra.mxu0 %vm8282_vm10, %v8140_v36  ;;  %5118 = vmatpush3.msk.msra.mxu1 %vm8266_vm4, %v8140_v36  ;;  %vm8290_vm4 = vnez %v8289_v31  ;;  %v2074_v31 = vsub.f32 1.0, %v2070_v1 }
 0x678   : > { %5089 = vmatprep.subr.msk.mxu0 %vm8284_vm8, %v8140_v36  ;;  %5119 = vmatprep.subr.msk.mxu1 %vm8268_vm9, %v8140_v36 }
 0x679   : > { %5090 = vmatpush3.msk.msra.mxu0 %vm8286_vm2, %v8140_v36  ;;  %5120 = vmatpush3.msk.msra.mxu1 %vm8270_vm15, %v8140_v36  ;;  %v2078_v39 = vmax.f32 %v2074_v31, 0.0 }
 0x67a   : > { %5091 = vmatprep.subr.msk.mxu0 %vm8288_vm11, %v8140_v36  ;;  %5121 = vmatprep.subr.msk.mxu1 %vm8272_vm12, %v8140_v36  ;;  %vm8308_vm12 = vnez %v8078_v17 }
 0x67b   : > { %5092 = vmatpush3.msk.msra.mxu0 %vm8290_vm4, %v8140_v36  ;;  %5122 = vmatpush3.msk.msra.mxu1 %vm8274_vm0, %v8140_v36  ;;  %vm8307_vm0 = vnez %v8076_v14 }
 0x67c   : > { %5123 = vmatprep.subr.msk.mxu1 %vm8276_vm7, %v8140_v36  ;;  %vm8306_vm7 = vcmask 130048  }
 0x67d   : > { %5124 = vmatpush3.msk.msra.mxu1 %vm8278_vm13, %v8140_v36  ;;  %vm8304_vm13 = vnez %v8072_v10 }
 0x67e   : > { %5125 = vmatprep.subr.msk.mxu1 %vm8280_vm14, %v8140_v36  ;;  %vm8303_vm14 = vnez %v8070_v9 }
 0x67f   : > { %5126 = vmatpush3.msk.msra.mxu1 %vm8282_vm10, %v8140_v36  ;;  %vm8302_vm10 = vnez %v8068_v58 }
 0x680   : > { %5127 = vmatprep.subr.msk.mxu1 %vm8284_vm8, %v8140_v36  ;;  %vm8295_vm8 = vnez %v8163_v63 }
 0x681   : > { %5128 = vmatpush3.msk.msra.mxu1 %vm8286_vm2, %v8140_v36  ;;  %vm8294_vm2 = vnez %v8162_v28 }
 0x682   : > { %5129 = vmatprep.subr.msk.mxu1 %vm8288_vm11, %v8140_v36  ;;  %vm8293_vm11 = vnez %v8133_v16 }
 0x683   : > { %5130 = vmatpush3.msk.msra.mxu1 %vm8290_vm4, %v8140_v36  ;;  %vm8292_vm4 = vnez %v8110_v53 }
 0x71c   : > { %v2382_v29 = vpop.f32.mrf.mxu0 }
 0x71d   : > { %v2476_v45 = vmul.f32 %v2382_v29, %v2075_v54 }
 0x71e   : > { %v2384_v15 = vpop.f32.mrf.mxu0 }
 0x71f   : > { %v2477_v57 = vmul.f32 %v2384_v15, %v2076_v8 }
 0x720   : > { %v2388_v41 = vpop.f32.mrf.mxu0 }
 0x721   : > { %v2478_v43 = vmul.f32 %v2388_v41, %v2077_v47 }
 0x722   : > { %v2390_v12 = vpop.f32.mrf.mxu0  ;;  %v2465_v33 = vpop.f32.mrf.mxu1 }
 0x723   : > { %v2480_v34 = vadd.f32 %v2478_v43, %v2476_v45  ;;  %v2479_v49 = vmul.f32 %v2390_v12, %v2078_v39  ;;  %v2494_v1 = vmul.f32 %v2465_v33, %v2075_v54 }
 0x724   : > { %v2467_v30 = vpop.f32.mrf.mxu1 }
 0x725   : > { %v2481_v48 = vrot.slane %v2480_v34, 4  ;;  %v2487_v46 = vadd.f32 %v2479_v49, %v2477_v57  ;;  %v2495_v51 = vmul.f32 %v2467_v30, %v2076_v8 }
 0x726   : > { %v2471_v11 = vpop.f32.mrf.mxu1 }
 0x727   : > { %v2482_v19 = vadd.f32 %v2481_v48, %v2480_v34  ;;  %v2488_v32 = vrot.slane %v2487_v46, 4  ;;  %v2496_v55 = vmul.f32 %v2471_v11, %v2077_v47 }
 0x728   : > { %v2473_v42 = vpop.f32.mrf.mxu1 }
 0x729   : > { %v2483_v62 = vrot.slane %v2482_v19, 2  ;;  %v2489_v29 = vadd.f32 %v2488_v32, %v2487_v46  ;;  %v2498_v52 = vadd.f32 %v2496_v55, %v2494_v1  ;;  %v2497_v41 = vmul.f32 %v2473_v42, %v2078_v39 }
 0x72b   : > { %v2484_v31 = vadd.f32 %v2483_v62, %v2482_v19  ;;  %v2490_v24 = vrot.slane %v2489_v29, 2  ;;  %v2499_v26 = vrot.slane %v2498_v52, 4  ;;  %v2505_v15 = vadd.f32 %v2497_v41, %v2495_v51 }
 0x72d   : > { %v2485_v45 = vrot.slane %v2484_v31, 1  ;;  %v2491_v12 = vadd.f32 %v2490_v24, %v2489_v29  ;;  %v2500_v43 = vadd.f32 %v2499_v26, %v2498_v52  ;;  %v2506_v27 = vrot.slane %v2505_v15, 4 }
 0x72f   : > { %v2492_v57 = vrot.slane %v2491_v12, 1  ;;  %v2501_v49 = vrot.slane %v2500_v43, 2  ;;  %v2507_v34 = vadd.f32 %v2506_v27, %v2505_v15  ;;  %v2486_v48 = vadd.f32 %v2485_v45, %v2484_v31 }
 0x731   : > { %v2493_v33 = vadd.f32 %v2492_v57, %v2491_v12  ;;  %v2502_v54 = vadd.f32 %v2501_v49, %v2500_v43  ;;  %v2508_v8 = vrot.slane %v2507_v34, 2 }
 0x733   : > { %v2514_v47 = vcombine.low %v2486_v48, %v2493_v33  ;;  %v2503_v30 = vrot.slane %v2502_v54, 1  ;;  %v2509_v46 = vadd.f32 %v2508_v8, %v2507_v34 }
 0x735   : > { %v2521_v55 = vrot.slane %v2514_v47, %v6349_v56  ;;  %v2510_v62 = vrot.slane %v2509_v46, 1  ;;  %v2504_v39 = vadd.f32 %v2503_v30, %v2502_v54 }
 0x737   : > { %v7121_v19 = vadd.f32 %v2521_v55, %v6865_v40  ;;  %v2511_v24 = vadd.f32 %v2510_v62, %v2509_v46 }
 0x739   : > { %v2526_v26 = vcombine.low %v2504_v39, %v2511_v24  ;;  %v2623_v11 = vrot.slane %v7121_v19, %v6006_v5  ;;  %v2619_v27 = vrot.slane %v7121_v19, %v5806_v22 }
 0x73b   : > { %v2533_v32 = vrot.slane %v2526_v26, %v6349_v56  ;;  %v2633_v1 = vrot.slane %v2623_v11, %v5806_v22  ;;  %v2629_v51 = vrot.slane %v2619_v27, %v5806_v22 }
 0x73d   : > { %v2534_v42 = vrot.slane %v2533_v32, 7  ;;  %4553 = vmatprep.mubr.msk.f32.mxu0 %vm8292_vm4, %v2633_v1 }
 0x73e   : > { %4554 = vmatmul.mubr.msk.f32.vlgmr.msra.gmra.mxu0 %vm8293_vm11, %v2629_v51 }
 0x73f   : > { %v7135_v40 = vadd.f32 %v2534_v42, %v6875_v44  ;;  %4555 = vmatprep.mubr.msk.f32.mxu0 %vm8294_vm2, %v2633_v1 }
 0x741   : > { %v2721_v29 = vrot.slane %v7135_v40, %v6015_v18  ;;  %v2717_v52 = vrot.slane %v7135_v40, %v5809_v23  ;;  %v2541_v41 = vmul.f32 7.5, %v7135_v40 }
 0x742   : > { %4556 = vmatmul.mubr.msk.f32.gmra.mxu0 %vm8295_vm8, %v2629_v51 }
 0x743   : > { %v2731_v31 = vrot.slane %v2721_v29, %v5809_v23  ;;  %v2727_v15 = vrot.slane %v2717_v52, %v5809_v23  ;;  %v2542_v44 = vadd.f32 %v2541_v41, %v6088_v4  ;;  %2881 = vmatprep.mubr.f32.mxu0 %v8165_v35 }
 0x745   : > { %4589 = vmatprep.mubr.msk.f32.mxu1 %vm8292_vm4, %v2731_v31  ;;  %v2543_v45 = vmax.f32 %v2542_v44, 0.0  ;;  %vm8301_vm4 = vnez %v8066_v7  ;;  %v8373_v7 = vld [vmem:[#allocation17_spill] sm:$0xff] }
 0x746   : > { %4590 = vmatmul.mubr.msk.f32.vlgmr.msra.gmra.mxu1 %vm8293_vm11, %v2727_v15  ;;  %vm8300_vm11 = vnez %v8064_v6  ;;  %v8370_v6 = vld [vmem:[#allocation16_spill] sm:$0xff] }
 0x747   : > { %4591 = vmatprep.mubr.msk.f32.mxu1 %vm8294_vm2, %v2731_v31  ;;  %v2544_v12 = vmin.f32 %v2543_v45, 15.0  ;;  %vm8297_vm2 = vcmask 130048  }
 0x749   : > { %v2588_v43 = vrot.slane %v2544_v12, %v6015_v18  ;;  %v2584_v57 = vrot.slane %v2544_v12, %v5809_v23 }
 0x74a   : > { %4592 = vmatmul.mubr.msk.f32.gmra.mxu1 %vm8295_vm8, %v2727_v15  ;;  %vm8296_vm8 = vnez %v8052_v59 }
 0x74b   : > { %v2598_v49 = vrot.slane %v2588_v43, %v5809_v23  ;;  %v2594_v34 = vrot.slane %v2584_v57, %v5809_v23  ;;  %2964 = vmatprep.mubr.f32.mxu1 %v8165_v35 }
 0x74d   : > { %v2602_v48 = vsub.f32 %v5853_v38, %v2598_v49  ;;  %v2601_v33 = vsub.f32 %v5853_v38, %v2594_v34  ;;  %v2600_v54 = vsub.f32 %v5851_v37, %v2598_v49  ;;  %v2599_v8 = vsub.f32 %v5851_v37, %v2594_v34  ;;  %v8313_v49 = vld [vmem:[#allocation12_spill] sm:$0xff]  ;;  %v8315_v34 = vld [vmem:[#allocation13_spill] sm:$0xff] }
 0x74f   : > { %v2606_v47 = vand.u32 2147483647, %v2602_v48  ;;  %v2605_v30 = vand.u32 2147483647, %v2601_v33  ;;  %v2604_v46 = vand.u32 2147483647, %v2600_v54 }
 0x750   : > { %v2603_v55 = vand.u32 2147483647, %v2599_v8  ;;  %v8319_v54 = vld [vmem:[#allocation16_spill] sm:$0xff]  ;;  %v8321_v8 = vld [vmem:[#allocation17_spill] sm:$0xff] }
 0x751   : > { %v2610_v62 = vsub.f32 1.0, %v2606_v47  ;;  %v2609_v39 = vsub.f32 1.0, %v2605_v30  ;;  %v2608_v24 = vsub.f32 1.0, %v2604_v46  ;;  %v8323_v47 = vld [vmem:[#allocation18_spill] sm:$0xff]  ;;  %v8325_v30 = vld [vmem:[#allocation19_spill] sm:$0xff]  ;;  %v8327_v46 = vld [vmem:[#allocation20_spill] sm:$0xff] }
 0x752   : > { %v2607_v26 = vsub.f32 1.0, %v2603_v55  ;;  %v8329_v55 = vld [vmem:[#allocation21_spill] sm:$0xff] }
 0x753   : > { %v2614_v11 = vmax.f32 %v2610_v62, 0.0  ;;  %v2613_v27 = vmax.f32 %v2609_v39, 0.0  ;;  %v2612_v32 = vmax.f32 %v2608_v24, 0.0  ;;  %v8331_v62 = vld [vmem:[#allocation23_spill] sm:$0xff]  ;;  %v8333_v39 = vld [vmem:[#allocation22_spill] sm:$0xff]  ;;  %v8335_v24 = vld [vmem:[#allocation25_spill] sm:$0xff] }
 0x754   : > { %v2611_v1 = vmax.f32 %v2607_v26, 0.0  ;;  %v8337_v26 = vld [vmem:[#allocation24_spill] sm:$0xff] }
 0x755   : > { %2845 = vmatprep.subr.mxu0 %v2614_v11  ;;  %2928 = vmatprep.subr.mxu1 %v2614_v11  ;;  %v2537_v11 = vmul.f32 7.5, %v7121_v19 }
 0x756   : > { %2846 = vmatpush1.msra.mxu0 %v2613_v27  ;;  %2929 = vmatpush1.msra.mxu1 %v2613_v27  ;;  %v8339_v27 = vld [vmem:[#allocation28_spill] sm:$0xff] }
 0x757   : > { %2847 = vmatprep.subr.mxu0 %v2612_v32  ;;  %2930 = vmatprep.subr.mxu1 %v2612_v32  ;;  %v2538_v32 = vadd.f32 %v2537_v11, %v8339_v27 }
 0x758   : > { %2848 = vmatpush1.msra.mxu0 %v2611_v1  ;;  %2931 = vmatpush1.msra.mxu1 %v2611_v1 }
 0x759   : > { %5137 = vmatprep.subr.msk.mxu0 %vm8296_vm8, %v8140_v36  ;;  %5175 = vmatprep.subr.msk.mxu1 %vm8296_vm8, %v8140_v36  ;;  %vm8298_vm8 = vmmov %vm8297_vm2  ;;  %v2539_v1 = vmax.f32 %v2538_v32, 0.0 }
 0x7fe   : > { %v5093_v51 = vpop.f32.mrf.mxu0 }
 0x800   : > { %v5094_v42 = vpop.f32.mrf.mxu0 }
 0x801   : > { %v5095_v29 = vadd.f32 %v5094_v42, %v5093_v51  ;;  %v2540_v51 = vmin.f32 %v2539_v1, 15.0 }
 0x802   : > { %v5096_v52 = vpop.f32.mrf.mxu0 }
 0x803   : > { %4593 = vmatmul.mubr.msk.f32.vlgmr.msra.gmra.mxu0 %vm8297_vm2, %v5095_v29  ;;  %vm8299_vm2 = vnez %v8062_v3  ;;  %v2549_v42 = vrot.slane %v2540_v51, %v5806_v22  ;;  %v2553_v29 = vrot.slane %v2540_v51, %v6006_v5 }
 0x804   : > { %v5097_v41 = vpop.f32.mrf.mxu0  ;;  %2887 = vmatprep.mubr.f32.mxu0 %v8165_v35  ;;  %5138 = vmatpush3.msk.msra.mxu0 %vm8249_vm5, %v8140_v36 }
 0x805   : > { %v5098_v31 = vadd.f32 %v5097_v41, %v5096_v52  ;;  %5139 = vmatprep.subr.msk.mxu0 %vm8250_vm6, %v8140_v36  ;;  %v2559_v52 = vrot.slane %v2549_v42, %v5806_v22  ;;  %v2563_v41 = vrot.slane %v2553_v29, %v5806_v22 }
 0x806   : > { %v5131_v15 = vpop.f32.mrf.mxu1  ;;  %5140 = vmatpush3.msk.msra.mxu0 %vm8251_vm3, %v8140_v36 }
 0x807   : > { %4594 = vmatmul.mubr.msk.f32.gmra.mxu0 %vm8298_vm8, %v5098_v31  ;;  %5141 = vmatprep.subr.msk.mxu0 %vm8252_vm1, %v8140_v36  ;;  %v2564_v31 = vsub.f32 %v5851_v37, %v2559_v52 }
 0x808   : > { %v5132_v44 = vpop.f32.mrf.mxu1  ;;  %5142 = vmatpush3.msk.msra.mxu0 %vm8299_vm2, %v8140_v36 }
 0x809   : > { %v5133_v45 = vadd.f32 %v5132_v44, %v5131_v15  ;;  %5143 = vmatprep.subr.msk.mxu0 %vm8300_vm11, %v8140_v36  ;;  %v2566_v15 = vsub.f32 %v5853_v38, %v2559_v52  ;;  %v2565_v44 = vsub.f32 %v5851_v37, %v2563_v41 }
 0x80a   : > { %v5134_v12 = vpop.f32.mrf.mxu1  ;;  %5144 = vmatpush3.msk.msra.mxu0 %vm8301_vm4, %v8140_v36 }
 0x80b   : > { %4595 = vmatmul.mubr.msk.f32.vlgmr.msra.gmra.mxu1 %vm8298_vm8, %v5133_v45  ;;  %5145 = vmatprep.subr.msk.mxu0 %vm8302_vm10, %v8140_v36  ;;  %vm8305_vm8 = vnez %v8074_v13  ;;  %v2567_v45 = vsub.f32 %v5853_v38, %v2563_v41 }
 0x80c   : > { %v5135_v43 = vpop.f32.mrf.mxu1  ;;  %2970 = vmatprep.mubr.f32.mxu1 %v8165_v35  ;;  %5146 = vmatpush3.msk.msra.mxu0 %vm8303_vm14, %v8140_v36 }
 0x80d   : > { %v5136_v57 = vadd.f32 %v5135_v43, %v5134_v12  ;;  %5147 = vmatprep.subr.msk.mxu0 %vm8304_vm13, %v8140_v36  ;;  %5176 = vmatpush3.msk.msra.mxu1 %vm8249_vm5, %v8140_v36  ;;  %vm8309_vm5 = vnez %v8080_v21  ;;  %v2568_v12 = vand.u32 2147483647, %v2564_v31  ;;  %v2570_v43 = vand.u32 2147483647, %v2566_v15 }
 0x80e   : > { %5148 = vmatpush3.msk.msra.mxu0 %vm8305_vm8, %v8140_v36  ;;  %5177 = vmatprep.subr.msk.mxu1 %vm8250_vm6, %v8140_v36  ;;  %vm8311_vm6 = vnez %v8084_v20  ;;  %v2571_v11 = vand.u32 2147483647, %v2567_v45 }
 0x80f   : > { %4596 = vmatmul.mubr.msk.f32.gmra.mxu1 %vm8306_vm7, %v5136_v57  ;;  %5149 = vmatprep.subr.msk.mxu0 %vm8307_vm0, %v8140_v36  ;;  %vm8310_vm7 = vnez %v8082_v25  ;;  %v2569_v57 = vand.u32 2147483647, %v2565_v44  ;;  %v2572_v32 = vsub.f32 1.0, %v2568_v12  ;;  %v2574_v1 = vsub.f32 1.0, %v2570_v43 }
 0x810   : > { %5150 = vmatpush3.msk.msra.mxu0 %vm8308_vm12, %v8140_v36  ;;  %5178 = vmatpush3.msk.msra.mxu1 %vm8251_vm3, %v8140_v36  ;;  %vm8312_vm3 = vnez %v8261_v50 }
 0x811   : > { %5151 = vmatprep.subr.msk.mxu0 %vm8309_vm5, %v8140_v36  ;;  %5179 = vmatprep.subr.msk.mxu1 %vm8252_vm1, %v8140_v36  ;;  %vm8314_vm1 = vnez %v8313_v49  ;;  %v2573_v51 = vsub.f32 1.0, %v2569_v57  ;;  %v2578_v29 = vmax.f32 %v2574_v1, 0.0 }
 0x812   : > { %5152 = vmatpush3.msk.msra.mxu0 %vm8310_vm7, %v8140_v36  ;;  %5180 = vmatpush3.msk.msra.mxu1 %vm8299_vm2, %v8140_v36  ;;  %vm8316_vm2 = vnez %v8315_v34 }
 0x813   : > { %5153 = vmatprep.subr.msk.mxu0 %vm8311_vm6, %v8140_v36  ;;  %5181 = vmatprep.subr.msk.mxu1 %vm8300_vm11, %v8140_v36 }
 0x814   : > { %5154 = vmatpush3.msk.msra.mxu0 %vm8312_vm3, %v8140_v36  ;;  %5182 = vmatpush3.msk.msra.mxu1 %vm8301_vm4, %v8140_v36 }
 0x815   : > { %5155 = vmatprep.subr.msk.mxu0 %vm8314_vm1, %v8140_v36  ;;  %5183 = vmatprep.subr.msk.mxu1 %vm8302_vm10, %v8140_v36  ;;  %vm8320_vm10 = vnez %v8319_v54 }
 0x816   : > { %5156 = vmatpush3.msk.msra.mxu0 %vm8316_vm2, %v8140_v36  ;;  %5184 = vmatpush3.msk.msra.mxu1 %vm8303_vm14, %v8140_v36  ;;  %vm8322_vm14 = vnez %v8321_v8 }
 0x817   : > { %5157 = vmatprep.subr.msk.mxu0 %vm8268_vm9, %v8140_v36  ;;  %5185 = vmatprep.subr.msk.mxu1 %vm8304_vm13, %v8140_v36  ;;  %vm8324_vm13 = vnez %v8323_v47 }
 0x818   : > { %5158 = vmatpush3.msk.msra.mxu0 %vm8270_vm15, %v8140_v36  ;;  %5186 = vmatpush3.msk.msra.mxu1 %vm8305_vm8, %v8140_v36  ;;  %vm8326_vm8 = vnez %v8325_v30 }
 0x819   : > { %5159 = vmatprep.subr.msk.mxu0 %vm8320_vm10, %v8140_v36  ;;  %5187 = vmatprep.subr.msk.mxu1 %vm8307_vm0, %v8140_v36  ;;  %vm8328_vm0 = vnez %v8327_v46 }
 0x81a   : > { %5160 = vmatpush3.msk.msra.mxu0 %vm8322_vm14, %v8140_v36  ;;  %5188 = vmatpush3.msk.msra.mxu1 %vm8308_vm12, %v8140_v36  ;;  %vm8330_vm12 = vnez %v8329_v55  ;;  %v2577_v55 = vmax.f32 %v2573_v51, 0.0 }
 0x81b   : > { %5161 = vmatprep.subr.msk.mxu0 %vm8324_vm13, %v8140_v36  ;;  %5189 = vmatprep.subr.msk.mxu1 %vm8309_vm5, %v8140_v36  ;;  %vm8332_vm5 = vnez %v8331_v62 }
 0x81c   : > { %5162 = vmatpush3.msk.msra.mxu0 %vm8326_vm8, %v8140_v36  ;;  %5190 = vmatpush3.msk.msra.mxu1 %vm8310_vm7, %v8140_v36  ;;  %vm8334_vm7 = vnez %v8333_v39 }
 0x81d   : > { %5163 = vmatprep.subr.msk.mxu0 %vm8328_vm0, %v8140_v36  ;;  %5191 = vmatprep.subr.msk.mxu1 %vm8311_vm6, %v8140_v36  ;;  %vm8336_vm6 = vnez %v8335_v24  ;;  %v2576_v24 = vmax.f32 %v2572_v32, 0.0 }
 0x81e   : > { %5164 = vmatpush3.msk.msra.mxu0 %vm8330_vm12, %v8140_v36  ;;  %5192 = vmatpush3.msk.msra.mxu1 %vm8312_vm3, %v8140_v36  ;;  %vm8338_vm3 = vnez %v8337_v26  ;;  %v2575_v26 = vsub.f32 1.0, %v2571_v11 }
 0x81f   : > { %5165 = vmatprep.subr.msk.mxu0 %vm8332_vm5, %v8140_v36  ;;  %5193 = vmatprep.subr.msk.mxu1 %vm8314_vm1, %v8140_v36 }
 0x820   : > { %5166 = vmatpush3.msk.msra.mxu0 %vm8334_vm7, %v8140_v36  ;;  %5194 = vmatpush3.msk.msra.mxu1 %vm8316_vm2, %v8140_v36  ;;  %v2579_v46 = vmax.f32 %v2575_v26, 0.0 }
 0x821   : > { %5167 = vmatprep.subr.msk.mxu0 %vm8336_vm6, %v8140_v36  ;;  %5195 = vmatprep.subr.msk.mxu1 %vm8268_vm9, %v8140_v36 }
 0x822   : > { %5168 = vmatpush3.msk.msra.mxu0 %vm8338_vm3, %v8140_v36  ;;  %5196 = vmatpush3.msk.msra.mxu1 %vm8270_vm15, %v8140_v36  ;;  %vm8357_vm15 = vnez %v8076_v14 }
 0x823   : > { %5197 = vmatprep.subr.msk.mxu1 %vm8320_vm10, %v8140_v36  ;;  %vm8356_vm10 = vnez %v8074_v13 }
 0x824   : > { %5198 = vmatpush3.msk.msra.mxu1 %vm8322_vm14, %v8140_v36  ;;  %vm8355_vm14 = vnez %v8072_v10 }
 0x825   : > { %5199 = vmatprep.subr.msk.mxu1 %vm8324_vm13, %v8140_v36  ;;  %vm8354_vm13 = vcmask 130048  }
 0x826   : > { %5200 = vmatpush3.msk.msra.mxu1 %vm8326_vm8, %v8140_v36  ;;  %vm8353_vm8 = vnez %v8070_v9  ;;  %v8379_v9 = vld [vmem:[#allocation19_spill] sm:$0xff] }
 0x827   : > { %5201 = vmatprep.subr.msk.mxu1 %vm8328_vm0, %v8140_v36  ;;  %vm8351_vm0 = vnez %v8062_v3  ;;  %v8368_v3 = vld [vmem:[#allocation15_spill] sm:$0xff] }
 0x828   : > { %5202 = vmatpush3.msk.msra.mxu1 %vm8330_vm12, %v8140_v36 }
 0x829   : > { %5203 = vmatprep.subr.msk.mxu1 %vm8332_vm5, %v8140_v36  ;;  %vm8343_vm5 = vnez %v8163_v63 }
 0x82a   : > { %5204 = vmatpush3.msk.msra.mxu1 %vm8334_vm7, %v8140_v36  ;;  %vm8342_vm7 = vnez %v8162_v28 }
 0x82b   : > { %5205 = vmatprep.subr.msk.mxu1 %vm8336_vm6, %v8140_v36  ;;  %vm8341_vm6 = vnez %v8133_v16 }
 0x82c   : > { %5206 = vmatpush3.msk.msra.mxu1 %vm8338_vm3, %v8140_v36  ;;  %vm8340_vm3 = vnez %v8110_v53 }
 0x8c3   : > { %v2883_v27 = vpop.f32.mrf.mxu0 }
 0x8c4   : > { %v2977_v62 = vmul.f32 %v2883_v27, %v2576_v24 }
 0x8c5   : > { %v2885_v42 = vpop.f32.mrf.mxu0 }
 0x8c6   : > { %v2978_v47 = vmul.f32 %v2885_v42, %v2577_v55 }
 0x8c7   : > { %v2889_v39 = vpop.f32.mrf.mxu0 }
 0x8c8   : > { %v2979_v52 = vmul.f32 %v2889_v39, %v2578_v29 }
 0x8c9   : > { %v2891_v30 = vpop.f32.mrf.mxu0 }
 0x8ca   : > { %v2981_v41 = vadd.f32 %v2979_v52, %v2977_v62  ;;  %v2980_v31 = vmul.f32 %v2891_v30, %v2579_v46 }
 0x8cb   : > { %v2966_v15 = vpop.f32.mrf.mxu1 }
 0x8cc   : > { %v2982_v44 = vrot.slane %v2981_v41, 4  ;;  %v2988_v45 = vadd.f32 %v2980_v31, %v2978_v47  ;;  %v2995_v32 = vmul.f32 %v2966_v15, %v2576_v24 }
 0x8cd   : > { %v2968_v12 = vpop.f32.mrf.mxu1 }
 0x8ce   : > { %v2983_v43 = vadd.f32 %v2982_v44, %v2981_v41  ;;  %v2989_v8 = vrot.slane %v2988_v45, 4  ;;  %v2996_v33 = vmul.f32 %v2968_v12, %v2577_v55 }
 0x8cf   : > { %v2972_v57 = vpop.f32.mrf.mxu1 }
 0x8d0   : > { %v2984_v11 = vrot.slane %v2983_v43, 2  ;;  %v2990_v54 = vadd.f32 %v2989_v8, %v2988_v45  ;;  %v2997_v1 = vmul.f32 %v2972_v57, %v2578_v29 }
 0x8d1   : > { %v2974_v27 = vpop.f32.mrf.mxu1 }
 0x8d2   : > { %v2985_v51 = vadd.f32 %v2984_v11, %v2983_v43  ;;  %v2991_v39 = vrot.slane %v2990_v54, 2  ;;  %v2999_v26 = vadd.f32 %v2997_v1, %v2995_v32  ;;  %v2998_v48 = vmul.f32 %v2974_v27, %v2579_v46 }
 0x8d4   : > { %v2986_v42 = vrot.slane %v2985_v51, 1  ;;  %v2992_v62 = vadd.f32 %v2991_v39, %v2990_v54  ;;  %v3000_v30 = vrot.slane %v2999_v26, 4  ;;  %v3006_v52 = vadd.f32 %v2998_v48, %v2996_v33 }
 0x8d6   : > { %v2993_v34 = vrot.slane %v2992_v62, 1  ;;  %v3001_v47 = vadd.f32 %v3000_v30, %v2999_v26  ;;  %v3007_v31 = vrot.slane %v3006_v52, 4  ;;  %v2987_v41 = vadd.f32 %v2986_v42, %v2985_v51 }
 0x8d8   : > { %v2994_v44 = vadd.f32 %v2993_v34, %v2992_v62  ;;  %v3002_v49 = vrot.slane %v3001_v47, 2  ;;  %v3008_v50 = vadd.f32 %v3007_v31, %v3006_v52 }
 0x8da   : > { %v3015_v8 = vcombine.low %v2987_v41, %v2994_v44  ;;  %v3003_v24 = vadd.f32 %v3002_v49, %v3001_v47  ;;  %v3009_v29 = vrot.slane %v3008_v50, 2 }
 0x8dc   : > { %v3022_v55 = vrot.slane %v3015_v8, %v6349_v56  ;;  %v3004_v15 = vrot.slane %v3003_v24, 1  ;;  %v3010_v45 = vadd.f32 %v3009_v29, %v3008_v50 }
 0x8de   : > { %v7377_v46 = vadd.f32 %v3022_v55, %v7121_v19  ;;  %v3011_v54 = vrot.slane %v3010_v45, 1  ;;  %v3005_v12 = vadd.f32 %v3004_v15, %v3003_v24 }
 0x8e0   : > { %v3012_v48 = vadd.f32 %v3011_v54, %v3010_v45  ;;  %v3124_v33 = vrot.slane %v7377_v46, %v6006_v5  ;;  %v3120_v34 = vrot.slane %v7377_v46, %v5806_v22 }
 0x8e2   : > { %v3027_v43 = vcombine.low %v3005_v12, %v3012_v48  ;;  %v3134_v49 = vrot.slane %v3124_v33, %v5806_v22  ;;  %v3130_v57 = vrot.slane %v3120_v34, %v5806_v22 }
 0x8e4   : > { %v3034_v11 = vrot.slane %v3027_v43, %v6349_v56  ;;  %4629 = vmatprep.mubr.msk.f32.mxu0 %vm8340_vm3, %v3134_v49 }
 0x8e5   : > { %4630 = vmatmul.mubr.msk.f32.vlgmr.msra.gmra.mxu0 %vm8341_vm6, %v3130_v57 }
 0x8e6   : > { %v3035_v50 = vrot.slane %v3034_v11, 7  ;;  %4631 = vmatprep.mubr.msk.f32.mxu0 %vm8342_vm7, %v3134_v49 }
 0x8e8   : > { %v7393_v19 = vadd.f32 %v3035_v50, %v7135_v40 }
 0x8e9   : > { %4632 = vmatmul.mubr.msk.f32.gmra.mxu0 %vm8343_vm5, %v3130_v57 }
 0x8ea   : > { %v3222_v32 = vrot.slane %v7393_v19, %v6015_v18  ;;  %v3218_v1 = vrot.slane %v7393_v19, %v5809_v23  ;;  %v3042_v27 = vmul.f32 7.5, %v7393_v19  ;;  %3382 = vmatprep.mubr.f32.mxu0 %v8165_v35 }
 0x8ec   : > { %v3232_v51 = vrot.slane %v3222_v32, %v5809_v23  ;;  %v3228_v39 = vrot.slane %v3218_v1, %v5809_v23  ;;  %v3043_v40 = vadd.f32 %v3042_v27, %v6088_v4 }
 0x8ee   : > { %4665 = vmatprep.mubr.msk.f32.mxu1 %vm8340_vm3, %v3232_v51  ;;  %v3044_v26 = vmax.f32 %v3043_v40, 0.0  ;;  %vm8347_vm3 = vnez %v8056_v61 }
 0x8ef   : > { %4666 = vmatmul.mubr.msk.f32.vlgmr.msra.gmra.mxu1 %vm8341_vm6, %v3228_v39  ;;  %vm8346_vm6 = vnez %v8054_v60  ;;  %v8363_v60 = vld [vmem:[#allocation11_spill] sm:$0xff] }
 0x8f0   : > { %4667 = vmatprep.mubr.msk.f32.mxu1 %vm8342_vm7, %v3232_v51  ;;  %v3045_v42 = vmin.f32 %v3044_v26, 15.0  ;;  %vm8345_vm7 = vcmask 130048  }
 0x8f1   : > { %vm8349_vm12 = vmmov %vm8345_vm7 }
 0x8f2   : > { %v3089_v62 = vrot.slane %v3045_v42, %v6015_v18  ;;  %v3085_v30 = vrot.slane %v3045_v42, %v5809_v23 }
 0x8f3   : > { %4668 = vmatmul.mubr.msk.f32.gmra.mxu1 %vm8343_vm5, %v3228_v39  ;;  %vm8344_vm5 = vnez %v8052_v59 }
 0x8f4   : > { %v3099_v52 = vrot.slane %v3089_v62, %v5809_v23  ;;  %v3095_v47 = vrot.slane %v3085_v30, %v5809_v23  ;;  %3465 = vmatprep.mubr.f32.mxu1 %v8165_v35  ;;  %v8393_v62 = vld [vmem:[#allocation28_spill] sm:$0xff] }
 0x8f6   : > { %v3103_v31 = vsub.f32 %v5853_v38, %v3099_v52  ;;  %v3102_v41 = vsub.f32 %v5853_v38, %v3095_v47  ;;  %v3101_v44 = vsub.f32 %v5851_v37, %v3099_v52  ;;  %v3100_v8 = vsub.f32 %v5851_v37, %v3095_v47 }
 0x8f8   : > { %v3107_v24 = vand.u32 2147483647, %v3103_v31  ;;  %v3106_v29 = vand.u32 2147483647, %v3102_v41  ;;  %v3105_v55 = vand.u32 2147483647, %v3101_v44 }
 0x8f9   : > { %v3104_v15 = vand.u32 2147483647, %v3100_v8 }
 0x8fa   : > { %v3111_v45 = vsub.f32 1.0, %v3107_v24  ;;  %v3110_v54 = vsub.f32 1.0, %v3106_v29  ;;  %v3109_v12 = vsub.f32 1.0, %v3105_v55 }
 0x8fb   : > { %v3108_v48 = vsub.f32 1.0, %v3104_v15 }
 0x8fc   : > { %v3115_v33 = vmax.f32 %v3111_v45, 0.0  ;;  %v3114_v34 = vmax.f32 %v3110_v54, 0.0  ;;  %v3113_v43 = vmax.f32 %v3109_v12, 0.0 }
 0x8fd   : > { %v3112_v49 = vmax.f32 %v3108_v48, 0.0 }
 0x8fe   : > { %3346 = vmatprep.subr.mxu0 %v3115_v33  ;;  %3429 = vmatprep.subr.mxu1 %v3115_v33 }
 0x8ff   : > { %3347 = vmatpush1.msra.mxu0 %v3114_v34  ;;  %3430 = vmatpush1.msra.mxu1 %v3114_v34 }
 0x900   : > { %3348 = vmatprep.subr.mxu0 %v3113_v43  ;;  %3431 = vmatprep.subr.mxu1 %v3113_v43 }
 0x901   : > { %3349 = vmatpush1.msra.mxu0 %v3112_v49  ;;  %3432 = vmatpush1.msra.mxu1 %v3112_v49 }
 0x902   : > { %5213 = vmatprep.subr.msk.mxu0 %vm8344_vm5, %v8140_v36  ;;  %5251 = vmatprep.subr.msk.mxu1 %vm8344_vm5, %v8140_v36  ;;  %vm8348_vm5 = vnez %v8058_v0 }
 0x9a5   : > { %v5169_v57 = vpop.f32.mrf.mxu0 }
 0x9a7   : > { %v5170_v11 = vpop.f32.mrf.mxu0 }
 0x9a8   : > { %v5171_v50 = vadd.f32 %v5170_v11, %v5169_v57 }
 0x9a9   : > { %v5172_v32 = vpop.f32.mrf.mxu0 }
 0x9aa   : > { %4669 = vmatmul.mubr.msk.f32.vlgmr.msra.gmra.mxu0 %vm8345_vm7, %v5171_v50  ;;  %vm8350_vm7 = vnez %v8060_v2 }
 0x9ab   : > { %v5173_v1 = vpop.f32.mrf.mxu0  ;;  %3388 = vmatprep.mubr.f32.mxu0 %v8165_v35  ;;  %5214 = vmatpush3.msk.msra.mxu0 %vm8346_vm6, %v8140_v36 }
 0x9ac   : > { %v5174_v27 = vadd.f32 %v5173_v1, %v5172_v32  ;;  %5215 = vmatprep.subr.msk.mxu0 %vm8347_vm3, %v8140_v36 }
 0x9ad   : > { %5216 = vmatpush3.msk.msra.mxu0 %vm8348_vm5, %v8140_v36 }
 0x9ae   : > { %4670 = vmatmul.mubr.msk.f32.gmra.mxu0 %vm8349_vm12, %v5174_v27  ;;  %5217 = vmatprep.subr.msk.mxu0 %vm8350_vm7, %v8140_v36  ;;  %vm8352_vm12 = vnez %v8068_v58  ;;  %v8376_v58 = vld [vmem:[#allocation18_spill] sm:$0xff] }
 0x9af   : > { %v5207_v59 = vpop.f32.mrf.mxu1  ;;  %5218 = vmatpush3.msk.msra.mxu0 %vm8351_vm0, %v8140_v36 }
 0x9b0   : > { %5219 = vmatprep.subr.msk.mxu0 %vm8300_vm11, %v8140_v36 }
 0x9b1   : > { %v5208_v51 = vpop.f32.mrf.mxu1  ;;  %5220 = vmatpush3.msk.msra.mxu0 %vm8301_vm4, %v8140_v36 }
 0x9b2   : > { %v5209_v39 = vadd.f32 %v5208_v51, %v5207_v59  ;;  %5221 = vmatprep.subr.msk.mxu0 %vm8352_vm12, %v8140_v36 }
 0x9b3   : > { %v5210_v40 = vpop.f32.mrf.mxu1  ;;  %5222 = vmatpush3.msk.msra.mxu0 %vm8353_vm8, %v8140_v36 }
 0x9b4   : > { %4671 = vmatmul.mubr.msk.f32.vlgmr.msra.gmra.mxu1 %vm8354_vm13, %v5209_v39  ;;  %5223 = vmatprep.subr.msk.mxu0 %vm8355_vm14, %v8140_v36  ;;  %vm8358_vm13 = vnez %v8078_v17  ;;  %vm8359_vm14 = vcmask 130048   ;;  %v8387_v17 = vld [vmem:[#allocation22_spill] sm:$0xff] }
 0x9b5   : > { %v5211_v26 = vpop.f32.mrf.mxu1  ;;  %3471 = vmatprep.mubr.f32.mxu1 %v8165_v35  ;;  %5224 = vmatpush3.msk.msra.mxu0 %vm8356_vm10, %v8140_v36  ;;  %vm8360_vm10 = vnez %v8080_v21  ;;  %v8389_v21 = vld [vmem:[#allocation25_spill] sm:$0xff] }
 0x9b6   : > { %v5212_v42 = vadd.f32 %v5211_v26, %v5210_v40  ;;  %5225 = vmatprep.subr.msk.mxu0 %vm8357_vm15, %v8140_v36  ;;  %5252 = vmatpush3.msk.msra.mxu1 %vm8346_vm6, %v8140_v36  ;;  %vm8361_vm15 = vnez %v8082_v25  ;;  %vm8362_vm6 = vnez %v8084_v20  ;;  %v8391_v25 = vld [vmem:[#allocation24_spill] sm:$0xff]  ;;  %v3038_v20 = vmul.f32 7.5, %v7377_v46 }
 0x9b7   : > { %5226 = vmatpush3.msk.msra.mxu0 %vm8358_vm13, %v8140_v36  ;;  %5253 = vmatprep.subr.msk.mxu1 %vm8347_vm3, %v8140_v36  ;;  %vm8364_vm3 = vnez %v8363_v60 }
 0x9b8   : > { %4672 = vmatmul.mubr.msk.f32.gmra.mxu1 %vm8359_vm14, %v5212_v42  ;;  %5227 = vmatprep.subr.msk.mxu0 %vm8360_vm10, %v8140_v36  ;;  %vm8374_vm14 = vnez %v8373_v7  ;;  %v3039_v30 = vadd.f32 %v3038_v20, %v8393_v62 }
 0x9b9   : > { %5228 = vmatpush3.msk.msra.mxu0 %vm8361_vm15, %v8140_v36  ;;  %5254 = vmatpush3.msk.msra.mxu1 %vm8348_vm5, %v8140_v36  ;;  %vm8375_vm5 = vnez %v8074_v13  ;;  %v8383_v13 = vld [vmem:[#allocation21_spill] sm:$0xff] }
 0x9ba   : > { %5229 = vmatprep.subr.msk.mxu0 %vm8362_vm6, %v8140_v36  ;;  %5255 = vmatprep.subr.msk.mxu1 %vm8350_vm7, %v8140_v36  ;;  %vm8377_vm7 = vnez %v8376_v58  ;;  %v3040_v52 = vmax.f32 %v3039_v30, 0.0 }
 0x9bb   : > { %5230 = vmatpush3.msk.msra.mxu0 %vm8364_vm3, %v8140_v36  ;;  %5256 = vmatpush3.msk.msra.mxu1 %vm8351_vm0, %v8140_v36  ;;  %vm8369_vm0 = vnez %v8368_v3 }
 0x9bc   : > { %5231 = vmatprep.subr.msk.mxu0 %vm8314_vm1, %v8140_v36  ;;  %5257 = vmatprep.subr.msk.mxu1 %vm8300_vm11, %v8140_v36  ;;  %vm8371_vm11 = vnez %v8370_v6  ;;  %v3041_v47 = vmin.f32 %v3040_v52, 15.0 }
 0x9bd   : > { %5232 = vmatpush3.msk.msra.mxu0 %vm8316_vm2, %v8140_v36  ;;  %5258 = vmatpush3.msk.msra.mxu1 %vm8301_vm4, %v8140_v36  ;;  %vm8372_vm4 = vnez %v8072_v10  ;;  %v8381_v10 = vld [vmem:[#allocation20_spill] sm:$0xff] }
 0x9be   : > { %5233 = vmatprep.subr.msk.mxu0 %vm8268_vm9, %v8140_v36  ;;  %5259 = vmatprep.subr.msk.mxu1 %vm8352_vm12, %v8140_v36  ;;  %vm8380_vm12 = vnez %v8379_v9  ;;  %v3050_v31 = vrot.slane %v3041_v47, %v5806_v22  ;;  %v3054_v41 = vrot.slane %v3041_v47, %v6006_v5 }
 0x9bf   : > { %5234 = vmatpush3.msk.msra.mxu0 %vm8369_vm0, %v8140_v36  ;;  %5260 = vmatpush3.msk.msra.mxu1 %vm8353_vm8, %v8140_v36  ;;  %vm8378_vm8 = vnez %v8076_v14  ;;  %v8385_v14 = vld [vmem:[#allocation23_spill] sm:$0xff] }
 0x9c0   : > { %5235 = vmatprep.subr.msk.mxu0 %vm8371_vm11, %v8140_v36  ;;  %5261 = vmatprep.subr.msk.mxu1 %vm8372_vm4, %v8140_v36  ;;  %vm8382_vm4 = vnez %v8381_v10  ;;  %v3060_v44 = vrot.slane %v3050_v31, %v5806_v22  ;;  %v3064_v8 = vrot.slane %v3054_v41, %v5806_v22 }
 0x9c1   : > { %5236 = vmatpush3.msk.msra.mxu0 %vm8374_vm14, %v8140_v36  ;;  %5262 = vmatpush3.msk.msra.mxu1 %vm8375_vm5, %v8140_v36  ;;  %vm8384_vm5 = vnez %v8383_v13 }
 0x9c2   : > { %5237 = vmatprep.subr.msk.mxu0 %vm8377_vm7, %v8140_v36  ;;  %5263 = vmatprep.subr.msk.mxu1 %vm8378_vm8, %v8140_v36  ;;  %vm8386_vm8 = vnez %v8385_v14  ;;  %v3065_v24 = vsub.f32 %v5851_v37, %v3060_v44  ;;  %v3067_v29 = vsub.f32 %v5853_v38, %v3060_v44  ;;  %v3068_v55 = vsub.f32 %v5853_v38, %v3064_v8 }
 0x9c3   : > { %5238 = vmatpush3.msk.msra.mxu0 %vm8380_vm12, %v8140_v36  ;;  %5264 = vmatpush3.msk.msra.mxu1 %vm8358_vm13, %v8140_v36  ;;  %vm8388_vm13 = vnez %v8387_v17 }
 0x9c4   : > { %5239 = vmatprep.subr.msk.mxu0 %vm8382_vm4, %v8140_v36  ;;  %5265 = vmatprep.subr.msk.mxu1 %vm8360_vm10, %v8140_v36  ;;  %vm8390_vm10 = vnez %v8389_v21  ;;  %v3069_v15 = vand.u32 2147483647, %v3065_v24  ;;  %v3071_v45 = vand.u32 2147483647, %v3067_v29  ;;  %v3072_v12 = vand.u32 2147483647, %v3068_v55 }
 0x9c5   : > { %5240 = vmatpush3.msk.msra.mxu0 %vm8384_vm5, %v8140_v36  ;;  %5266 = vmatpush3.msk.msra.mxu1 %vm8361_vm15, %v8140_v36  ;;  %vm8392_vm15 = vnez %v8391_v25 }
 0x9c6   : > { %5241 = vmatprep.subr.msk.mxu0 %vm8386_vm8, %v8140_v36  ;;  %5267 = vmatprep.subr.msk.mxu1 %vm8362_vm6, %v8140_v36  ;;  %v3073_v48 = vsub.f32 1.0, %v3069_v15  ;;  %v3075_v33 = vsub.f32 1.0, %v3071_v45  ;;  %v3076_v49 = vsub.f32 1.0, %v3072_v12  ;;  %vm8397_vm6 = vnez %v8163_v63 }
 0x9c7   : > { %5242 = vmatpush3.msk.msra.mxu0 %vm8388_vm13, %v8140_v36  ;;  %5268 = vmatpush3.msk.msra.mxu1 %vm8364_vm3, %v8140_v36  ;;  %vm8398_vm3 = vcmask 130048  }
 0x9c8   : > { %5243 = vmatprep.subr.msk.mxu0 %vm8390_vm10, %v8140_v36  ;;  %5269 = vmatprep.subr.msk.mxu1 %vm8314_vm1, %v8140_v36  ;;  %v3077_v11 = vmax.f32 %v3073_v48, 0.0  ;;  %v3079_v50 = vmax.f32 %v3075_v33, 0.0  ;;  %v3080_v51 = vmax.f32 %v3076_v49, 0.0  ;;  %vm8394_vm1 = vnez %v8110_v53 }
 0x9c9   : > { %5244 = vmatpush3.msk.msra.mxu0 %vm8392_vm15, %v8140_v36  ;;  %5270 = vmatpush3.msk.msra.mxu1 %vm8316_vm2, %v8140_v36  ;;  %vm8396_vm2 = vnez %v8162_v28 }
 0x9ca   : > { %5271 = vmatprep.subr.msk.mxu1 %vm8268_vm9, %v8140_v36  ;;  %vm8395_vm9 = vnez %v8133_v16 }
 0x9cb   : > { %5272 = vmatpush3.msk.msra.mxu1 %vm8369_vm0, %v8140_v36  ;;  %vm8399_vm0 = vmmov %vm8398_vm3 }
 0x9cc   : > { %5273 = vmatprep.subr.msk.mxu1 %vm8371_vm11, %v8140_v36  ;;  %vm8400_vm11 = vmmov %vm8399_vm0 }
 0x9cd   : > { %5274 = vmatpush3.msk.msra.mxu1 %vm8374_vm14, %v8140_v36  ;;  %vm8401_vm14 = vmmov %vm8399_vm0 }
 0x9ce   : > { %5275 = vmatprep.subr.msk.mxu1 %vm8377_vm7, %v8140_v36  ;;  %vm4062_vm7 = vcmask 1040384  }
 0x9cf   : > { %5276 = vmatpush3.msk.msra.mxu1 %vm8380_vm12, %v8140_v36 }
 0x9d0   : > { %5277 = vmatprep.subr.msk.mxu1 %vm8382_vm4, %v8140_v36 }
 0x9d1   : > { %5278 = vmatpush3.msk.msra.mxu1 %vm8384_vm5, %v8140_v36 }
 0x9d2   : > { %5279 = vmatprep.subr.msk.mxu1 %vm8386_vm8, %v8140_v36 }
 0x9d3   : > { %5280 = vmatpush3.msk.msra.mxu1 %vm8388_vm13, %v8140_v36 }
 0x9d4   : > { %5281 = vmatprep.subr.msk.mxu1 %vm8390_vm10, %v8140_v36 }
 0x9d5   : > { %5282 = vmatpush3.msk.msra.mxu1 %vm8392_vm15, %v8140_v36  ;;  %v3066_v36 = vsub.f32 %v5851_v37, %v3064_v8 }
 0x9d7   : > { %v3070_v54 = vand.u32 2147483647, %v3066_v36 }
 0x9d9   : > { %v3074_v43 = vsub.f32 1.0, %v3070_v54 }
 0x9db   : > { %v3078_v27 = vmax.f32 %v3074_v43, 0.0 }
 0xa6a   : > { %v3384_v34 = vpop.f32.mrf.mxu0 }
 0xa6b   : > { %v3478_v1 = vmul.f32 %v3384_v34, %v3077_v11 }
 0xa6c   : > { %v3386_v57 = vpop.f32.mrf.mxu0 }
 0xa6d   : > { %v3479_v40 = vmul.f32 %v3386_v57, %v3078_v27 }
 0xa6e   : > { %v3390_v32 = vpop.f32.mrf.mxu0 }
 0xa6f   : > { %v3480_v59 = vmul.f32 %v3390_v32, %v3079_v50 }
 0xa70   : > { %v3392_v39 = vpop.f32.mrf.mxu0 }
 0xa71   : > { %v3482_v26 = vadd.f32 %v3480_v59, %v3478_v1  ;;  %v3481_v42 = vmul.f32 %v3392_v39, %v3080_v51 }
 0xa73   : > { %v3483_v60 = vrot.slane %v3482_v26, 4  ;;  %v3489_v61 = vadd.f32 %v3481_v42, %v3479_v40 }
 0xa74   : > { %v3467_v0 = vpop.f32.mrf.mxu1 }
 0xa75   : > { %v3484_v2 = vadd.f32 %v3483_v60, %v3482_v26  ;;  %v3490_v3 = vrot.slane %v3489_v61, 4  ;;  %v3496_v14 = vmul.f32 %v3467_v0, %v3077_v11 }
 0xa76   : > { %v3469_v6 = vpop.f32.mrf.mxu1 }
 0xa77   : > { %v3485_v7 = vrot.slane %v3484_v2, 2  ;;  %v3491_v58 = vadd.f32 %v3490_v3, %v3489_v61  ;;  %v3497_v21 = vmul.f32 %v3469_v6, %v3078_v27 }
 0xa78   : > { %v3473_v9 = vpop.f32.mrf.mxu1 }
 0xa79   : > { %v3486_v10 = vadd.f32 %v3485_v7, %v3484_v2  ;;  %v3492_v13 = vrot.slane %v3491_v58, 2  ;;  %v3498_v17 = vmul.f32 %v3473_v9, %v3079_v50 }
 0xa7a   : > { %v3475_v25 = vpop.f32.mrf.mxu1 }
 0xa7b   : > { %v3487_v20 = vrot.slane %v3486_v10, 1  ;;  %v3493_v30 = vadd.f32 %v3492_v13, %v3491_v58  ;;  %v3500_v52 = vadd.f32 %v3498_v17, %v3496_v14  ;;  %v3499_v47 = vmul.f32 %v3475_v25, %v3080_v51 }
 0xa7d   : > { %v3494_v31 = vrot.slane %v3493_v30, 1  ;;  %v3501_v41 = vrot.slane %v3500_v52, 4  ;;  %v3507_v44 = vadd.f32 %v3499_v47, %v3497_v21  ;;  %v3488_v8 = vadd.f32 %v3487_v20, %v3486_v10 }
 0xa7f   : > { %v3495_v24 = vadd.f32 %v3494_v31, %v3493_v30  ;;  %v3502_v29 = vadd.f32 %v3501_v41, %v3500_v52  ;;  %v3508_v36 = vrot.slane %v3507_v44, 4 }
 0xa81   : > { %v3516_v55 = vcombine.low %v3488_v8, %v3495_v24  ;;  %v3503_v15 = vrot.slane %v3502_v29, 2  ;;  %v3509_v45 = vadd.f32 %v3508_v36, %v3507_v44 }
 0xa83   : > { %v3523_v54 = vrot.slane %v3516_v55, %v6349_v56  ;;  %v3504_v12 = vadd.f32 %v3503_v15, %v3502_v29  ;;  %v3510_v48 = vrot.slane %v3509_v45, 2 }
 0xa85   : > { %v7633_v33 = vadd.f32 %v3523_v54, %v7377_v46  ;;  %v3505_v34 = vrot.slane %v3504_v12, 1  ;;  %v3511_v43 = vadd.f32 %v3510_v48, %v3509_v45 }
 0xa87   : > { %v3512_v49 = vrot.slane %v3511_v43, 1  ;;  %v3625_v57 = vrot.slane %v7633_v33, %v6006_v5  ;;  %v3621_v11 = vrot.slane %v7633_v33, %v5806_v22  ;;  %v3506_v50 = vadd.f32 %v3505_v34, %v3504_v12 }
 0xa88   : > { %v3539_v48 = vmul.f32 7.5, %v7633_v33 }
 0xa89   : > { %v3513_v32 = vadd.f32 %v3512_v49, %v3511_v43  ;;  %v3635_v1 = vrot.slane %v3625_v57, %v5806_v22  ;;  %v3631_v27 = vrot.slane %v3621_v11, %v5806_v22 }
 0xa8a   : > { %v3540_v34 = vadd.f32 %v3539_v48, %v8393_v62 }
 0xa8b   : > { %v3528_v59 = vcombine.low %v3506_v50, %v3513_v32  ;;  %4705 = vmatprep.mubr.msk.f32.mxu0 %vm8394_vm1, %v3635_v1 }
 0xa8c   : > { %4706 = vmatmul.mubr.msk.f32.vlgmr.msra.gmra.mxu0 %vm8395_vm9, %v3631_v27  ;;  %v3541_v43 = vmax.f32 %v3540_v34, 0.0 }
 0xa8d   : > { %v3535_v46 = vrot.slane %v3528_v59, %v6349_v56  ;;  %4707 = vmatprep.mubr.msk.f32.mxu0 %vm8396_vm2, %v3635_v1 }
 0xa8e   : > { %v3542_v49 = vmin.f32 %v3541_v43, 15.0 }
 0xa8f   : > { %v3536_v51 = vrot.slane %v3535_v46, 7 }
 0xa90   : > { %4708 = vmatmul.mubr.msk.f32.gmra.mxu0 %vm8397_vm6, %v3631_v27  ;;  %v3551_v57 = vrot.slane %v3542_v49, %v5806_v22  ;;  %v3555_v11 = vrot.slane %v3542_v49, %v6006_v5 }
 0xa91   : > { %v7651_v39 = vadd.f32 %v3536_v51, %v7393_v19  ;;  %3883 = vmatprep.mubr.f32.mxu0 %v8165_v35 }
 0xa92   : > { %v3561_v50 = vrot.slane %v3551_v57, %v5806_v22  ;;  %v3565_v32 = vrot.slane %v3555_v11, %v5806_v22 }
 0xa93   : > { %v3723_v40 = vrot.slane %v7651_v39, %v6015_v18  ;;  %v3719_v26 = vrot.slane %v7651_v39, %v5809_v23  ;;  %v3543_v42 = vmul.f32 7.5, %v7651_v39 }
 0xa94   : > { %v3566_v1 = vsub.f32 %v5851_v37, %v3561_v50  ;;  %v3567_v27 = vsub.f32 %v5851_v37, %v3565_v32  ;;  %v3569_v59 = vsub.f32 %v5853_v38, %v3565_v32 }
 0xa95   : > { %v3733_v60 = vrot.slane %v3723_v40, %v5809_v23  ;;  %v3729_v61 = vrot.slane %v3719_v26, %v5809_v23  ;;  %v3544_v0 = vadd.f32 %v3543_v42, %v6088_v4 }
 0xa96   : > { %v3570_v46 = vand.u32 2147483647, %v3566_v1  ;;  %v3571_v51 = vand.u32 2147483647, %v3567_v27  ;;  %v3573_v40 = vand.u32 2147483647, %v3569_v59 }
 0xa97   : > { %4741 = vmatprep.mubr.msk.f32.mxu1 %vm8394_vm1, %v3733_v60  ;;  %v3545_v19 = vmax.f32 %v3544_v0, 0.0 }
 0xa98   : > { %4742 = vmatmul.mubr.msk.f32.vlgmr.msra.gmra.mxu1 %vm8395_vm9, %v3729_v61  ;;  %v3574_v26 = vsub.f32 1.0, %v3570_v46  ;;  %v3577_v0 = vsub.f32 1.0, %v3573_v40 }
 0xa99   : > { %4743 = vmatprep.mubr.msk.f32.mxu1 %vm8396_vm2, %v3733_v60  ;;  %v3546_v2 = vmin.f32 %v3545_v19, 15.0 }
 0xa9b   : > { %v3590_v3 = vrot.slane %v3546_v2, %v6015_v18  ;;  %v3586_v6 = vrot.slane %v3546_v2, %v5809_v23  ;;  %v3578_v2 = vmax.f32 %v3574_v26, 0.0 }
 0xa9c   : > { %4744 = vmatmul.mubr.msk.f32.gmra.mxu1 %vm8397_vm6, %v3729_v61  ;;  %v3575_v61 = vsub.f32 1.0, %v3571_v51 }
 0xa9d   : > { %v3600_v4 = vrot.slane %v3590_v3, %v5809_v23  ;;  %v3596_v53 = vrot.slane %v3586_v6, %v5809_v23  ;;  %3966 = vmatprep.mubr.f32.mxu1 %v8165_v35 }
 0xa9f   : > { %v3604_v16 = vsub.f32 %v5853_v38, %v3600_v4  ;;  %v3603_v7 = vsub.f32 %v5853_v38, %v3596_v53  ;;  %v3602_v28 = vsub.f32 %v5851_v37, %v3600_v4  ;;  %v3601_v58 = vsub.f32 %v5851_v37, %v3596_v53 }
 0xaa0   : > { %v3579_v53 = vmax.f32 %v3575_v61, 0.0 }
 0xaa1   : > { %v3608_v9 = vand.u32 2147483647, %v3604_v16  ;;  %v3607_v10 = vand.u32 2147483647, %v3603_v7  ;;  %v3606_v13 = vand.u32 2147483647, %v3602_v28 }
 0xaa2   : > { %v3605_v14 = vand.u32 2147483647, %v3601_v58  ;;  %v3581_v7 = vmax.f32 %v3577_v0, 0.0 }
 0xaa3   : > { %v3612_v63 = vsub.f32 1.0, %v3608_v9  ;;  %v3611_v17 = vsub.f32 1.0, %v3607_v10  ;;  %v3610_v21 = vsub.f32 1.0, %v3606_v13 }
 0xaa4   : > { %v3609_v25 = vsub.f32 1.0, %v3605_v14 }
 0xaa5   : > { %v3616_v20 = vmax.f32 %v3612_v63, 0.0  ;;  %v3615_v30 = vmax.f32 %v3611_v17, 0.0  ;;  %v3614_v52 = vmax.f32 %v3610_v21, 0.0 }
 0xaa6   : > { %v3613_v47 = vmax.f32 %v3609_v25, 0.0 }
 0xaa7   : > { %3847 = vmatprep.subr.mxu0 %v3616_v20  ;;  %3930 = vmatprep.subr.mxu1 %v3616_v20 }
 0xaa8   : > { %3848 = vmatpush1.msra.mxu0 %v3615_v30  ;;  %3931 = vmatpush1.msra.mxu1 %v3615_v30 }
 0xaa9   : > { %3849 = vmatprep.subr.mxu0 %v3614_v52  ;;  %3932 = vmatprep.subr.mxu1 %v3614_v52 }
 0xaaa   : > { %3850 = vmatpush1.msra.mxu0 %v3613_v47  ;;  %3933 = vmatpush1.msra.mxu1 %v3613_v47 }
 0xb4c   : > { %v5245_v31 = vpop.f32.mrf.mxu0 }
 0xb4e   : > { %v5246_v41 = vpop.f32.mrf.mxu0 }
 0xb4f   : > { %v5247_v44 = vadd.f32 %v5246_v41, %v5245_v31 }
 0xb50   : > { %v5248_v8 = vpop.f32.mrf.mxu0 }
 0xb51   : > { %4745 = vmatmul.mubr.msk.f32.vlgmr.msra.gmra.mxu0 %vm8398_vm3, %v5247_v44 }
 0xb52   : > { %v5249_v24 = vpop.f32.mrf.mxu0  ;;  %3889 = vmatprep.mubr.f32.mxu0 %v8165_v35 }
 0xb53   : > { %v5250_v29 = vadd.f32 %v5249_v24, %v5248_v8 }
 0xb55   : > { %4746 = vmatmul.mubr.msk.f32.gmra.mxu0 %vm8399_vm0, %v5250_v29 }
 0xb58   : > { %v5283_v36 = vpop.f32.mrf.mxu1 }
 0xb5a   : > { %v5284_v55 = vpop.f32.mrf.mxu1 }
 0xb5b   : > { %v5285_v15 = vadd.f32 %v5284_v55, %v5283_v36 }
 0xb5c   : > { %v5286_v45 = vpop.f32.mrf.mxu1 }
 0xb5d   : > { %4747 = vmatmul.mubr.msk.f32.vlgmr.msra.gmra.mxu1 %vm8400_vm11, %v5285_v15 }
 0xb5e   : > { %v5287_v54 = vpop.f32.mrf.mxu1  ;;  %3972 = vmatprep.mubr.f32.mxu1 %v8165_v35  ;;  %v3568_v35 = vsub.f32 %v5853_v38, %v3561_v50 }
 0xb5f   : > { %v5288_v12 = vadd.f32 %v5287_v54, %v5286_v45 }
 0xb60   : > { %v3572_v62 = vand.u32 2147483647, %v3568_v35 }
 0xb61   : > { %4748 = vmatmul.mubr.msk.f32.gmra.mxu1 %vm8401_vm14, %v5288_v12 }
 0xb62   : > { %v3576_v42 = vsub.f32 1.0, %v3572_v62 }
 0xb64   : > { %v3580_v3 = vmax.f32 %v3576_v42, 0.0 }
 0xc11   : > { %v3885_v60 = vpop.f32.mrf.mxu0 }
 0xc12   : > { %v3979_v4 = vmul.f32 %v3885_v60, %v3578_v2 }
 0xc13   : > { %v3887_v19 = vpop.f32.mrf.mxu0 }
 0xc14   : > { %v3980_v28 = vmul.f32 %v3887_v19, %v3579_v53 }
 0xc15   : > { %v3891_v6 = vpop.f32.mrf.mxu0 }
 0xc16   : > { %v3981_v16 = vmul.f32 %v3891_v6, %v3580_v3 }
 0xc17   : > { %v3893_v37 = vpop.f32.mrf.mxu0 }
 0xc18   : > { %v3983_v38 = vadd.f32 %v3981_v16, %v3979_v4  ;;  %v3982_v58 = vmul.f32 %v3893_v37, %v3581_v7 }
 0xc1a   : > { %v3984_v9 = vrot.slane %v3983_v38, 4  ;;  %v3990_v10 = vadd.f32 %v3982_v58, %v3980_v28 }
 0xc1c   : > { %v3991_v13 = vrot.slane %v3990_v10, 4  ;;  %v3985_v63 = vadd.f32 %v3984_v9, %v3983_v38 }
 0xc1d   : > { %v3968_v14 = vpop.f32.mrf.mxu1 }
 0xc1e   : > { %v3992_v17 = vadd.f32 %v3991_v13, %v3990_v10  ;;  %v3986_v30 = vrot.slane %v3985_v63, 2  ;;  %v3997_v52 = vmul.f32 %v3968_v14, %v3578_v2 }
 0xc1f   : > { %v3970_v21 = vpop.f32.mrf.mxu1 }
 0xc20   : > { %v3993_v25 = vrot.slane %v3992_v17, 2  ;;  %v3998_v44 = vmul.f32 %v3970_v21, %v3579_v53  ;;  %v3987_v29 = vadd.f32 %v3986_v30, %v3985_v63 }
 0xc21   : > { %v3974_v20 = vpop.f32.mrf.mxu1 }
 0xc22   : > { %v3999_v47 = vmul.f32 %v3974_v20, %v3580_v3  ;;  %v3994_v41 = vadd.f32 %v3993_v25, %v3992_v17  ;;  %v3988_v12 = vrot.slane %v3987_v29, 1 }
 0xc23   : > { %v3976_v31 = vpop.f32.mrf.mxu1 }
 0xc24   : > { %v4001_v8 = vadd.f32 %v3999_v47, %v3997_v52  ;;  %v4000_v24 = vmul.f32 %v3976_v31, %v3581_v7  ;;  %v3995_v15 = vrot.slane %v3994_v41, 1  ;;  %v3989_v11 = vadd.f32 %v3988_v12, %v3987_v29 }
 0xc26   : > { %v4002_v36 = vrot.slane %v4001_v8, 4  ;;  %v4008_v55 = vadd.f32 %v4000_v24, %v3998_v44  ;;  %v3996_v43 = vadd.f32 %v3995_v15, %v3994_v41 }
 0xc28   : > { %v4003_v45 = vadd.f32 %v4002_v36, %v4001_v8  ;;  %v4009_v54 = vrot.slane %v4008_v55, 4  ;;  %v4017_v1 = vcombine.low %v3989_v11, %v3996_v43 }
 0xc2a   : > { %v4004_v48 = vrot.slane %v4003_v45, 2  ;;  %v4010_v34 = vadd.f32 %v4009_v54, %v4008_v55  ;;  %v4024_v46 = vrot.slane %v4017_v1, %v6349_v56 }
 0xc2c   : > { %v4005_v49 = vadd.f32 %v4004_v48, %v4003_v45  ;;  %v4011_v57 = vrot.slane %v4010_v34, 2  ;;  %v4026_v40 = vadd.f32 %v4024_v46, %v7633_v33 }
 0xc2e   : > { %v4006_v50 = vrot.slane %v4005_v49, 1  ;;  %v4012_v32 = vadd.f32 %v4011_v57, %v4010_v34  ;;  %v4044_v60 = vrot.slane %v4026_v40, %v5806_v22  ;;  %v4048_v61 = vrot.slane %v4026_v40, %v6006_v5 }
 0xc30   : > { %v4013_v35 = vrot.slane %v4012_v32, 1  ;;  %v4007_v27 = vadd.f32 %v4006_v50, %v4005_v49 }
 0xc32   : > { %v4014_v59 = vadd.f32 %v4013_v35, %v4012_v32 }
 0xc34   : > { %v4029_v62 = vcombine.low %v4007_v27, %v4014_v59 }
 0xc36   : > { %v4036_v51 = vrot.slane %v4029_v62, %v6349_v56 }
 0xc38   : > { %v4037_v26 = vrot.slane %v4036_v51, 7 }
 0xc3a   : > { %v4039_v42 = vadd.f32 %v4037_v26, %v7651_v39 }
 0xc3c   : > { %v4055_v0 = vrot.slane %v4039_v42, %v5809_v23  ;;  %v4059_v19 = vrot.slane %v4039_v42, %v6015_v18 }
 0xc3e   : > { %v4063_v56 = vsel %vm4062_vm7, %v4044_v60, %v4055_v0  ;;  %v4064_v33 = vsel %vm4062_vm7, %v4048_v61, %v4059_v19 }
 0xc3f   : > { %v4067_v2 = vcombine.low %v4063_v56, %v4064_v33 }
 0xc41   : > { %4749 = vst.sshfl [vmem:[%s172_s17] sm:$0x33 pattern:$0x76325410] %v4067_v2 }
 0xc42   : > { %5417 = shalt.err (!%p5414_p3)
}
 0xc43   : > { %s5418_s26 = scalar_lea.hbm %s4090_s21, 64  ;;  %s5422_s3 = scalar_lea.hbm %s7742_s2, 128 }
 0xc44   : > { %p5419_p12 = scmp.ne.s32.totalorder %s4090_s21, %s5418_s26  ;;  %p5423_p10 = scmp.lt.s32.totalorder %s4090_s21, %s7742_s2 }
 0xc45   : > { %p5424_p6 = scmp.lt.s32.totalorder %s5422_s3, %s5418_s26 }
 0xc46   : > { %p5420_p5 = pnand %p5419_p12, %p8402_p9 }
 0xc47   : > { %p5425_p4 = por %p5424_p6, %p5423_p10 }
 0xc48   : > { %p5421_p7 = pneg %p5420_p5 }
 0xc4a   : > { %p5426_p8 = pnand %p5425_p4, %p5421_p7 }
 0xc4c   : > { %5429 = shalt.err (!%p5426_p8)
}
 0xc4d   : > { %5295 = dma.vmem_to_hbm [thread:$0]  (%p8402_p9), %s4093_s14, 64, %s4090_s21, %s4078_s22  }
 0xc4e PF: > { %s4104_s6 = sand.u32 1, %s5460_s9   ;;  %p8403_p11 = scmp.ne.s32.totalorder %s8040_s16, 0 }
 0xc4f   : > { %p8404_p13 = scmp.ge.s32.totalorder %s5472_s12, 2  ;;  %s4105_s8 = scalar_lea.sflag [#allocation4], %s4104_s6 }
 0xc51   : > { %p5306_p1 = pnand %p8404_p13, %p8403_p11 }
 0xc53   : > { %p5307_p2 = pneg %p5306_p1 }
 0xc55   : > { %5455 = dma.done.wait (%p5307_p2), %s4105_s8, 64  }
 0xc56   : > { %5457 = vsyncadd (%p5307_p2), %s4105_s8, 4294967232  ;;  %p16_p0 = scmp.ge.s32.totalorder %s5544_s20, 4   ;;  %s8405_s9 = smov %s5464_s10 }
 0xc57   : > { %s8406_s10 = smov %s5468_s11  ;;  %s8407_s11 = smov %s5571_s28 }
 0xc58   : > { %s8408_s12 = smov %s5544_s20  ;;  %18 = sbr.rel (!%p16_p0) target bundleno = 6 (0x6), region = 79 }
 0xc5d   :  { %4110 = vsyncpa [#allocation3], 1 }
 0xc5e   :  { %4112 = vsyncpa [#allocation3 + $0x1], 1 }
 0xc5f   :  { %4113 = vsyncpa [#allocation6], 1 }
 0xc60   :  { %4115 = vsyncpa [#allocation6 + $0x1], 1 }
 0xc61   :  { %4116 = vsyncpa [#allocation4], 1 }
 0xc62   :  { %4118 = vsyncpa [#allocation4 + $0x1], 1 }

</bundles_post_ra>
